<compile_context>
chip_gen: v6e
topology: v6e:2x2x1
jax: 0.10.0
libtpu: 0.0.40
codegen_flags: <defaults>
</compile_context>

<pallas_src>
import functools
import math

import jax
import jax.numpy as jnp
from jax.experimental import pallas as pl
from jax.experimental.pallas import tpu as pltpu

_LANE = 128
_SUBLANE = 8


def _round_up(n, m):
    return ((n + m - 1) // m) * m


# --- exact-gelu epilogue ----------------------------------------------------
# gelu(x) = 0.5*x*(1 + erf(x/sqrt(2))), erf via Abramowitz-Stegun 7.1.26
# (|err| < 1.5e-7 with an exact reciprocal).  The 1/sqrt(2) argument scaling
# and the 0.5 gelu factor are folded into the coefficients, and the
# sign/select chain is replaced by the identity
#     gelu(x) = 0.5*x + |x| * (0.5 - polyh(t) * exp(-x*x/2)),
#     t = 1 / (1 + P*|x|)
# so the whole epilogue is abs/fma chains on the VPU plus exp + approximate
# reciprocal on the EUP slot.
_INV_SQRT2 = 0.7071067811865476
_P = 0.3275911 * _INV_SQRT2
_A1 = 0.5 * 0.254829592
_A2 = 0.5 * -0.284496736
_A3 = 0.5 * 1.421413741
_A4 = 0.5 * -1.453152027
_A5 = 0.5 * 1.061405429


def _gelu_exact(x):
    ax = jnp.abs(x)
    t = pl.reciprocal(1.0 + _P * ax, approx=True)          # EUP
    polyh = ((((_A5 * t + _A4) * t + _A3) * t + _A2) * t + _A1) * t
    e = jnp.exp(-0.5 * x * x)                               # EUP
    return 0.5 * x + ax * (0.5 - polyh * e)


# --- kernel -----------------------------------------------------------------
def _gated_mlp_kernel(x_ref, wgv_ref, ws_ref, o_ref, *acc, n_h):
    th = wgv_ref.shape[1] // 2                  # gate / value halves of tile

    # Single grow matmul per step: columns are [gate tile | value tile].
    gv = jnp.dot(x_ref[...], wgv_ref[...], preferred_element_type=jnp.float32)
    hidden = _gelu_exact(gv[:, :th]) * gv[:, th:]            # (tm, th) f32

    # Shrink contribution of this hidden tile (cast back to stream dtype so
    # the MXU runs native bf16 when weights are bf16; accumulate in f32).
    contrib = jnp.dot(hidden.astype(ws_ref.dtype), ws_ref[...],
                      preferred_element_type=jnp.float32)

    if n_h == 1:
        # Whole hidden dim in one step: no accumulator needed at all.
        o_ref[...] = contrib.astype(o_ref.dtype)
        return

    acc_ref = acc[0]
    h = pl.program_id(1)

    @pl.when(h == 0)
    def _start():
        acc_ref[...] = contrib                 # write-only init (no RMW)

    @pl.when(jnp.logical_and(h > 0, h < n_h - 1))
    def _accumulate():
        acc_ref[...] += contrib

    @pl.when(h == n_h - 1)
    def _finalize():
        # Fuse the last accumulate with the output cast/store: one acc read,
        # no extra acc write.
        o_ref[...] = (acc_ref[...] + contrib).astype(o_ref.dtype)


# --- one-time weight re-layout (call at model load, NOT per forward) --------
def prepare_gated_mlp_weights(w_grow, w_shrink, *, compute_dtype=jnp.bfloat16,
                              th=None, vmem_budget_bytes=48 * 1024 * 1024):
    """Transpose, pad, cast and gate/value-interleave the GatedMLP weights.

    Returns (wgv, ws, th):
      wgv: (Dp, 2*Hp)  grow weights, columns interleaved per hidden tile of
                       width th -> one MXU matmul per grid step.
      ws:  (Hp, Dp)    shrink weights, transposed / padded.
    """
    H2, D = w_grow.shape
    H = H2 // 2
    Ds, Hs = w_shrink.shape
    assert Ds == D and Hs == H, "weight shapes inconsistent"

    Dp = _round_up(D, _LANE)
    Hp = _round_up(H, _LANE)
    w_bytes = jnp.dtype(compute_dtype).itemsize

    if th is None:
        # Largest hidden tile whose double-buffered weight tiles use at most
        # ~half the VMEM budget.  th == Hp means the weight block index is
        # constant, so the weights are DMA'd once and stay VMEM-resident.
        for cand in (Hp, 512, 256, 128):
            if cand <= Hp and Hp % cand == 0:
                tile_bytes = 2 * (Dp * 2 * cand + cand * Dp) * w_bytes
                if tile_bytes <= vmem_budget_bytes // 2 or cand == 128:
                    th = cand
                    break
    assert Hp % th == 0 and th % _LANE == 0

    wg = jnp.transpose(w_grow[:H]).astype(compute_dtype)   # (D, H) gate cols
    wv = jnp.transpose(w_grow[H:]).astype(compute_dtype)   # (D, H) value cols
    ws = jnp.transpose(w_shrink).astype(compute_dtype)     # (H, D)

    # Zero padding is mathematically inert (padded x cols are zero; padded
    # hidden units give gelu(0)*0 = 0; padded output cols are sliced off).
    wg = jnp.pad(wg, ((0, Dp - D), (0, Hp - H)))
    wv = jnp.pad(wv, ((0, Dp - D), (0, Hp - H)))
    ws = jnp.pad(ws, ((0, Hp - H), (0, Dp - D)))

    n_h = Hp // th
    wgv = jnp.concatenate(
        [wg.reshape(Dp, n_h, th), wv.reshape(Dp, n_h, th)], axis=2
    ).reshape(Dp, 2 * Hp)
    return wgv, ws, th


def _vmem_estimate(tm, th, n_h, Dp, x_bytes, w_bytes, out_bytes):
    return (2 * tm * Dp * x_bytes                          # x (double-buffered)
            + 2 * (Dp * 2 * th + th * Dp) * w_bytes        # wgv + ws tiles
            + 2 * tm * Dp * out_bytes                      # output
            + (tm * Dp * 4 if n_h > 1 else 0))             # f32 accumulator


# --- hot path ----------------------------------------------------------------
@functools.partial(jax.jit, static_argnames=("th", "tm_max",
                                             "vmem_budget_bytes",
                                             "weight_buffers"))
def gated_mlp(x, wgv, ws, *, th, tm_max=256,
              vmem_budget_bytes=48 * 1024 * 1024, weight_buffers=None):
    """x: (..., D); wgv/ws from prepare_gated_mlp_weights (same th)."""
    *lead, D = x.shape
    Dp, Hp2 = wgv.shape
    Hp = Hp2 // 2
    Hs_p, Ds_p = ws.shape
    assert Ds_p == Dp and Hs_p == Hp and Dp >= D and Hp % th == 0

    compute_dtype = wgv.dtype
    x_bytes = w_bytes = jnp.dtype(compute_dtype).itemsize
    out_dtype = x.dtype
    out_bytes = jnp.dtype(out_dtype).itemsize

    M = math.prod(lead) if lead else 1
    n_h = Hp // th

    # Token tile: fill the MXU M dimension (256 on v6e/v7x), but keep >= 2
    # token tiles when possible so v7x's second TensorCore has work, and
    # shrink until the working set fits the VMEM budget.
    tm = min(tm_max, _round_up(M, _SUBLANE))
    Mp = _round_up(M, tm)
    while Mp // tm < 2 and tm > _SUBLANE:
        tm = max(_SUBLANE, _round_up(tm // 2, _SUBLANE))
        Mp = _round_up(M, tm)
    while (_vmem_estimate(tm, th, n_h, Dp, x_bytes, w_bytes, out_bytes)
           > vmem_budget_bytes and tm > _SUBLANE):
        tm = max(_SUBLANE, _round_up(tm // 2, _SUBLANE))
        Mp = _round_up(M, tm)

    xm = x.reshape(M, D).astype(compute_dtype)     # no-op if already bf16/f32
    xm = jnp.pad(xm, ((0, Mp - M), (0, Dp - D)))

    n_i = Mp // tm
    grid = (n_i, n_h)

    est = _vmem_estimate(tm, th, n_h, Dp, x_bytes, w_bytes, out_bytes)
    vmem_limit = max(16 * 1024 * 1024,
                     min(int(1.4 * est) + (2 << 20), 64 * 1024 * 1024))

    w_kwargs = {}
    if weight_buffers is not None:               # optional deeper buffering
        w_kwargs = dict(pipeline_mode=pl.Buffered(weight_buffers))

    scratch_shapes = [] if n_h == 1 else [pltpu.VMEM((tm, Dp), jnp.float32)]

    # Weights are re-streamed once per token tile unless they are VMEM
    # resident (n_h == 1 -> constant block index -> DMA'd exactly once).
    weight_streams = 1 if n_h == 1 else n_i
    bytes_accessed = (Mp * Dp * (x_bytes + out_bytes)
                      + weight_streams * 3 * Dp * Hp * w_bytes)

    out = pl.pallas_call(
        functools.partial(_gated_mlp_kernel, n_h=n_h),
        out_shape=jax.ShapeDtypeStruct((Mp, Dp), out_dtype),
        grid_spec=pltpu.PrefetchScalarGridSpec(
            num_scalar_prefetch=0,
            grid=grid,
            in_specs=[
                pl.BlockSpec((tm, Dp), lambda i, h: (i, 0)),             # x
                pl.BlockSpec((Dp, 2 * th), lambda i, h: (0, h), **w_kwargs),
                pl.BlockSpec((th, Dp), lambda i, h: (h, 0), **w_kwargs),
            ],
            out_specs=pl.BlockSpec((tm, Dp), lambda i, h: (i, 0)),
            scratch_shapes=scratch_shapes,
        ),
        compiler_params=pltpu.CompilerParams(
            dimension_semantics=("parallel", "arbitrary"),
            vmem_limit_bytes=vmem_limit),
        cost_estimate=pl.CostEstimate(
            flops=6 * Mp * Dp * Hp,
            transcendentals=2 * Mp * Hp,
            bytes_accessed=bytes_accessed),
    )(xm, wgv, ws)

    return out[:M, :D].reshape(*lead, D)


# --- pure-JAX reference (mirrors the PyTorch forward) ------------------------
def _reference(x, w_grow, w_shrink):
    H = w_grow.shape[0] // 2
    hi = jax.lax.Precision.HIGHEST
    y = jnp.einsum("...d,hd->...h", x, w_grow, precision=hi)
    gate, val = y[..., :H], y[..., H:]
    h = jax.nn.gelu(gate, approximate=False) * val
    return jnp.einsum("...h,dh->...d", h, w_shrink, precision=hi)


if __name__ == "__main__":
    batch, seq_len, dim, expansion_factor = 2, 64, 256, 2
    hidden = int(dim * expansion_factor)  # 512

    key = jax.random.PRNGKey(0)
    kx, kg, ks = jax.random.split(key, 3)

    x = jax.random.normal(kx, (batch, seq_len, dim), dtype=jnp.float32)
    # Same init as the PyTorch module: normal(std=dim**-0.5 / hidden**-0.5).
    w_grow = (dim ** -0.5) * jax.random.normal(
        kg, (2 * hidden, dim), dtype=jnp.float32)
    w_shrink = (hidden ** -0.5) * jax.random.normal(
        ks, (dim, hidden), dtype=jnp.float32)

    ref = _reference(x, w_grow, w_shrink)

    # 1) f32 parity path (strict check of the fused kernel math).
    wgv32, ws32, th32 = prepare_gated_mlp_weights(
        w_grow, w_shrink, compute_dtype=jnp.float32)
    out32 = jax.block_until_ready(gated_mlp(x, wgv32, ws32, th=th32))
    assert out32.shape == x.shape
    err32 = float(jnp.max(jnp.abs(out32 - ref)))
    assert jnp.allclose(out32, ref, atol=5e-3, rtol=5e-3), (
        f"f32 path mismatch vs reference (max abs err {err32})")

    # 2) bf16-streaming path (the performance default: bf16 MXU operands,
    #    f32 accumulation) -- tolerance loosened for bf16 input rounding.
    wgv16, ws16, th16 = prepare_gated_mlp_weights(
        w_grow, w_shrink, compute_dtype=jnp.bfloat16)
    out16 = jax.block_until_ready(gated_mlp(x, wgv16, ws16, th=th16))
    err16 = float(jnp.max(jnp.abs(out16 - ref)))
    assert jnp.allclose(out16, ref, atol=1e-1, rtol=5e-2), (
        f"bf16 path mismatch vs reference (max abs err {err16})")

    # 3) force the multi-hidden-tile accumulator path (th=128 -> n_h=4).
    wgv_s, ws_s, th_s = prepare_gated_mlp_weights(
        w_grow, w_shrink, compute_dtype=jnp.float32, th=128)
    out_s = jax.block_until_ready(gated_mlp(x, wgv_s, ws_s, th=th_s))
    err_s = float(jnp.max(jnp.abs(out_s - ref)))
    assert jnp.allclose(out_s, ref, atol=5e-3, rtol=5e-3), (
        f"tiled-accumulator path mismatch vs reference (max abs err {err_s})")

    print("KERNEL_OK")
</pallas_src>

<mosaic_0001>
module attributes {stable_mosaic.version = 11 : i64} {
  func.func @_gated_mlp_kernel(%arg0: i32, %arg1: i32, %arg2: memref<64x256xf32, #tpu.memory_space<vmem>>, %arg3: memref<256x1024xf32, #tpu.memory_space<vmem>>, %arg4: memref<512x256xf32, #tpu.memory_space<vmem>>, %arg5: memref<64x256xf32, #tpu.memory_space<vmem>>) attributes {dimension_semantics = [#tpu.dimension_semantics<parallel>, #tpu.dimension_semantics<arbitrary>], iteration_bounds = array<i64: 2, 1>, scalar_prefetch = 0 : i64, scratch_operands = 0 : i64, tpu.core_type = #tpu.core_type<tc>, window_params = [{transform_indices = @transform_0, window_bounds = array<i64: 64, 256>}, {transform_indices = @transform_1, window_bounds = array<i64: 256, 1024>}, {transform_indices = @transform_2, window_bounds = array<i64: 512, 256>}, {transform_indices = @transform_3, window_bounds = array<i64: 64, 256>}]} {
    %c0 = arith.constant 0 : index
    %c0_0 = arith.constant 0 : index
    %0 = vector.load %arg2[%c0, %c0_0] : memref<64x256xf32, #tpu.memory_space<vmem>>, vector<64x256xf32>
    %c0_1 = arith.constant 0 : index
    %c0_2 = arith.constant 0 : index
    %1 = vector.load %arg3[%c0_1, %c0_2] : memref<256x1024xf32, #tpu.memory_space<vmem>>, vector<256x1024xf32>
    %cst = arith.constant dense<0.000000e+00> : vector<64x1024xf32>
    %2 = tpu.matmul %0, %1, %cst {dimension_numbers = #tpu.dot_dimension_numbers<[1], [0], [0], [1], [0, 0, 1, 1], [], []>} : vector<64x256xf32>, vector<256x1024xf32>, vector<64x1024xf32> -> vector<64x1024xf32>
    %3 = vector.extract_strided_slice %2 {offsets = [0, 0], sizes = [64, 512], strides = [1, 1]} : vector<64x1024xf32> to vector<64x512xf32>
    %4 = math.absf %3 : vector<64x512xf32>
    %cst_3 = arith.constant 0.231641889 : f32
    %5 = vector.broadcast %cst_3 : f32 to vector<64x512xf32>
    %6 = arith.mulf %5, %4 : vector<64x512xf32>
    %cst_4 = arith.constant 1.000000e+00 : f32
    %7 = vector.broadcast %cst_4 : f32 to vector<64x512xf32>
    %8 = arith.addf %7, %6 : vector<64x512xf32>
    %9 = tpu.reciprocal %8 {approx = true} : vector<64x512xf32> -> vector<64x512xf32>
    %cst_5 = arith.constant 0.53070271 : f32
    %10 = vector.broadcast %cst_5 : f32 to vector<64x512xf32>
    %11 = arith.mulf %10, %9 : vector<64x512xf32>
    %cst_6 = arith.constant -0.72657603 : f32
    %12 = vector.broadcast %cst_6 : f32 to vector<64x512xf32>
    %13 = arith.addf %11, %12 : vector<64x512xf32>
    %14 = arith.mulf %13, %9 : vector<64x512xf32>
    %cst_7 = arith.constant 0.710706889 : f32
    %15 = vector.broadcast %cst_7 : f32 to vector<64x512xf32>
    %16 = arith.addf %14, %15 : vector<64x512xf32>
    %17 = arith.mulf %16, %9 : vector<64x512xf32>
    %cst_8 = arith.constant -0.142248362 : f32
    %18 = vector.broadcast %cst_8 : f32 to vector<64x512xf32>
    %19 = arith.addf %17, %18 : vector<64x512xf32>
    %20 = arith.mulf %19, %9 : vector<64x512xf32>
    %cst_9 = arith.constant 0.127414793 : f32
    %21 = vector.broadcast %cst_9 : f32 to vector<64x512xf32>
    %22 = arith.addf %20, %21 : vector<64x512xf32>
    %23 = arith.mulf %22, %9 : vector<64x512xf32>
    %cst_10 = arith.constant -5.000000e-01 : f32
    %24 = vector.broadcast %cst_10 : f32 to vector<64x512xf32>
    %25 = arith.mulf %24, %3 : vector<64x512xf32>
    %26 = arith.mulf %25, %3 : vector<64x512xf32>
    %27 = math.exp %26 : vector<64x512xf32>
    %cst_11 = arith.constant 5.000000e-01 : f32
    %28 = vector.broadcast %cst_11 : f32 to vector<64x512xf32>
    %29 = arith.mulf %28, %3 : vector<64x512xf32>
    %30 = arith.mulf %23, %27 : vector<64x512xf32>
    %cst_12 = arith.constant 5.000000e-01 : f32
    %31 = vector.broadcast %cst_12 : f32 to vector<64x512xf32>
    %32 = arith.subf %31, %30 : vector<64x512xf32>
    %33 = arith.mulf %4, %32 : vector<64x512xf32>
    %34 = arith.addf %29, %33 : vector<64x512xf32>
    %35 = vector.extract_strided_slice %2 {offsets = [0, 512], sizes = [64, 512], strides = [1, 1]} : vector<64x1024xf32> to vector<64x512xf32>
    %36 = arith.mulf %34, %35 : vector<64x512xf32>
    %c0_13 = arith.constant 0 : index
    %c0_14 = arith.constant 0 : index
    %37 = vector.load %arg4[%c0_13, %c0_14] : memref<512x256xf32, #tpu.memory_space<vmem>>, vector<512x256xf32>
    %cst_15 = arith.constant dense<0.000000e+00> : vector<64x256xf32>
    %38 = tpu.matmul %36, %37, %cst_15 {dimension_numbers = #tpu.dot_dimension_numbers<[1], [0], [0], [1], [0, 0, 1, 1], [], []>} : vector<64x512xf32>, vector<512x256xf32>, vector<64x256xf32> -> vector<64x256xf32>
    %c0_16 = arith.constant 0 : index
    %c0_17 = arith.constant 0 : index
    %39 = vector.load %arg5[%c0_16, %c0_17] : memref<64x256xf32, #tpu.memory_space<vmem>>, vector<64x256xf32>
    tpu.vector_store %arg5[%c0_16, %c0_17], %38 {strides = array<i32>} : memref<64x256xf32, #tpu.memory_space<vmem>>, vector<64x256xf32>,
    return
  }
  func.func @transform_0(%arg0: i32, %arg1: i32) -> (i32, i32) {
    %c0_i32 = arith.constant 0 : i32
    %c0_i32_0 = arith.constant 0 : i32
    return %arg0, %c0_i32 : i32, i32
  }
  func.func @transform_1(%arg0: i32, %arg1: i32) -> (i32, i32) {
    %c0_i32 = arith.constant 0 : i32
    %c0_i32_0 = arith.constant 0 : i32
    return %c0_i32, %arg1 : i32, i32
  }
  func.func @transform_2(%arg0: i32, %arg1: i32) -> (i32, i32) {
    %c0_i32 = arith.constant 0 : i32
    %c0_i32_0 = arith.constant 0 : i32
    return %arg1, %c0_i32 : i32, i32
  }
  func.func @transform_3(%arg0: i32, %arg1: i32) -> (i32, i32) {
    %c0_i32 = arith.constant 0 : i32
    %c0_i32_0 = arith.constant 0 : i32
    return %arg0, %c0_i32 : i32, i32
  }
}

</mosaic_0001>

<bundles_post_ra>
// kernel: gated_mlp.1
= control target key start
LH: loop header
LB: loop body
LE: loop exit
PB: predicated region body
PF: predicated region fallthrough
CT: control target
= control target key end

     0   :  { %8 = vsyncpa [#allocation3], 0  ;;  %s3634_s0 = inlined_call_operand.hbm [shape: f32[128,256], index: 0, kind: input, shape index: {}]   ;;  %s3635_s1 = inlined_call_operand.hbm [shape: f32[256,1024], index: 1, kind: input, shape index: {}]   ;;  %s3636_s2 = inlined_call_operand.hbm [shape: f32[512,256], index: 2, kind: input, shape index: {}]   ;;  %s3637_s3 = inlined_call_operand.hbm [shape: f32[128,256], index: 3, kind: output, shape index: {}]  }
   0x1   :  { %10 = vsyncpa [#allocation3 + $0x1], 0 }
   0x2   :  { %11 = vsyncpa [#allocation6], 0 }
   0x3   :  { %12 = vsyncpa [#allocation4], 0 }
   0x4   :  { %14 = vsyncpa [#allocation4 + $0x1], 0  ;;  %s2639_s12 = smov 0   ;;  %s2641_s13 = smov 0  }
   0x5   :  { %s2643_s14 = smov 0   ;;  %s2645_s15 = smov 0  }
   0x6   :  { %s2647_s16 = smov 0   ;;  %s2649_s17 = smov 0  }
   0x7 LB: > { %s2201_s18 = sadd.s32 4294967295, %s2607_s17   ;;  %s2202_s19 = sadd.s32 4294967294, %s2607_s17   ;;  %s2607_s17 = sphi %s2649_s17, %s20_s17   ;;  %s2603_s16 = sphi %s2647_s16, %s3879_s16   ;;  %s2599_s15 = sphi %s2645_s15, %s3878_s15   ;;  %s2595_s14 = sphi %s2643_s14, %s3877_s14   ;;  %s2591_s13 = sphi %s2641_s13, %s3876_s13   ;;  %s2587_s12 = sphi %s2639_s12, %s3875_s12  }
   0x8   : > { %p52_p0 = scmp.ne.s32.totalorder %s2591_s13, %s2587_s12  ;;  %p2673_p1 = scmp.eq.s32.totalorder %s2201_s18, 0 }
   0x9   : > { %p2677_p2 = scmp.eq.s32.totalorder %s2201_s18, 1  ;;  %p134_p3 = scmp.eq.s32.totalorder %s2202_s19, 1 }
   0xa   : > { %s3720_s20 = scalar_select %p2673_p1, 1, 0 }
   0xb   : > { %p2683_p4 = por %p2673_p1, %p52_p0  ;;  %p2203_p5 = scmp.ge.s32.totalorder %s2607_s17, 1 }
   0xc   : > { %p2688_p6 = por %p134_p3, %p52_p0  ;;  %p141_p7 = scmp.lt.s32.totalorder %s2607_s17, 3 }
   0xd   : > { %s3722_s22 = scalar_select %p2683_p4, 1, 0 }
   0xe   : > { %s3723_s23 = scalar_select %p2688_p6, 1, 0 }
   0xf   : > { %p2693_p8 = pnand %p2203_p5, %p141_p7  ;;  %s2609_s25 = smov [#allocation5]  }
  0x10   : > { %s156_s26 = sshll.u32 %s2609_s25, 4  ;;  %s2610_s28 = smov [#allocation7]   ;;  %s157_s26 = int_to_ptr.vmem [resolvable:$true] %s156_s26 }
  0x11   : > { %p2238_p9 = pneg %p2693_p8  ;;  %s173_s29 = sshll.u32 %s2610_s28, 4  ;;  %s174_s29 = int_to_ptr.vmem [resolvable:$true] %s173_s29 }
  0x12   : > { %s2454_s30 = scalar_lea.vmem %s157_s26, 32768  ;;  %p2462_p5 = scmp.lt.s32.totalorder %s157_s26, %s157_s26 }
  0x13   : > { %p2702_p11 = pnand %p2238_p9, %p2673_p1  ;;  %p2455_p13 = scmp.ne.s32.totalorder %s157_s26, %s2454_s30 }
  0x14   : > { %p2463_p7 = scmp.lt.s32.totalorder %s2454_s30, %s2454_s30 }
  0x15   : > { %p2445_p12 = pneg %p2702_p11 }
  0x16   : > { %p2464_p10 = por %p2463_p7, %p2462_p5 }
  0x17   : > { %p2457_p0 = pnand %p2455_p13, %p2445_p12 }
  0x19   : > { %p2458_p3 = pneg %p2457_p0 }
  0x1b   : > { %p2465_p9 = pnand %p2464_p10, %p2458_p3 }
  0x1d   : > { %2468 = shalt.err (!%p2465_p9)
}
  0x1e   : > { %s2611_s4 = smov 1024   ;;  %s2612_s5 = smov 64  }
  0x1f   : > { %2241 = dma.hbm_to_vmem [thread:$0]  (!%p2702_p11), %s3635_s1, 32768, %s157_s26, [#allocation6], %s2611_s4, %s2611_s4, %s2612_s5  }
  0x20   : > { %s2480_s8 = scalar_lea.vmem %s174_s29, 16384  ;;  %p2488_p1 = scmp.lt.s32.totalorder %s174_s29, %s174_s29 }
  0x21   : > { %p2481_p6 = scmp.ne.s32.totalorder %s174_s29, %s2480_s8  ;;  %p2489_p4 = scmp.lt.s32.totalorder %s2480_s8, %s2480_s8 }
  0x23   : > { %p2483_p13 = pnand %p2481_p6, %p2445_p12  ;;  %p2490_p5 = por %p2489_p4, %p2488_p1 }
  0x25   : > { %p2484_p0 = pneg %p2483_p13 }
  0x27   : > { %p2491_p10 = pnand %p2490_p5, %p2484_p0 }
  0x29   : > { %2494 = shalt.err (!%p2491_p10)
}
  0x2a   : > { %s3641_s9 = smov 256   ;;  %s2614_s10 = smov 16  }
  0x2b   : > { %2244 = dma.hbm_to_vmem [thread:$0]  (!%p2702_p11), %s3636_s2, 16384, %s174_s29, [#allocation6], %s3641_s9, %s3641_s9, %s2614_s10  }
  0x2c   : > { %s32_s19 = sadd.s32 1, %s2603_s16  ;;  %s39_s25 = sadd.s32 1, %s2595_s14 }
  0x2d   : > { %p34_p1 = scmp.ge.s32.totalorder %s32_s19, 2  ;;  %p46_p4 = scmp.ne.s32.totalorder %s2595_s14, %s2591_s13 }
  0x2e   : > { %p47_p6 = scmp.eq.s32.totalorder %s2607_s17, 0  ;;  %p2255_p12 = scmp.lt.s32.totalorder %s2607_s17, 2 }
  0x2f   : > { %s3881_s19 = smov (%p34_p1, %s32_s19), 0  ;;  %p2737_p7 = por %p2677_p2, %p46_p4 }
  0x30   : > { %p48_p3 = por %p47_p6, %p46_p4  ;;  %s36_s27 = ssub.s32 %s2603_s16, %s3881_s19 }
  0x31   : > { %s187_s28 = sand.u32 1, %s2595_s14   ;;  %p37_p9 = scmp.eq.s32.totalorder %s36_s27, 0 }
  0x32   : > { %s2207_s29 = sshll.u32 %s187_s28, 7  ;;  %s2223_s30 = sshll.u32 %s2603_s16, 11 }
  0x33   : > { %s2746_s4 = scalar_select %p37_p9, %s2595_s14, %s39_s25  }
  0x34   : > { %s198_s7 = scalar_lea.hbm %s3634_s0, %s2223_s30  ;;  %s191_s8 = scalar_lea.vmem [#allocation2], %s2207_s29 }
  0x35   : > { %s199_s11 = sshll.u32 %s191_s8, 4  ;;  %p2753_p11 = pnand %p2255_p12, %p48_p3  ;;  %s200_s11 = int_to_ptr.vmem [resolvable:$true] %s199_s11 }
  0x36   : > { %s188_s18 = scalar_lea.sflag [#allocation3], %s187_s28  ;;  %s2508_s27 = scalar_lea.vmem %s200_s11, 2048 }
  0x37   : > { %p2497_p2 = pneg %p2753_p11  ;;  %p2509_p13 = scmp.ne.s32.totalorder %s200_s11, %s2508_s27 }
  0x38   : > { %s2615_s25 = smov [#allocation2]  }
  0x39   : > { %p2511_p0 = pnand %p2509_p13, %p2497_p2  ;;  %s2513_s9 = sshll.u32 %s2615_s25, 4  ;;  %s2514_s9 = int_to_ptr.vmem [resolvable:$false] %s2513_s9 }
  0x3a   : > { %s2515_s30 = scalar_lea.vmem %s2514_s9, 4096  ;;  %p2516_p10 = scmp.lt.s32.totalorder %s200_s11, %s2514_s9 }
  0x3b   : > { %p2512_p5 = pneg %p2511_p0  ;;  %p2517_p1 = scmp.lt.s32.totalorder %s2515_s30, %s2508_s27 }
  0x3d   : > { %p2518_p4 = por %p2517_p1, %p2516_p10 }
  0x3f   : > { %p2519_p6 = pnand %p2518_p4, %p2512_p5 }
  0x41   : > { %2522 = shalt.err (!%p2519_p6)
}
  0x42   : > { %s3728_s29 = smov 256   ;;  %211 = sbr.rel (%p2693_p8) target bundleno = 751 (0x2ef), region = 32 }
  0x43   : > { %2248 = dma.hbm_to_vmem [thread:$0]  (!%p2753_p11), %s198_s7, 2048, %s200_s11, %s188_s18, %s3728_s29, %s3728_s29, %s2614_s10  }
  0x47   : > { %s2767_s28 = sand.u32 1, %s2591_s13   ;;  %p3729_p12 = scmp.ne.s32.totalorder %s3722_s22, 0 }
  0x48   : > { %s2212_s9 = sshll.u32 %s2767_s28, 7  ;;  %s214_s5 = scalar_lea.sflag [#allocation3], %s2767_s28 }
  0x49   : > { %s2773_s6 = scalar_lea.vmem [#allocation2], %s2212_s9 }
  0x4a   : > { %2574 = dma.done.wait (%p3729_p12), %s214_s5, 2048  }
  0x4b   : > { %2576 = vsyncadd (%p3729_p12), %s214_s5, 4294965248  ;;  %p3730_p3 = scmp.ne.s32.totalorder %s3720_s20, 0 }
  0x4d   : > { %2578 = dma.done.wait (%p3730_p3), [#allocation6], 49152  }
  0x4e   : > { %2580 = vsyncadd (%p3730_p3), [#allocation6], 4294918144  ;;  %v389_v0 = vld [vmem:[#allocation5 + $0x3c8] sm:$0xff]  ;;  %v391_v1 = vld [vmem:[#allocation5 + $0x3d8] sm:$0xff]  ;;  %s3561_s20 = scalar_lea.vmem [#allocation8], %s2212_s9  ;;  %s2225_s22 = sshll.u32 %s2599_s15, 11 }
  0x4f   : > { %v388_v2 = vld [vmem:[#allocation5 + $0x3c0] sm:$0xff]  ;;  %524 = vmatprep.subr.mxu0 %v389_v0  ;;  %637 = vmatprep.subr.mxu1 %v391_v1  ;;  %v390_v3 = vld [vmem:[#allocation5 + $0x3d0] sm:$0xff]  ;;  %v381_v4 = vld [vmem:[#allocation5 + $0x388] sm:$0xff]  ;;  %s2097_s24 = sshll.u32 %s3561_s20, 4  ;;  %s3582_s8 = scalar_lea.hbm %s3637_s3, %s2225_s22  ;;  %s3584_s24 = int_to_ptr.vmem [resolvable:$true] %s2097_s24 }
  0x50   : > { %v383_v5 = vld [vmem:[#allocation5 + $0x398] sm:$0xff]  ;;  %525 = vmatpush1.msra.mxu0 %v388_v2  ;;  %638 = vmatpush1.msra.mxu1 %v390_v3  ;;  %v380_v6 = vld [vmem:[#allocation5 + $0x380] sm:$0xff]  ;;  %v382_v7 = vld [vmem:[#allocation5 + $0x390] sm:$0xff]  ;;  %s2083_s11 = scalar_lea.sflag [#allocation4], %s2767_s28  ;;  %s2523_s15 = scalar_lea.vmem %s3584_s24, 2048 }
  0x51   : > { %v373_v8 = vld [vmem:[#allocation5 + $0x348] sm:$0xff]  ;;  %526 = vmatprep.subr.mxu0 %v381_v4  ;;  %639 = vmatprep.subr.mxu1 %v383_v5  ;;  %v375_v9 = vld [vmem:[#allocation5 + $0x358] sm:$0xff]  ;;  %v372_v10 = vld [vmem:[#allocation5 + $0x340] sm:$0xff]  ;;  %p2524_p8 = scmp.ne.s32.totalorder %s3584_s24, %s2523_s15  ;;  %s2616_s21 = smov [#allocation8]  }
  0x52   : > { %v374_v11 = vld [vmem:[#allocation5 + $0x350] sm:$0xff]  ;;  %527 = vmatpush1.msra.mxu0 %v380_v6  ;;  %640 = vmatpush1.msra.mxu1 %v382_v7  ;;  %v365_v12 = vld [vmem:[#allocation5 + $0x308] sm:$0xff]  ;;  %v367_v13 = vld [vmem:[#allocation5 + $0x318] sm:$0xff]  ;;  %s2527_s18 = sshll.u32 %s2616_s21, 4  ;;  %s2528_s18 = int_to_ptr.vmem [resolvable:$false] %s2527_s18 }
  0x53   : > { %528 = vmatprep.subr.mxu0 %v373_v8  ;;  %641 = vmatprep.subr.mxu1 %v375_v9  ;;  %v364_v14 = vld [vmem:[#allocation5 + $0x300] sm:$0xff]  ;;  %v366_v15 = vld [vmem:[#allocation5 + $0x310] sm:$0xff]  ;;  %v357_v16 = vld [vmem:[#allocation5 + $0x2c8] sm:$0xff]  ;;  %p2525_p9 = pnand %p2524_p8, %p2737_p7  ;;  %s2529_s27 = scalar_lea.vmem %s2528_s18, 4096 }
  0x54   : > { %529 = vmatpush1.msra.mxu0 %v372_v10  ;;  %642 = vmatpush1.msra.mxu1 %v374_v11  ;;  %v359_v17 = vld [vmem:[#allocation5 + $0x2d8] sm:$0xff]  ;;  %v356_v18 = vld [vmem:[#allocation5 + $0x2c0] sm:$0xff]  ;;  %v358_v19 = vld [vmem:[#allocation5 + $0x2d0] sm:$0xff]  ;;  %p2530_p2 = scmp.lt.s32.totalorder %s3584_s24, %s2528_s18  ;;  %p2531_p13 = scmp.lt.s32.totalorder %s2529_s27, %s2523_s15 }
  0x55   : > { %530 = vmatprep.subr.mxu0 %v365_v12  ;;  %643 = vmatprep.subr.mxu1 %v367_v13  ;;  %v349_v20 = vld [vmem:[#allocation5 + $0x288] sm:$0xff]  ;;  %v351_v21 = vld [vmem:[#allocation5 + $0x298] sm:$0xff]  ;;  %v348_v22 = vld [vmem:[#allocation5 + $0x280] sm:$0xff]  ;;  %p2526_p11 = pneg %p2525_p9 }
  0x56   : > { %531 = vmatpush1.msra.mxu0 %v364_v14  ;;  %644 = vmatpush1.msra.mxu1 %v366_v15  ;;  %v350_v23 = vld [vmem:[#allocation5 + $0x290] sm:$0xff]  ;;  %v341_v24 = vld [vmem:[#allocation5 + $0x248] sm:$0xff]  ;;  %v343_v25 = vld [vmem:[#allocation5 + $0x258] sm:$0xff]  ;;  %p2532_p0 = por %p2531_p13, %p2530_p2 }
  0x57   : > { %532 = vmatprep.subr.mxu0 %v357_v16  ;;  %645 = vmatprep.subr.mxu1 %v359_v17  ;;  %v340_v26 = vld [vmem:[#allocation5 + $0x240] sm:$0xff]  ;;  %v342_v27 = vld [vmem:[#allocation5 + $0x250] sm:$0xff]  ;;  %v333_v28 = vld [vmem:[#allocation5 + $0x208] sm:$0xff] }
  0x58   : > { %533 = vmatpush1.msra.mxu0 %v356_v18  ;;  %646 = vmatpush1.msra.mxu1 %v358_v19  ;;  %v335_v29 = vld [vmem:[#allocation5 + $0x218] sm:$0xff]  ;;  %v332_v30 = vld [vmem:[#allocation5 + $0x200] sm:$0xff]  ;;  %v334_v31 = vld [vmem:[#allocation5 + $0x210] sm:$0xff]  ;;  %p2533_p5 = pnand %p2532_p0, %p2526_p11 }
  0x59   : > { %534 = vmatprep.subr.mxu0 %v349_v20  ;;  %647 = vmatprep.subr.mxu1 %v351_v21  ;;  %v325_v32 = vld [vmem:[#allocation5 + $0x1c8] sm:$0xff]  ;;  %v327_v33 = vld [vmem:[#allocation5 + $0x1d8] sm:$0xff]  ;;  %v324_v34 = vld [vmem:[#allocation5 + $0x1c0] sm:$0xff] }
  0x5a   : > { %535 = vmatpush1.msra.mxu0 %v348_v22  ;;  %648 = vmatpush1.msra.mxu1 %v350_v23  ;;  %v326_v35 = vld [vmem:[#allocation5 + $0x1d0] sm:$0xff]  ;;  %v317_v36 = vld [vmem:[#allocation5 + $0x188] sm:$0xff]  ;;  %v319_v37 = vld [vmem:[#allocation5 + $0x198] sm:$0xff] }
  0x5b   : > { %536 = vmatprep.subr.mxu0 %v341_v24  ;;  %649 = vmatprep.subr.mxu1 %v343_v25  ;;  %v316_v38 = vld [vmem:[#allocation5 + $0x180] sm:$0xff]  ;;  %v318_v39 = vld [vmem:[#allocation5 + $0x190] sm:$0xff]  ;;  %v309_v40 = vld [vmem:[#allocation5 + $0x148] sm:$0xff] }
  0x5c   : > { %537 = vmatpush1.msra.mxu0 %v340_v26  ;;  %650 = vmatpush1.msra.mxu1 %v342_v27  ;;  %v311_v41 = vld [vmem:[#allocation5 + $0x158] sm:$0xff]  ;;  %v308_v42 = vld [vmem:[#allocation5 + $0x140] sm:$0xff]  ;;  %v310_v43 = vld [vmem:[#allocation5 + $0x150] sm:$0xff] }
  0x5d   : > { %538 = vmatprep.subr.mxu0 %v333_v28  ;;  %651 = vmatprep.subr.mxu1 %v335_v29  ;;  %v301_v44 = vld [vmem:[#allocation5 + $0x108] sm:$0xff]  ;;  %v303_v45 = vld [vmem:[#allocation5 + $0x118] sm:$0xff]  ;;  %v300_v46 = vld [vmem:[#allocation5 + $0x100] sm:$0xff] }
  0x5e   : > { %539 = vmatpush1.msra.mxu0 %v332_v30  ;;  %652 = vmatpush1.msra.mxu1 %v334_v31  ;;  %v302_v47 = vld [vmem:[#allocation5 + $0x110] sm:$0xff]  ;;  %v293_v48 = vld [vmem:[#allocation5 + $0xc8] sm:$0xff]  ;;  %v295_v49 = vld [vmem:[#allocation5 + $0xd8] sm:$0xff] }
  0x5f   : > { %540 = vmatprep.subr.mxu0 %v325_v32  ;;  %653 = vmatprep.subr.mxu1 %v327_v33  ;;  %v292_v50 = vld [vmem:[#allocation5 + $0xc0] sm:$0xff]  ;;  %v294_v51 = vld [vmem:[#allocation5 + $0xd0] sm:$0xff]  ;;  %v285_v52 = vld [vmem:[#allocation5 + $0x88] sm:$0xff] }
  0x60   : > { %541 = vmatpush1.msra.mxu0 %v324_v34  ;;  %654 = vmatpush1.msra.mxu1 %v326_v35  ;;  %v287_v53 = vld [vmem:[#allocation5 + $0x98] sm:$0xff]  ;;  %v284_v54 = vld [vmem:[#allocation5 + $0x80] sm:$0xff]  ;;  %v286_v55 = vld [vmem:[#allocation5 + $0x90] sm:$0xff] }
  0x61   : > { %542 = vmatprep.subr.mxu0 %v317_v36  ;;  %655 = vmatprep.subr.mxu1 %v319_v37  ;;  %v277_v56 = vld [vmem:[#allocation5 + $0x48] sm:$0xff]  ;;  %v279_v57 = vld [vmem:[#allocation5 + $0x58] sm:$0xff]  ;;  %v276_v58 = vld [vmem:[#allocation5 + $0x40] sm:$0xff] }
  0x62   : > { %543 = vmatpush1.msra.mxu0 %v316_v38  ;;  %656 = vmatpush1.msra.mxu1 %v318_v39  ;;  %v278_v59 = vld [vmem:[#allocation5 + $0x50] sm:$0xff]  ;;  %v269_v60 = vld [vmem:[#allocation5 + $0x8] sm:$0xff]  ;;  %v271_v61 = vld [vmem:[#allocation5 + $0x18] sm:$0xff] }
  0x63   : > { %544 = vmatprep.subr.mxu0 %v309_v40  ;;  %657 = vmatprep.subr.mxu1 %v311_v41  ;;  %v268_v62 = vld [vmem:[#allocation5] sm:$0xff]  ;;  %v270_v63 = vld [vmem:[#allocation5 + $0x10] sm:$0xff]  ;;  %v517_v0 = vld [vmem:[#allocation5 + $0x7c8] sm:$0xff] }
  0x64   : > { %545 = vmatpush1.msra.mxu0 %v308_v42  ;;  %658 = vmatpush1.msra.mxu1 %v310_v43  ;;  %v519_v1 = vld [vmem:[#allocation5 + $0x7d8] sm:$0xff]  ;;  %v516_v2 = vld [vmem:[#allocation5 + $0x7c0] sm:$0xff]  ;;  %v518_v3 = vld [vmem:[#allocation5 + $0x7d0] sm:$0xff] }
  0x65   : > { %546 = vmatprep.subr.mxu0 %v301_v44  ;;  %659 = vmatprep.subr.mxu1 %v303_v45  ;;  %v509_v4 = vld [vmem:[#allocation5 + $0x788] sm:$0xff]  ;;  %v511_v5 = vld [vmem:[#allocation5 + $0x798] sm:$0xff]  ;;  %v508_v6 = vld [vmem:[#allocation5 + $0x780] sm:$0xff] }
  0x66   : > { %547 = vmatpush1.msra.mxu0 %v300_v46  ;;  %660 = vmatpush1.msra.mxu1 %v302_v47  ;;  %v510_v7 = vld [vmem:[#allocation5 + $0x790] sm:$0xff]  ;;  %v501_v8 = vld [vmem:[#allocation5 + $0x748] sm:$0xff]  ;;  %v503_v9 = vld [vmem:[#allocation5 + $0x758] sm:$0xff] }
  0x67   : > { %548 = vmatprep.subr.mxu0 %v293_v48  ;;  %661 = vmatprep.subr.mxu1 %v295_v49  ;;  %v500_v10 = vld [vmem:[#allocation5 + $0x740] sm:$0xff]  ;;  %v502_v11 = vld [vmem:[#allocation5 + $0x750] sm:$0xff]  ;;  %v493_v12 = vld [vmem:[#allocation5 + $0x708] sm:$0xff] }
  0x68   : > { %549 = vmatpush1.msra.mxu0 %v292_v50  ;;  %662 = vmatpush1.msra.mxu1 %v294_v51  ;;  %v495_v13 = vld [vmem:[#allocation5 + $0x718] sm:$0xff]  ;;  %v492_v14 = vld [vmem:[#allocation5 + $0x700] sm:$0xff]  ;;  %v494_v15 = vld [vmem:[#allocation5 + $0x710] sm:$0xff] }
  0x69   : > { %550 = vmatprep.subr.mxu0 %v285_v52  ;;  %663 = vmatprep.subr.mxu1 %v287_v53  ;;  %v485_v16 = vld [vmem:[#allocation5 + $0x6c8] sm:$0xff]  ;;  %v487_v17 = vld [vmem:[#allocation5 + $0x6d8] sm:$0xff]  ;;  %v484_v18 = vld [vmem:[#allocation5 + $0x6c0] sm:$0xff] }
  0x6a   : > { %551 = vmatpush1.msra.mxu0 %v284_v54  ;;  %664 = vmatpush1.msra.mxu1 %v286_v55  ;;  %v486_v19 = vld [vmem:[#allocation5 + $0x6d0] sm:$0xff]  ;;  %v477_v20 = vld [vmem:[#allocation5 + $0x688] sm:$0xff]  ;;  %v479_v21 = vld [vmem:[#allocation5 + $0x698] sm:$0xff] }
  0x6b   : > { %552 = vmatprep.subr.mxu0 %v277_v56  ;;  %665 = vmatprep.subr.mxu1 %v279_v57  ;;  %v476_v22 = vld [vmem:[#allocation5 + $0x680] sm:$0xff]  ;;  %v478_v23 = vld [vmem:[#allocation5 + $0x690] sm:$0xff]  ;;  %v469_v24 = vld [vmem:[#allocation5 + $0x648] sm:$0xff] }
  0x6c   : > { %553 = vmatpush1.msra.mxu0 %v276_v58  ;;  %666 = vmatpush1.msra.mxu1 %v278_v59  ;;  %v471_v25 = vld [vmem:[#allocation5 + $0x658] sm:$0xff]  ;;  %v468_v26 = vld [vmem:[#allocation5 + $0x640] sm:$0xff]  ;;  %v470_v27 = vld [vmem:[#allocation5 + $0x650] sm:$0xff] }
  0x6d   : > { %554 = vmatprep.subr.mxu0 %v269_v60  ;;  %667 = vmatprep.subr.mxu1 %v271_v61  ;;  %v461_v28 = vld [vmem:[#allocation5 + $0x608] sm:$0xff]  ;;  %v463_v29 = vld [vmem:[#allocation5 + $0x618] sm:$0xff]  ;;  %v460_v30 = vld [vmem:[#allocation5 + $0x600] sm:$0xff] }
  0x6e   : > { %555 = vmatpush1.msra.mxu0 %v268_v62  ;;  %668 = vmatpush1.msra.mxu1 %v270_v63  ;;  %v462_v31 = vld [vmem:[#allocation5 + $0x610] sm:$0xff]  ;;  %v453_v32 = vld [vmem:[#allocation5 + $0x5c8] sm:$0xff]  ;;  %v455_v33 = vld [vmem:[#allocation5 + $0x5d8] sm:$0xff] }
  0x6f   : > { %556 = vmatprep.subr.mxu0 %v517_v0  ;;  %669 = vmatprep.subr.mxu1 %v519_v1  ;;  %v452_v34 = vld [vmem:[#allocation5 + $0x5c0] sm:$0xff]  ;;  %v454_v35 = vld [vmem:[#allocation5 + $0x5d0] sm:$0xff]  ;;  %v445_v36 = vld [vmem:[#allocation5 + $0x588] sm:$0xff] }
  0x70   : > { %557 = vmatpush2.msra.mxu0 %v516_v2  ;;  %670 = vmatpush2.msra.mxu1 %v518_v3  ;;  %v447_v37 = vld [vmem:[#allocation5 + $0x598] sm:$0xff]  ;;  %v444_v38 = vld [vmem:[#allocation5 + $0x580] sm:$0xff]  ;;  %v446_v39 = vld [vmem:[#allocation5 + $0x590] sm:$0xff] }
  0x71   : > { %558 = vmatprep.subr.mxu0 %v509_v4  ;;  %671 = vmatprep.subr.mxu1 %v511_v5  ;;  %v437_v40 = vld [vmem:[#allocation5 + $0x548] sm:$0xff]  ;;  %v439_v41 = vld [vmem:[#allocation5 + $0x558] sm:$0xff]  ;;  %v436_v42 = vld [vmem:[#allocation5 + $0x540] sm:$0xff] }
  0x72   : > { %559 = vmatpush2.msra.mxu0 %v508_v6  ;;  %672 = vmatpush2.msra.mxu1 %v510_v7  ;;  %v438_v43 = vld [vmem:[#allocation5 + $0x550] sm:$0xff]  ;;  %v429_v44 = vld [vmem:[#allocation5 + $0x508] sm:$0xff]  ;;  %v431_v45 = vld [vmem:[#allocation5 + $0x518] sm:$0xff] }
  0x73   : > { %560 = vmatprep.subr.mxu0 %v501_v8  ;;  %673 = vmatprep.subr.mxu1 %v503_v9  ;;  %v428_v46 = vld [vmem:[#allocation5 + $0x500] sm:$0xff]  ;;  %v430_v47 = vld [vmem:[#allocation5 + $0x510] sm:$0xff]  ;;  %v421_v48 = vld [vmem:[#allocation5 + $0x4c8] sm:$0xff] }
  0x74   : > { %561 = vmatpush2.msra.mxu0 %v500_v10  ;;  %674 = vmatpush2.msra.mxu1 %v502_v11  ;;  %v423_v49 = vld [vmem:[#allocation5 + $0x4d8] sm:$0xff]  ;;  %v420_v50 = vld [vmem:[#allocation5 + $0x4c0] sm:$0xff]  ;;  %v422_v51 = vld [vmem:[#allocation5 + $0x4d0] sm:$0xff] }
  0x75   : > { %562 = vmatprep.subr.mxu0 %v493_v12  ;;  %675 = vmatprep.subr.mxu1 %v495_v13  ;;  %v413_v52 = vld [vmem:[#allocation5 + $0x488] sm:$0xff]  ;;  %v415_v53 = vld [vmem:[#allocation5 + $0x498] sm:$0xff]  ;;  %v412_v54 = vld [vmem:[#allocation5 + $0x480] sm:$0xff] }
  0x76   : > { %563 = vmatpush2.msra.mxu0 %v492_v14  ;;  %676 = vmatpush2.msra.mxu1 %v494_v15  ;;  %v414_v55 = vld [vmem:[#allocation5 + $0x490] sm:$0xff]  ;;  %v405_v56 = vld [vmem:[#allocation5 + $0x448] sm:$0xff]  ;;  %v407_v57 = vld [vmem:[#allocation5 + $0x458] sm:$0xff] }
  0x77   : > { %564 = vmatprep.subr.mxu0 %v485_v16  ;;  %677 = vmatprep.subr.mxu1 %v487_v17  ;;  %v404_v58 = vld [vmem:[#allocation5 + $0x440] sm:$0xff]  ;;  %v406_v59 = vld [vmem:[#allocation5 + $0x450] sm:$0xff]  ;;  %v397_v60 = vld [vmem:[#allocation5 + $0x408] sm:$0xff] }
  0x78   : > { %565 = vmatpush2.msra.mxu0 %v484_v18  ;;  %678 = vmatpush2.msra.mxu1 %v486_v19  ;;  %v399_v61 = vld [vmem:[#allocation5 + $0x418] sm:$0xff]  ;;  %v396_v62 = vld [vmem:[#allocation5 + $0x400] sm:$0xff]  ;;  %v2784_v63 = vld [vmem:[%s2773_s6 + $0x8] sm:$0xff] }
  0x79   : > { %566 = vmatprep.subr.mxu0 %v477_v20  ;;  %679 = vmatprep.subr.mxu1 %v479_v21  ;;  %v398_v0 = vld [vmem:[#allocation5 + $0x410] sm:$0xff]  ;;  %v2787_v1 = vld [vmem:[%s2773_s6] sm:$0xff]  ;;  %v393_v2 = vld [vmem:[#allocation5 + $0x3e8] sm:$0xff] }
  0x7a   : > { %567 = vmatpush2.msra.mxu0 %v476_v22  ;;  %680 = vmatpush2.msra.mxu1 %v478_v23  ;;  %v395_v3 = vld [vmem:[#allocation5 + $0x3f8] sm:$0xff]  ;;  %v392_v4 = vld [vmem:[#allocation5 + $0x3e0] sm:$0xff]  ;;  %v394_v5 = vld [vmem:[#allocation5 + $0x3f0] sm:$0xff] }
  0x7b   : > { %568 = vmatprep.subr.mxu0 %v469_v24  ;;  %681 = vmatprep.subr.mxu1 %v471_v25  ;;  %v385_v6 = vld [vmem:[#allocation5 + $0x3a8] sm:$0xff]  ;;  %v387_v7 = vld [vmem:[#allocation5 + $0x3b8] sm:$0xff]  ;;  %v384_v9 = vld [vmem:[#allocation5 + $0x3a0] sm:$0xff] }
  0x7c   : > { %569 = vmatpush2.msra.mxu0 %v468_v26  ;;  %682 = vmatpush2.msra.mxu1 %v470_v27  ;;  %v2794_v8 = vld [vmem:[%s2773_s6 + $0x18] sm:$0xff]  ;;  %v386_v10 = vld [vmem:[#allocation5 + $0x3b0] sm:$0xff]  ;;  %v377_v12 = vld [vmem:[#allocation5 + $0x368] sm:$0xff] }
  0x7d   : > { %570 = vmatprep.subr.mxu0 %v461_v28  ;;  %683 = vmatprep.subr.mxu1 %v463_v29  ;;  %v2797_v11 = vld [vmem:[%s2773_s6 + $0x10] sm:$0xff]  ;;  %v379_v13 = vld [vmem:[#allocation5 + $0x378] sm:$0xff]  ;;  %v376_v14 = vld [vmem:[#allocation5 + $0x360] sm:$0xff] }
  0x7e   : > { %571 = vmatpush2.msra.mxu0 %v460_v30  ;;  %684 = vmatpush2.msra.mxu1 %v462_v31  ;;  %v378_v15 = vld [vmem:[#allocation5 + $0x370] sm:$0xff]  ;;  %v369_v16 = vld [vmem:[#allocation5 + $0x328] sm:$0xff]  ;;  %v371_v17 = vld [vmem:[#allocation5 + $0x338] sm:$0xff] }
  0x7f   : > { %572 = vmatprep.subr.mxu0 %v453_v32  ;;  %685 = vmatprep.subr.mxu1 %v455_v33  ;;  %v2804_v18 = vld [vmem:[%s2773_s6 + $0x28] sm:$0xff]  ;;  %v368_v19 = vld [vmem:[#allocation5 + $0x320] sm:$0xff]  ;;  %v370_v20 = vld [vmem:[#allocation5 + $0x330] sm:$0xff] }
  0x80   : > { %573 = vmatpush2.msra.mxu0 %v452_v34  ;;  %686 = vmatpush2.msra.mxu1 %v454_v35  ;;  %v2807_v21 = vld [vmem:[%s2773_s6 + $0x20] sm:$0xff]  ;;  %v361_v22 = vld [vmem:[#allocation5 + $0x2e8] sm:$0xff]  ;;  %v363_v23 = vld [vmem:[#allocation5 + $0x2f8] sm:$0xff] }
  0x81   : > { %574 = vmatprep.subr.mxu0 %v445_v36  ;;  %687 = vmatprep.subr.mxu1 %v447_v37  ;;  %v360_v24 = vld [vmem:[#allocation5 + $0x2e0] sm:$0xff]  ;;  %v362_v25 = vld [vmem:[#allocation5 + $0x2f0] sm:$0xff]  ;;  %v353_v26 = vld [vmem:[#allocation5 + $0x2a8] sm:$0xff] }
  0x82   : > { %575 = vmatpush2.msra.mxu0 %v444_v38  ;;  %688 = vmatpush2.msra.mxu1 %v446_v39  ;;  %v355_v27 = vld [vmem:[#allocation5 + $0x2b8] sm:$0xff]  ;;  %v352_v29 = vld [vmem:[#allocation5 + $0x2a0] sm:$0xff]  ;;  %v354_v30 = vld [vmem:[#allocation5 + $0x2b0] sm:$0xff] }
  0x83   : > { %576 = vmatprep.subr.mxu0 %v437_v40  ;;  %689 = vmatprep.subr.mxu1 %v439_v41  ;;  %v2814_v28 = vld [vmem:[%s2773_s6 + $0x38] sm:$0xff]  ;;  %v2817_v31 = vld [vmem:[%s2773_s6 + $0x30] sm:$0xff]  ;;  %v345_v32 = vld [vmem:[#allocation5 + $0x268] sm:$0xff] }
  0x84   : > { %577 = vmatpush2.msra.mxu0 %v436_v42  ;;  %690 = vmatpush2.msra.mxu1 %v438_v43  ;;  %v347_v33 = vld [vmem:[#allocation5 + $0x278] sm:$0xff]  ;;  %v344_v34 = vld [vmem:[#allocation5 + $0x260] sm:$0xff]  ;;  %v346_v35 = vld [vmem:[#allocation5 + $0x270] sm:$0xff] }
  0x85   : > { %578 = vmatprep.subr.mxu0 %v429_v44  ;;  %691 = vmatprep.subr.mxu1 %v431_v45  ;;  %v337_v36 = vld [vmem:[#allocation5 + $0x228] sm:$0xff]  ;;  %v339_v37 = vld [vmem:[#allocation5 + $0x238] sm:$0xff]  ;;  %v336_v39 = vld [vmem:[#allocation5 + $0x220] sm:$0xff] }
  0x86   : > { %579 = vmatpush2.msra.mxu0 %v428_v46  ;;  %692 = vmatpush2.msra.mxu1 %v430_v47  ;;  %v2824_v38 = vld [vmem:[%s2773_s6 + $0x48] sm:$0xff]  ;;  %v338_v40 = vld [vmem:[#allocation5 + $0x230] sm:$0xff]  ;;  %v2827_v41 = vld [vmem:[%s2773_s6 + $0x40] sm:$0xff] }
  0x87   : > { %580 = vmatprep.subr.mxu0 %v421_v48  ;;  %693 = vmatprep.subr.mxu1 %v423_v49  ;;  %v329_v42 = vld [vmem:[#allocation5 + $0x1e8] sm:$0xff]  ;;  %v331_v43 = vld [vmem:[#allocation5 + $0x1f8] sm:$0xff]  ;;  %v328_v44 = vld [vmem:[#allocation5 + $0x1e0] sm:$0xff] }
  0x88   : > { %581 = vmatpush2.msra.mxu0 %v420_v50  ;;  %694 = vmatpush2.msra.mxu1 %v422_v51  ;;  %v330_v45 = vld [vmem:[#allocation5 + $0x1f0] sm:$0xff]  ;;  %v321_v46 = vld [vmem:[#allocation5 + $0x1a8] sm:$0xff]  ;;  %v323_v47 = vld [vmem:[#allocation5 + $0x1b8] sm:$0xff] }
  0x89   : > { %582 = vmatprep.subr.mxu0 %v413_v52  ;;  %695 = vmatprep.subr.mxu1 %v415_v53  ;;  %v2834_v48 = vld [vmem:[%s2773_s6 + $0x58] sm:$0xff]  ;;  %v320_v49 = vld [vmem:[#allocation5 + $0x1a0] sm:$0xff]  ;;  %v322_v50 = vld [vmem:[#allocation5 + $0x1b0] sm:$0xff] }
  0x8a   : > { %583 = vmatpush2.msra.mxu0 %v412_v54  ;;  %696 = vmatpush2.msra.mxu1 %v414_v55  ;;  %v2837_v51 = vld [vmem:[%s2773_s6 + $0x50] sm:$0xff]  ;;  %v313_v52 = vld [vmem:[#allocation5 + $0x168] sm:$0xff]  ;;  %v315_v53 = vld [vmem:[#allocation5 + $0x178] sm:$0xff] }
  0x8b   : > { %584 = vmatprep.subr.mxu0 %v405_v56  ;;  %697 = vmatprep.subr.mxu1 %v407_v57  ;;  %v312_v54 = vld [vmem:[#allocation5 + $0x160] sm:$0xff]  ;;  %v314_v55 = vld [vmem:[#allocation5 + $0x170] sm:$0xff]  ;;  %v305_v56 = vld [vmem:[#allocation5 + $0x128] sm:$0xff] }
  0x8c   : > { %585 = vmatpush2.msra.mxu0 %v404_v58  ;;  %698 = vmatpush2.msra.mxu1 %v406_v59  ;;  %v307_v57 = vld [vmem:[#allocation5 + $0x138] sm:$0xff]  ;;  %v2844_v58 = vld [vmem:[%s2773_s6 + $0x68] sm:$0xff]  ;;  %v304_v59 = vld [vmem:[#allocation5 + $0x120] sm:$0xff] }
  0x8d   : > { %586 = vmatprep.subr.mxu0 %v397_v60  ;;  %699 = vmatprep.subr.mxu1 %v399_v61  ;;  %v306_v60 = vld [vmem:[#allocation5 + $0x130] sm:$0xff]  ;;  %v2847_v61 = vld [vmem:[%s2773_s6 + $0x60] sm:$0xff] }
  0x8e   : > { %587 = vmatpush2.msra.mxu0 %v396_v62  ;;  %588 = vmatprep.mubr.f32.mxu0 %v2784_v63  ;;  %v297_v62 = vld [vmem:[#allocation5 + $0xe8] sm:$0xff] }
  0x8f   : > { %700 = vmatpush2.msra.mxu1 %v398_v0  ;;  %701 = vmatprep.mubr.f32.mxu1 %v2784_v63  ;;  %v299_v0 = vld [vmem:[#allocation5 + $0xf8] sm:$0xff] }
  0x90   : > { %589 = vmatmul.mubr.f32.vlgmr.msra.gmra.mxu0 %v2787_v1  ;;  %702 = vmatmul.mubr.f32.vlgmr.msra.gmra.mxu1 %v2787_v1 }
  0x91   : > { %750 = vmatprep.subr.mxu0 %v393_v2  ;;  %863 = vmatprep.subr.mxu1 %v395_v3  ;;  %v296_v2 = vld [vmem:[#allocation5 + $0xe0] sm:$0xff]  ;;  %v298_v3 = vld [vmem:[#allocation5 + $0xf0] sm:$0xff] }
  0x92   : > { %751 = vmatpush1.msra.mxu0 %v392_v4  ;;  %864 = vmatpush1.msra.mxu1 %v394_v5  ;;  %v289_v4 = vld [vmem:[#allocation5 + $0xa8] sm:$0xff]  ;;  %v291_v5 = vld [vmem:[#allocation5 + $0xb8] sm:$0xff] }
  0x93   : > { %752 = vmatprep.subr.mxu0 %v385_v6  ;;  %865 = vmatprep.subr.mxu1 %v387_v7  ;;  %v2854_v6 = vld [vmem:[%s2773_s6 + $0x78] sm:$0xff]  ;;  %v288_v7 = vld [vmem:[#allocation5 + $0xa0] sm:$0xff] }
  0x94   : > { %594 = vmatprep.mubr.f32.mxu0 %v2794_v8  ;;  %707 = vmatprep.mubr.f32.mxu1 %v2794_v8 }
  0x95   : > { %753 = vmatpush1.msra.mxu0 %v384_v9  ;;  %866 = vmatpush1.msra.mxu1 %v386_v10  ;;  %v290_v9 = vld [vmem:[#allocation5 + $0xb0] sm:$0xff] }
  0x96   : > { %595 = vmatmul.mubr.f32.gmra.mxu0 %v2797_v11  ;;  %708 = vmatmul.mubr.f32.gmra.mxu1 %v2797_v11  ;;  %v2857_v10 = vld [vmem:[%s2773_s6 + $0x70] sm:$0xff] }
  0x97   : > { %754 = vmatprep.subr.mxu0 %v377_v12  ;;  %867 = vmatprep.subr.mxu1 %v379_v13  ;;  %v281_v12 = vld [vmem:[#allocation5 + $0x68] sm:$0xff]  ;;  %v283_v13 = vld [vmem:[#allocation5 + $0x78] sm:$0xff] }
  0x98   : > { %755 = vmatpush1.msra.mxu0 %v376_v14  ;;  %868 = vmatpush1.msra.mxu1 %v378_v15  ;;  %v280_v14 = vld [vmem:[#allocation5 + $0x60] sm:$0xff]  ;;  %v282_v15 = vld [vmem:[#allocation5 + $0x70] sm:$0xff] }
  0x99   : > { %756 = vmatprep.subr.mxu0 %v369_v16  ;;  %869 = vmatprep.subr.mxu1 %v371_v17  ;;  %v273_v16 = vld [vmem:[#allocation5 + $0x28] sm:$0xff]  ;;  %v275_v17 = vld [vmem:[#allocation5 + $0x38] sm:$0xff] }
  0x9a   : > { %600 = vmatprep.mubr.f32.mxu0 %v2804_v18  ;;  %713 = vmatprep.mubr.f32.mxu1 %v2804_v18 }
  0x9b   : > { %757 = vmatpush1.msra.mxu0 %v368_v19  ;;  %870 = vmatpush1.msra.mxu1 %v370_v20  ;;  %v272_v19 = vld [vmem:[#allocation5 + $0x20] sm:$0xff]  ;;  %v274_v20 = vld [vmem:[#allocation5 + $0x30] sm:$0xff] }
  0x9c   : > { %601 = vmatmul.mubr.f32.gmra.mxu0 %v2807_v21  ;;  %714 = vmatmul.mubr.f32.gmra.mxu1 %v2807_v21 }
  0x9d   : > { %758 = vmatprep.subr.mxu0 %v361_v22  ;;  %871 = vmatprep.subr.mxu1 %v363_v23  ;;  %v521_v22 = vld [vmem:[#allocation5 + $0x7e8] sm:$0xff]  ;;  %v523_v23 = vld [vmem:[#allocation5 + $0x7f8] sm:$0xff] }
  0x9e   : > { %759 = vmatpush1.msra.mxu0 %v360_v24  ;;  %872 = vmatpush1.msra.mxu1 %v362_v25  ;;  %v520_v24 = vld [vmem:[#allocation5 + $0x7e0] sm:$0xff]  ;;  %v522_v25 = vld [vmem:[#allocation5 + $0x7f0] sm:$0xff] }
  0x9f   : > { %760 = vmatprep.subr.mxu0 %v353_v26  ;;  %873 = vmatprep.subr.mxu1 %v355_v27  ;;  %v513_v26 = vld [vmem:[#allocation5 + $0x7a8] sm:$0xff]  ;;  %v515_v27 = vld [vmem:[#allocation5 + $0x7b8] sm:$0xff] }
  0xa0   : > { %606 = vmatprep.mubr.f32.mxu0 %v2814_v28  ;;  %719 = vmatprep.mubr.f32.mxu1 %v2814_v28 }
  0xa1   : > { %761 = vmatpush1.msra.mxu0 %v352_v29  ;;  %874 = vmatpush1.msra.mxu1 %v354_v30  ;;  %v512_v29 = vld [vmem:[#allocation5 + $0x7a0] sm:$0xff]  ;;  %v514_v30 = vld [vmem:[#allocation5 + $0x7b0] sm:$0xff] }
  0xa2   : > { %607 = vmatmul.mubr.f32.gmra.mxu0 %v2817_v31  ;;  %720 = vmatmul.mubr.f32.gmra.mxu1 %v2817_v31 }
  0xa3   : > { %762 = vmatprep.subr.mxu0 %v345_v32  ;;  %875 = vmatprep.subr.mxu1 %v347_v33  ;;  %v505_v32 = vld [vmem:[#allocation5 + $0x768] sm:$0xff]  ;;  %v507_v33 = vld [vmem:[#allocation5 + $0x778] sm:$0xff] }
  0xa4   : > { %763 = vmatpush1.msra.mxu0 %v344_v34  ;;  %876 = vmatpush1.msra.mxu1 %v346_v35  ;;  %v504_v34 = vld [vmem:[#allocation5 + $0x760] sm:$0xff]  ;;  %v506_v35 = vld [vmem:[#allocation5 + $0x770] sm:$0xff] }
  0xa5   : > { %764 = vmatprep.subr.mxu0 %v337_v36  ;;  %877 = vmatprep.subr.mxu1 %v339_v37  ;;  %v497_v36 = vld [vmem:[#allocation5 + $0x728] sm:$0xff]  ;;  %v499_v37 = vld [vmem:[#allocation5 + $0x738] sm:$0xff] }
  0xa6   : > { %612 = vmatprep.mubr.f32.mxu0 %v2824_v38  ;;  %725 = vmatprep.mubr.f32.mxu1 %v2824_v38 }
  0xa7   : > { %765 = vmatpush1.msra.mxu0 %v336_v39  ;;  %878 = vmatpush1.msra.mxu1 %v338_v40  ;;  %v496_v39 = vld [vmem:[#allocation5 + $0x720] sm:$0xff]  ;;  %v498_v40 = vld [vmem:[#allocation5 + $0x730] sm:$0xff] }
  0xa8   : > { %613 = vmatmul.mubr.f32.gmra.mxu0 %v2827_v41  ;;  %726 = vmatmul.mubr.f32.gmra.mxu1 %v2827_v41 }
  0xa9   : > { %766 = vmatprep.subr.mxu0 %v329_v42  ;;  %879 = vmatprep.subr.mxu1 %v331_v43  ;;  %v489_v42 = vld [vmem:[#allocation5 + $0x6e8] sm:$0xff]  ;;  %v491_v43 = vld [vmem:[#allocation5 + $0x6f8] sm:$0xff] }
  0xaa   : > { %767 = vmatpush1.msra.mxu0 %v328_v44  ;;  %880 = vmatpush1.msra.mxu1 %v330_v45  ;;  %v488_v44 = vld [vmem:[#allocation5 + $0x6e0] sm:$0xff]  ;;  %v490_v45 = vld [vmem:[#allocation5 + $0x6f0] sm:$0xff] }
  0xab   : > { %768 = vmatprep.subr.mxu0 %v321_v46  ;;  %881 = vmatprep.subr.mxu1 %v323_v47  ;;  %v481_v46 = vld [vmem:[#allocation5 + $0x6a8] sm:$0xff]  ;;  %v483_v47 = vld [vmem:[#allocation5 + $0x6b8] sm:$0xff] }
  0xac   : > { %618 = vmatprep.mubr.f32.mxu0 %v2834_v48  ;;  %731 = vmatprep.mubr.f32.mxu1 %v2834_v48 }
  0xad   : > { %769 = vmatpush1.msra.mxu0 %v320_v49  ;;  %882 = vmatpush1.msra.mxu1 %v322_v50  ;;  %v480_v49 = vld [vmem:[#allocation5 + $0x6a0] sm:$0xff]  ;;  %v482_v50 = vld [vmem:[#allocation5 + $0x6b0] sm:$0xff] }
  0xae   : > { %619 = vmatmul.mubr.f32.gmra.mxu0 %v2837_v51  ;;  %732 = vmatmul.mubr.f32.gmra.mxu1 %v2837_v51 }
  0xaf   : > { %770 = vmatprep.subr.mxu0 %v313_v52  ;;  %883 = vmatprep.subr.mxu1 %v315_v53  ;;  %v473_v52 = vld [vmem:[#allocation5 + $0x668] sm:$0xff]  ;;  %v475_v53 = vld [vmem:[#allocation5 + $0x678] sm:$0xff] }
  0xb0   : > { %771 = vmatpush1.msra.mxu0 %v312_v54  ;;  %884 = vmatpush1.msra.mxu1 %v314_v55  ;;  %v472_v54 = vld [vmem:[#allocation5 + $0x660] sm:$0xff]  ;;  %v474_v55 = vld [vmem:[#allocation5 + $0x670] sm:$0xff] }
  0xb1   : > { %772 = vmatprep.subr.mxu0 %v305_v56  ;;  %885 = vmatprep.subr.mxu1 %v307_v57  ;;  %v465_v56 = vld [vmem:[#allocation5 + $0x628] sm:$0xff]  ;;  %v467_v57 = vld [vmem:[#allocation5 + $0x638] sm:$0xff] }
  0xb2   : > { %624 = vmatprep.mubr.f32.mxu0 %v2844_v58  ;;  %737 = vmatprep.mubr.f32.mxu1 %v2844_v58 }
  0xb3   : > { %773 = vmatpush1.msra.mxu0 %v304_v59  ;;  %886 = vmatpush1.msra.mxu1 %v306_v60  ;;  %v464_v59 = vld [vmem:[#allocation5 + $0x620] sm:$0xff]  ;;  %v466_v60 = vld [vmem:[#allocation5 + $0x630] sm:$0xff] }
  0xb4   : > { %625 = vmatmul.mubr.f32.gmra.mxu0 %v2847_v61  ;;  %738 = vmatmul.mubr.f32.gmra.mxu1 %v2847_v61 }
  0xb5   : > { %774 = vmatprep.subr.mxu0 %v297_v62  ;;  %887 = vmatprep.subr.mxu1 %v299_v0  ;;  %v457_v62 = vld [vmem:[#allocation5 + $0x5e8] sm:$0xff]  ;;  %v459_v0 = vld [vmem:[#allocation5 + $0x5f8] sm:$0xff] }
  0xb6   : > { %775 = vmatpush1.msra.mxu0 %v296_v2  ;;  %888 = vmatpush1.msra.mxu1 %v298_v3  ;;  %v456_v2 = vld [vmem:[#allocation5 + $0x5e0] sm:$0xff]  ;;  %v458_v3 = vld [vmem:[#allocation5 + $0x5f0] sm:$0xff] }
  0xb7   : > { %776 = vmatprep.subr.mxu0 %v289_v4  ;;  %889 = vmatprep.subr.mxu1 %v291_v5  ;;  %v449_v4 = vld [vmem:[#allocation5 + $0x5a8] sm:$0xff]  ;;  %v451_v5 = vld [vmem:[#allocation5 + $0x5b8] sm:$0xff] }
  0xb8   : > { %630 = vmatprep.mubr.f32.mxu0 %v2854_v6  ;;  %743 = vmatprep.mubr.f32.mxu1 %v2854_v6 }
  0xb9   : > { %777 = vmatpush1.msra.mxu0 %v288_v7  ;;  %890 = vmatpush1.msra.mxu1 %v290_v9  ;;  %v448_v7 = vld [vmem:[#allocation5 + $0x5a0] sm:$0xff]  ;;  %v450_v9 = vld [vmem:[#allocation5 + $0x5b0] sm:$0xff] }
  0xba   : > { %631 = vmatmul.mubr.f32.gmra.mxu0 %v2857_v10  ;;  %744 = vmatmul.mubr.f32.gmra.mxu1 %v2857_v10 }
  0xbb   : > { %778 = vmatprep.subr.mxu0 %v281_v12  ;;  %891 = vmatprep.subr.mxu1 %v283_v13  ;;  %v441_v12 = vld [vmem:[#allocation5 + $0x568] sm:$0xff]  ;;  %v443_v13 = vld [vmem:[#allocation5 + $0x578] sm:$0xff] }
  0xbc   : > { %779 = vmatpush1.msra.mxu0 %v280_v14  ;;  %892 = vmatpush1.msra.mxu1 %v282_v15  ;;  %v440_v14 = vld [vmem:[#allocation5 + $0x560] sm:$0xff]  ;;  %v442_v15 = vld [vmem:[#allocation5 + $0x570] sm:$0xff] }
  0xbd   : > { %780 = vmatprep.subr.mxu0 %v273_v16  ;;  %893 = vmatprep.subr.mxu1 %v275_v17  ;;  %v433_v16 = vld [vmem:[#allocation5 + $0x528] sm:$0xff]  ;;  %v435_v17 = vld [vmem:[#allocation5 + $0x538] sm:$0xff] }
  0xbe   : > { %781 = vmatpush1.msra.mxu0 %v272_v19  ;;  %894 = vmatpush1.msra.mxu1 %v274_v20  ;;  %v432_v19 = vld [vmem:[#allocation5 + $0x520] sm:$0xff]  ;;  %v434_v20 = vld [vmem:[#allocation5 + $0x530] sm:$0xff] }
  0xbf   : > { %782 = vmatprep.subr.mxu0 %v521_v22  ;;  %895 = vmatprep.subr.mxu1 %v523_v23  ;;  %v425_v22 = vld [vmem:[#allocation5 + $0x4e8] sm:$0xff]  ;;  %v427_v23 = vld [vmem:[#allocation5 + $0x4f8] sm:$0xff] }
  0xc0   : > { %783 = vmatpush2.msra.mxu0 %v520_v24  ;;  %896 = vmatpush2.msra.mxu1 %v522_v25  ;;  %v424_v24 = vld [vmem:[#allocation5 + $0x4e0] sm:$0xff]  ;;  %v426_v25 = vld [vmem:[#allocation5 + $0x4f0] sm:$0xff] }
  0xc1   : > { %784 = vmatprep.subr.mxu0 %v513_v26  ;;  %897 = vmatprep.subr.mxu1 %v515_v27  ;;  %v417_v26 = vld [vmem:[#allocation5 + $0x4a8] sm:$0xff]  ;;  %v419_v27 = vld [vmem:[#allocation5 + $0x4b8] sm:$0xff] }
  0xc2   : > { %785 = vmatpush2.msra.mxu0 %v512_v29  ;;  %898 = vmatpush2.msra.mxu1 %v514_v30  ;;  %v416_v29 = vld [vmem:[#allocation5 + $0x4a0] sm:$0xff]  ;;  %v418_v30 = vld [vmem:[#allocation5 + $0x4b0] sm:$0xff] }
  0xc3   : > { %786 = vmatprep.subr.mxu0 %v505_v32  ;;  %899 = vmatprep.subr.mxu1 %v507_v33  ;;  %v409_v32 = vld [vmem:[#allocation5 + $0x468] sm:$0xff]  ;;  %v411_v33 = vld [vmem:[#allocation5 + $0x478] sm:$0xff] }
  0xc4   : > { %787 = vmatpush2.msra.mxu0 %v504_v34  ;;  %900 = vmatpush2.msra.mxu1 %v506_v35  ;;  %v408_v34 = vld [vmem:[#allocation5 + $0x460] sm:$0xff]  ;;  %v410_v35 = vld [vmem:[#allocation5 + $0x470] sm:$0xff] }
  0xc5   : > { %788 = vmatprep.subr.mxu0 %v497_v36  ;;  %901 = vmatprep.subr.mxu1 %v499_v37  ;;  %v401_v36 = vld [vmem:[#allocation5 + $0x428] sm:$0xff]  ;;  %v403_v37 = vld [vmem:[#allocation5 + $0x438] sm:$0xff] }
  0xc6   : > { %789 = vmatpush2.msra.mxu0 %v496_v39  ;;  %902 = vmatpush2.msra.mxu1 %v498_v40  ;;  %v400_v39 = vld [vmem:[#allocation5 + $0x420] sm:$0xff]  ;;  %v402_v40 = vld [vmem:[#allocation5 + $0x430] sm:$0xff] }
  0xc7   : > { %790 = vmatprep.subr.mxu0 %v489_v42  ;;  %903 = vmatprep.subr.mxu1 %v491_v43  ;;  %v1743_v42 = vld [vmem:[#allocation7 + $0xf8] sm:$0xff] }
  0xc8   : > { %791 = vmatpush2.msra.mxu0 %v488_v44  ;;  %904 = vmatpush2.msra.mxu1 %v490_v45  ;;  %v1807_v43 = vld [vmem:[#allocation7 + $0x2f8] sm:$0xff]  ;;  %v1806_v44 = vld [vmem:[#allocation7 + $0x2f0] sm:$0xff]  ;;  %v1805_v45 = vld [vmem:[#allocation7 + $0x2e8] sm:$0xff] }
  0xc9   : > { %792 = vmatprep.subr.mxu0 %v481_v46  ;;  %905 = vmatprep.subr.mxu1 %v483_v47  ;;  %v1803_v46 = vld [vmem:[#allocation7 + $0x2d8] sm:$0xff]  ;;  %v1738_v47 = vld [vmem:[#allocation7 + $0xd0] sm:$0xff] }
  0xca   : > { %793 = vmatpush2.msra.mxu0 %v480_v49  ;;  %906 = vmatpush2.msra.mxu1 %v482_v50  ;;  %v1802_v49 = vld [vmem:[#allocation7 + $0x2d0] sm:$0xff]  ;;  %v1736_v50 = vld [vmem:[#allocation7 + $0xc0] sm:$0xff] }
  0xcb   : > { %794 = vmatprep.subr.mxu0 %v473_v52  ;;  %907 = vmatprep.subr.mxu1 %v475_v53  ;;  %v1800_v52 = vld [vmem:[#allocation7 + $0x2c0] sm:$0xff]  ;;  %v1734_v53 = vld [vmem:[#allocation7 + $0xb0] sm:$0xff] }
  0xcc   : > { %795 = vmatpush2.msra.mxu0 %v472_v54  ;;  %908 = vmatpush2.msra.mxu1 %v474_v55  ;;  %v1798_v54 = vld [vmem:[#allocation7 + $0x2b0] sm:$0xff]  ;;  %v1732_v55 = vld [vmem:[#allocation7 + $0xa0] sm:$0xff] }
  0xcd   : > { %796 = vmatprep.subr.mxu0 %v465_v56  ;;  %909 = vmatprep.subr.mxu1 %v467_v57  ;;  %v1796_v56 = vld [vmem:[#allocation7 + $0x2a0] sm:$0xff]  ;;  %v1730_v57 = vld [vmem:[#allocation7 + $0x90] sm:$0xff] }
  0xce   : > { %797 = vmatpush2.msra.mxu0 %v464_v59  ;;  %910 = vmatpush2.msra.mxu1 %v466_v60  ;;  %v1794_v59 = vld [vmem:[#allocation7 + $0x290] sm:$0xff]  ;;  %v1729_v60 = vld [vmem:[#allocation7 + $0x88] sm:$0xff] }
  0xcf   : > { %798 = vmatprep.subr.mxu0 %v457_v62  ;;  %911 = vmatprep.subr.mxu1 %v459_v0  ;;  %v1728_v62 = vld [vmem:[#allocation7 + $0x80] sm:$0xff] }
  0xd0   : > { %799 = vmatpush2.msra.mxu0 %v456_v2  ;;  %912 = vmatpush2.msra.mxu1 %v458_v3  ;;  %v1792_v0 = vld [vmem:[#allocation7 + $0x280] sm:$0xff]  ;;  %v1791_v2 = vld [vmem:[#allocation7 + $0x278] sm:$0xff]  ;;  %v1726_v3 = vld [vmem:[#allocation7 + $0x70] sm:$0xff] }
  0xd1   : > { %800 = vmatprep.subr.mxu0 %v449_v4  ;;  %913 = vmatprep.subr.mxu1 %v451_v5  ;;  %v1790_v4 = vld [vmem:[#allocation7 + $0x270] sm:$0xff]  ;;  %v1725_v5 = vld [vmem:[#allocation7 + $0x68] sm:$0xff] }
  0xd2   : > { %801 = vmatpush2.msra.mxu0 %v448_v7  ;;  %914 = vmatpush2.msra.mxu1 %v450_v9  ;;  %v1724_v7 = vld [vmem:[#allocation7 + $0x60] sm:$0xff] }
  0xd3   : > { %802 = vmatprep.subr.mxu0 %v441_v12  ;;  %915 = vmatprep.subr.mxu1 %v443_v13  ;;  %v1788_v9 = vld [vmem:[#allocation7 + $0x260] sm:$0xff]  ;;  %v1723_v12 = vld [vmem:[#allocation7 + $0x58] sm:$0xff] }
  0xd4   : > { %803 = vmatpush2.msra.mxu0 %v440_v14  ;;  %916 = vmatpush2.msra.mxu1 %v442_v15  ;;  %v1787_v13 = vld [vmem:[#allocation7 + $0x258] sm:$0xff]  ;;  %v1722_v14 = vld [vmem:[#allocation7 + $0x50] sm:$0xff] }
  0xd5   : > { %804 = vmatprep.subr.mxu0 %v433_v16  ;;  %917 = vmatprep.subr.mxu1 %v435_v17  ;;  %v1786_v15 = vld [vmem:[#allocation7 + $0x250] sm:$0xff]  ;;  %v1721_v16 = vld [vmem:[#allocation7 + $0x48] sm:$0xff] }
  0xd6   : > { %805 = vmatpush2.msra.mxu0 %v432_v19  ;;  %918 = vmatpush2.msra.mxu1 %v434_v20  ;;  %v1785_v17 = vld [vmem:[#allocation7 + $0x248] sm:$0xff]  ;;  %v1720_v19 = vld [vmem:[#allocation7 + $0x40] sm:$0xff] }
  0xd7   : > { %806 = vmatprep.subr.mxu0 %v425_v22  ;;  %919 = vmatprep.subr.mxu1 %v427_v23  ;;  %v1784_v20 = vld [vmem:[#allocation7 + $0x240] sm:$0xff]  ;;  %v1719_v22 = vld [vmem:[#allocation7 + $0x38] sm:$0xff] }
  0xd8   : > { %807 = vmatpush2.msra.mxu0 %v424_v24  ;;  %920 = vmatpush2.msra.mxu1 %v426_v25  ;;  %v1783_v23 = vld [vmem:[#allocation7 + $0x238] sm:$0xff]  ;;  %v1718_v24 = vld [vmem:[#allocation7 + $0x30] sm:$0xff] }
  0xd9   : > { %808 = vmatprep.subr.mxu0 %v417_v26  ;;  %921 = vmatprep.subr.mxu1 %v419_v27  ;;  %v1782_v25 = vld [vmem:[#allocation7 + $0x230] sm:$0xff]  ;;  %v1717_v26 = vld [vmem:[#allocation7 + $0x28] sm:$0xff] }
  0xda   : > { %809 = vmatpush2.msra.mxu0 %v416_v29  ;;  %922 = vmatpush2.msra.mxu1 %v418_v30  ;;  %v1781_v27 = vld [vmem:[#allocation7 + $0x228] sm:$0xff]  ;;  %v1716_v29 = vld [vmem:[#allocation7 + $0x20] sm:$0xff] }
  0xdb   : > { %810 = vmatprep.subr.mxu0 %v409_v32  ;;  %923 = vmatprep.subr.mxu1 %v411_v33  ;;  %v1780_v30 = vld [vmem:[#allocation7 + $0x220] sm:$0xff]  ;;  %v1715_v32 = vld [vmem:[#allocation7 + $0x18] sm:$0xff] }
  0xdc   : > { %811 = vmatpush2.msra.mxu0 %v408_v34  ;;  %924 = vmatpush2.msra.mxu1 %v410_v35  ;;  %v1779_v33 = vld [vmem:[#allocation7 + $0x218] sm:$0xff]  ;;  %v1714_v34 = vld [vmem:[#allocation7 + $0x10] sm:$0xff] }
  0xdd   : > { %812 = vmatprep.subr.mxu0 %v401_v36  ;;  %925 = vmatprep.subr.mxu1 %v403_v37  ;;  %v1778_v35 = vld [vmem:[#allocation7 + $0x210] sm:$0xff]  ;;  %v1713_v36 = vld [vmem:[#allocation7 + $0x8] sm:$0xff] }
  0xde   : > { %813 = vmatpush2.msra.mxu0 %v400_v39  ;;  %814 = vmatprep.mubr.f32.mxu0 %v2784_v63  ;;  %v1777_v37 = vld [vmem:[#allocation7 + $0x208] sm:$0xff]  ;;  %v1712_v39 = vld [vmem:[#allocation7] sm:$0xff] }
  0xdf   : > { %926 = vmatpush2.msra.mxu1 %v402_v40  ;;  %927 = vmatprep.mubr.f32.mxu1 %v2784_v63  ;;  %v1742_v63 = vld [vmem:[#allocation7 + $0xf0] sm:$0xff]  ;;  %v1776_v40 = vld [vmem:[#allocation7 + $0x200] sm:$0xff] }
  0xe0   : > { %815 = vmatmul.mubr.f32.vlgmr.msra.gmra.mxu0 %v2787_v1  ;;  %928 = vmatmul.mubr.f32.vlgmr.msra.gmra.mxu1 %v2787_v1  ;;  %v1741_v1 = vld [vmem:[#allocation7 + $0xe8] sm:$0xff] }
  0xe1   : > { %820 = vmatprep.mubr.f32.mxu0 %v2794_v8  ;;  %933 = vmatprep.mubr.f32.mxu1 %v2794_v8  ;;  %v1740_v8 = vld [vmem:[#allocation7 + $0xe0] sm:$0xff] }
  0xe2   : > { %1840 = vmatprep.subr.mxu0 %v1743_v42  ;;  %1953 = vmatprep.subr.mxu1 %v1807_v43  ;;  %v1775_v42 = vld [vmem:[#allocation7 + $0x1f8] sm:$0xff] }
  0xe3   : > { %1841 = vmatpush1.msra.mxu0 %v1742_v63  ;;  %1954 = vmatpush1.msra.mxu1 %v1806_v44  ;;  %v1839_v43 = vld [vmem:[#allocation7 + $0x3f8] sm:$0xff]  ;;  %v1774_v63 = vld [vmem:[#allocation7 + $0x1f0] sm:$0xff] }
  0xe4   : > { %821 = vmatmul.mubr.f32.gmra.mxu0 %v2797_v11  ;;  %934 = vmatmul.mubr.f32.gmra.mxu1 %v2797_v11  ;;  %v1804_v11 = vld [vmem:[#allocation7 + $0x2e0] sm:$0xff]  ;;  %v1838_v44 = vld [vmem:[#allocation7 + $0x3f0] sm:$0xff] }
  0xe5   : > { %826 = vmatprep.mubr.f32.mxu0 %v2804_v18  ;;  %939 = vmatprep.mubr.f32.mxu1 %v2804_v18  ;;  %v1739_v18 = vld [vmem:[#allocation7 + $0xd8] sm:$0xff] }
  0xe6   : > { %1842 = vmatprep.subr.mxu0 %v1741_v1  ;;  %1955 = vmatprep.subr.mxu1 %v1805_v45  ;;  %v1773_v1 = vld [vmem:[#allocation7 + $0x1e8] sm:$0xff] }
  0xe7   : > { %1843 = vmatpush1.msra.mxu0 %v1740_v8  ;;  %1956 = vmatpush1.msra.mxu1 %v1804_v11  ;;  %v1837_v45 = vld [vmem:[#allocation7 + $0x3e8] sm:$0xff]  ;;  %v1772_v8 = vld [vmem:[#allocation7 + $0x1e0] sm:$0xff] }
  0xe8   : > { %827 = vmatmul.mubr.f32.gmra.mxu0 %v2807_v21  ;;  %940 = vmatmul.mubr.f32.gmra.mxu1 %v2807_v21  ;;  %v1737_v21 = vld [vmem:[#allocation7 + $0xc8] sm:$0xff]  ;;  %v1836_v11 = vld [vmem:[#allocation7 + $0x3e0] sm:$0xff] }
  0xe9   : > { %832 = vmatprep.mubr.f32.mxu0 %v2814_v28  ;;  %945 = vmatprep.mubr.f32.mxu1 %v2814_v28  ;;  %v1801_v28 = vld [vmem:[#allocation7 + $0x2c8] sm:$0xff] }
  0xea   : > { %1844 = vmatprep.subr.mxu0 %v1739_v18  ;;  %1957 = vmatprep.subr.mxu1 %v1803_v46  ;;  %v1771_v18 = vld [vmem:[#allocation7 + $0x1d8] sm:$0xff] }
  0xeb   : > { %1845 = vmatpush1.msra.mxu0 %v1738_v47  ;;  %1958 = vmatpush1.msra.mxu1 %v1802_v49  ;;  %v1835_v46 = vld [vmem:[#allocation7 + $0x3d8] sm:$0xff]  ;;  %v1770_v47 = vld [vmem:[#allocation7 + $0x1d0] sm:$0xff] }
  0xec   : > { %833 = vmatmul.mubr.f32.gmra.mxu0 %v2817_v31  ;;  %946 = vmatmul.mubr.f32.gmra.mxu1 %v2817_v31  ;;  %v1735_v31 = vld [vmem:[#allocation7 + $0xb8] sm:$0xff]  ;;  %v1834_v49 = vld [vmem:[#allocation7 + $0x3d0] sm:$0xff] }
  0xed   : > { %838 = vmatprep.mubr.f32.mxu0 %v2824_v38  ;;  %951 = vmatprep.mubr.f32.mxu1 %v2824_v38  ;;  %v1799_v38 = vld [vmem:[#allocation7 + $0x2b8] sm:$0xff] }
  0xee   : > { %1846 = vmatprep.subr.mxu0 %v1737_v21  ;;  %1959 = vmatprep.subr.mxu1 %v1801_v28  ;;  %v1769_v21 = vld [vmem:[#allocation7 + $0x1c8] sm:$0xff] }
  0xef   : > { %1847 = vmatpush1.msra.mxu0 %v1736_v50  ;;  %1960 = vmatpush1.msra.mxu1 %v1800_v52  ;;  %v1833_v28 = vld [vmem:[#allocation7 + $0x3c8] sm:$0xff]  ;;  %v1768_v50 = vld [vmem:[#allocation7 + $0x1c0] sm:$0xff] }
  0xf0   : > { %839 = vmatmul.mubr.f32.gmra.mxu0 %v2827_v41  ;;  %952 = vmatmul.mubr.f32.gmra.mxu1 %v2827_v41  ;;  %v1733_v41 = vld [vmem:[#allocation7 + $0xa8] sm:$0xff]  ;;  %v1832_v52 = vld [vmem:[#allocation7 + $0x3c0] sm:$0xff] }
  0xf1   : > { %844 = vmatprep.mubr.f32.mxu0 %v2834_v48  ;;  %957 = vmatprep.mubr.f32.mxu1 %v2834_v48  ;;  %v1797_v48 = vld [vmem:[#allocation7 + $0x2a8] sm:$0xff] }
  0xf2   : > { %1848 = vmatprep.subr.mxu0 %v1735_v31  ;;  %1961 = vmatprep.subr.mxu1 %v1799_v38  ;;  %v1767_v31 = vld [vmem:[#allocation7 + $0x1b8] sm:$0xff] }
  0xf3   : > { %1849 = vmatpush1.msra.mxu0 %v1734_v53  ;;  %1962 = vmatpush1.msra.mxu1 %v1798_v54  ;;  %v1831_v38 = vld [vmem:[#allocation7 + $0x3b8] sm:$0xff]  ;;  %v1766_v53 = vld [vmem:[#allocation7 + $0x1b0] sm:$0xff] }
  0xf4   : > { %845 = vmatmul.mubr.f32.gmra.mxu0 %v2837_v51  ;;  %958 = vmatmul.mubr.f32.gmra.mxu1 %v2837_v51  ;;  %v1731_v51 = vld [vmem:[#allocation7 + $0x98] sm:$0xff]  ;;  %v1830_v54 = vld [vmem:[#allocation7 + $0x3b0] sm:$0xff] }
  0xf5   : > { %850 = vmatprep.mubr.f32.mxu0 %v2844_v58  ;;  %963 = vmatprep.mubr.f32.mxu1 %v2844_v58  ;;  %v1795_v58 = vld [vmem:[#allocation7 + $0x298] sm:$0xff] }
  0xf6   : > { %1850 = vmatprep.subr.mxu0 %v1733_v41  ;;  %1963 = vmatprep.subr.mxu1 %v1797_v48  ;;  %v1765_v41 = vld [vmem:[#allocation7 + $0x1a8] sm:$0xff] }
  0xf7   : > { %1851 = vmatpush1.msra.mxu0 %v1732_v55  ;;  %1964 = vmatpush1.msra.mxu1 %v1796_v56  ;;  %v1829_v48 = vld [vmem:[#allocation7 + $0x3a8] sm:$0xff]  ;;  %v1764_v55 = vld [vmem:[#allocation7 + $0x1a0] sm:$0xff] }
  0xf8   : > { %851 = vmatmul.mubr.f32.gmra.mxu0 %v2847_v61  ;;  %964 = vmatmul.mubr.f32.gmra.mxu1 %v2847_v61  ;;  %v1793_v61 = vld [vmem:[#allocation7 + $0x288] sm:$0xff]  ;;  %v1828_v56 = vld [vmem:[#allocation7 + $0x3a0] sm:$0xff] }
  0xf9   : > { %856 = vmatprep.mubr.f32.mxu0 %v2854_v6  ;;  %969 = vmatprep.mubr.f32.mxu1 %v2854_v6  ;;  %v1727_v6 = vld [vmem:[#allocation7 + $0x78] sm:$0xff] }
  0xfa   : > { %1852 = vmatprep.subr.mxu0 %v1731_v51  ;;  %1965 = vmatprep.subr.mxu1 %v1795_v58  ;;  %v1763_v51 = vld [vmem:[#allocation7 + $0x198] sm:$0xff] }
  0xfb   : > { %1853 = vmatpush1.msra.mxu0 %v1730_v57  ;;  %1966 = vmatpush1.msra.mxu1 %v1794_v59  ;;  %v1827_v58 = vld [vmem:[#allocation7 + $0x398] sm:$0xff]  ;;  %v1762_v57 = vld [vmem:[#allocation7 + $0x190] sm:$0xff] }
  0xfc   : > { %857 = vmatmul.mubr.f32.gmra.mxu0 %v2857_v10  ;;  %970 = vmatmul.mubr.f32.gmra.mxu1 %v2857_v10  ;;  %v1789_v10 = vld [vmem:[#allocation7 + $0x268] sm:$0xff]  ;;  %v1826_v59 = vld [vmem:[#allocation7 + $0x390] sm:$0xff] }
  0xfd   : > { %1854 = vmatprep.subr.mxu0 %v1729_v60  ;;  %1967 = vmatprep.subr.mxu1 %v1793_v61  ;;  %v1761_v60 = vld [vmem:[#allocation7 + $0x188] sm:$0xff] }
  0xfe   : > { %1855 = vmatpush1.msra.mxu0 %v1728_v62  ;;  %1968 = vmatpush1.msra.mxu1 %v1792_v0  ;;  %v1825_v61 = vld [vmem:[#allocation7 + $0x388] sm:$0xff]  ;;  %v1760_v62 = vld [vmem:[#allocation7 + $0x180] sm:$0xff] }
  0xff   : > { %1856 = vmatprep.subr.mxu0 %v1727_v6  ;;  %1969 = vmatprep.subr.mxu1 %v1791_v2  ;;  %v1824_v0 = vld [vmem:[#allocation7 + $0x380] sm:$0xff]  ;;  %v1759_v6 = vld [vmem:[#allocation7 + $0x178] sm:$0xff] }
 0x100   : > { %1857 = vmatpush1.msra.mxu0 %v1726_v3  ;;  %1970 = vmatpush1.msra.mxu1 %v1790_v4  ;;  %v1823_v2 = vld [vmem:[#allocation7 + $0x378] sm:$0xff]  ;;  %v1758_v3 = vld [vmem:[#allocation7 + $0x170] sm:$0xff] }
 0x101   : > { %1858 = vmatprep.subr.mxu0 %v1725_v5  ;;  %1971 = vmatprep.subr.mxu1 %v1789_v10  ;;  %v1822_v4 = vld [vmem:[#allocation7 + $0x370] sm:$0xff]  ;;  %v1757_v5 = vld [vmem:[#allocation7 + $0x168] sm:$0xff] }
 0x102   : > { %1859 = vmatpush1.msra.mxu0 %v1724_v7  ;;  %1972 = vmatpush1.msra.mxu1 %v1788_v9  ;;  %v1821_v10 = vld [vmem:[#allocation7 + $0x368] sm:$0xff]  ;;  %v1756_v7 = vld [vmem:[#allocation7 + $0x160] sm:$0xff] }
 0x103   : > { %1860 = vmatprep.subr.mxu0 %v1723_v12  ;;  %1973 = vmatprep.subr.mxu1 %v1787_v13  ;;  %v1820_v9 = vld [vmem:[#allocation7 + $0x360] sm:$0xff]  ;;  %v1755_v12 = vld [vmem:[#allocation7 + $0x158] sm:$0xff] }
 0x104   : > { %1861 = vmatpush1.msra.mxu0 %v1722_v14  ;;  %1974 = vmatpush1.msra.mxu1 %v1786_v15  ;;  %v1819_v13 = vld [vmem:[#allocation7 + $0x358] sm:$0xff]  ;;  %v1754_v14 = vld [vmem:[#allocation7 + $0x150] sm:$0xff] }
 0x105   : > { %1862 = vmatprep.subr.mxu0 %v1721_v16  ;;  %1975 = vmatprep.subr.mxu1 %v1785_v17  ;;  %v1818_v15 = vld [vmem:[#allocation7 + $0x350] sm:$0xff]  ;;  %v1753_v16 = vld [vmem:[#allocation7 + $0x148] sm:$0xff] }
 0x106   : > { %1863 = vmatpush1.msra.mxu0 %v1720_v19  ;;  %1976 = vmatpush1.msra.mxu1 %v1784_v20  ;;  %v1817_v17 = vld [vmem:[#allocation7 + $0x348] sm:$0xff]  ;;  %v1752_v19 = vld [vmem:[#allocation7 + $0x140] sm:$0xff] }
 0x107   : > { %1864 = vmatprep.subr.mxu0 %v1719_v22  ;;  %1977 = vmatprep.subr.mxu1 %v1783_v23  ;;  %v1816_v20 = vld [vmem:[#allocation7 + $0x340] sm:$0xff]  ;;  %v1751_v22 = vld [vmem:[#allocation7 + $0x138] sm:$0xff] }
 0x108   : > { %1865 = vmatpush1.msra.mxu0 %v1718_v24  ;;  %1978 = vmatpush1.msra.mxu1 %v1782_v25  ;;  %v1815_v23 = vld [vmem:[#allocation7 + $0x338] sm:$0xff]  ;;  %v1750_v24 = vld [vmem:[#allocation7 + $0x130] sm:$0xff] }
 0x109   : > { %1866 = vmatprep.subr.mxu0 %v1717_v26  ;;  %1979 = vmatprep.subr.mxu1 %v1781_v27  ;;  %v1814_v25 = vld [vmem:[#allocation7 + $0x330] sm:$0xff]  ;;  %v1749_v26 = vld [vmem:[#allocation7 + $0x128] sm:$0xff] }
 0x10a   : > { %1867 = vmatpush1.msra.mxu0 %v1716_v29  ;;  %1980 = vmatpush1.msra.mxu1 %v1780_v30  ;;  %v1813_v27 = vld [vmem:[#allocation7 + $0x328] sm:$0xff]  ;;  %v1748_v29 = vld [vmem:[#allocation7 + $0x120] sm:$0xff] }
 0x10b   : > { %1868 = vmatprep.subr.mxu0 %v1715_v32  ;;  %1981 = vmatprep.subr.mxu1 %v1779_v33  ;;  %v1812_v30 = vld [vmem:[#allocation7 + $0x320] sm:$0xff]  ;;  %v1747_v32 = vld [vmem:[#allocation7 + $0x118] sm:$0xff] }
 0x10c   : > { %1869 = vmatpush1.msra.mxu0 %v1714_v34  ;;  %1982 = vmatpush1.msra.mxu1 %v1778_v35  ;;  %v1811_v33 = vld [vmem:[#allocation7 + $0x318] sm:$0xff]  ;;  %v1746_v34 = vld [vmem:[#allocation7 + $0x110] sm:$0xff] }
 0x10d   : > { %1870 = vmatprep.subr.mxu0 %v1713_v36  ;;  %1983 = vmatprep.subr.mxu1 %v1777_v37  ;;  %v1810_v35 = vld [vmem:[#allocation7 + $0x310] sm:$0xff]  ;;  %v1745_v36 = vld [vmem:[#allocation7 + $0x108] sm:$0xff] }
 0x10e   : > { %1871 = vmatpush1.msra.mxu0 %v1712_v39  ;;  %1984 = vmatpush1.msra.mxu1 %v1776_v40  ;;  %v1809_v37 = vld [vmem:[#allocation7 + $0x308] sm:$0xff]  ;;  %v1744_v39 = vld [vmem:[#allocation7 + $0x100] sm:$0xff] }
 0x10f   : > { %1872 = vmatprep.subr.mxu0 %v1775_v42  ;;  %1985 = vmatprep.subr.mxu1 %v1839_v43  ;;  %v1808_v40 = vld [vmem:[#allocation7 + $0x300] sm:$0xff] }
 0x110   : > { %1873 = vmatpush2.msra.mxu0 %v1774_v63  ;;  %1986 = vmatpush2.msra.mxu1 %v1838_v44 }
 0x111   : > { %1874 = vmatprep.subr.mxu0 %v1773_v1  ;;  %1987 = vmatprep.subr.mxu1 %v1837_v45 }
 0x112   : > { %1875 = vmatpush2.msra.mxu0 %v1772_v8  ;;  %1988 = vmatpush2.msra.mxu1 %v1836_v11 }
 0x113   : > { %1876 = vmatprep.subr.mxu0 %v1771_v18  ;;  %1989 = vmatprep.subr.mxu1 %v1835_v46 }
 0x114   : > { %1877 = vmatpush2.msra.mxu0 %v1770_v47  ;;  %1990 = vmatpush2.msra.mxu1 %v1834_v49 }
 0x115   : > { %1878 = vmatprep.subr.mxu0 %v1769_v21  ;;  %1991 = vmatprep.subr.mxu1 %v1833_v28 }
 0x116   : > { %1879 = vmatpush2.msra.mxu0 %v1768_v50  ;;  %1992 = vmatpush2.msra.mxu1 %v1832_v52 }
 0x117   : > { %1880 = vmatprep.subr.mxu0 %v1767_v31  ;;  %1993 = vmatprep.subr.mxu1 %v1831_v38 }
 0x118   : > { %1881 = vmatpush2.msra.mxu0 %v1766_v53  ;;  %1994 = vmatpush2.msra.mxu1 %v1830_v54 }
 0x119   : > { %1882 = vmatprep.subr.mxu0 %v1765_v41  ;;  %1995 = vmatprep.subr.mxu1 %v1829_v48 }
 0x11a   : > { %1883 = vmatpush2.msra.mxu0 %v1764_v55  ;;  %1996 = vmatpush2.msra.mxu1 %v1828_v56 }
 0x11b   : > { %1884 = vmatprep.subr.mxu0 %v1763_v51  ;;  %1997 = vmatprep.subr.mxu1 %v1827_v58 }
 0x11c   : > { %1885 = vmatpush2.msra.mxu0 %v1762_v57  ;;  %1998 = vmatpush2.msra.mxu1 %v1826_v59 }
 0x11d   : > { %1886 = vmatprep.subr.mxu0 %v1761_v60  ;;  %1999 = vmatprep.subr.mxu1 %v1825_v61 }
 0x11e   : > { %1887 = vmatpush2.msra.mxu0 %v1760_v62  ;;  %2000 = vmatpush2.msra.mxu1 %v1824_v0 }
 0x11f   : > { %1888 = vmatprep.subr.mxu0 %v1759_v6  ;;  %2001 = vmatprep.subr.mxu1 %v1823_v2 }
 0x120   : > { %1889 = vmatpush2.msra.mxu0 %v1758_v3  ;;  %2002 = vmatpush2.msra.mxu1 %v1822_v4 }
 0x121   : > { %1890 = vmatprep.subr.mxu0 %v1757_v5  ;;  %2003 = vmatprep.subr.mxu1 %v1821_v10 }
 0x122   : > { %1891 = vmatpush2.msra.mxu0 %v1756_v7  ;;  %2004 = vmatpush2.msra.mxu1 %v1820_v9 }
 0x123   : > { %1892 = vmatprep.subr.mxu0 %v1755_v12  ;;  %2005 = vmatprep.subr.mxu1 %v1819_v13 }
 0x124   : > { %1893 = vmatpush2.msra.mxu0 %v1754_v14  ;;  %2006 = vmatpush2.msra.mxu1 %v1818_v15 }
 0x125   : > { %1894 = vmatprep.subr.mxu0 %v1753_v16  ;;  %2007 = vmatprep.subr.mxu1 %v1817_v17 }
 0x126   : > { %1895 = vmatpush2.msra.mxu0 %v1752_v19  ;;  %2008 = vmatpush2.msra.mxu1 %v1816_v20 }
 0x127   : > { %1896 = vmatprep.subr.mxu0 %v1751_v22  ;;  %2009 = vmatprep.subr.mxu1 %v1815_v23 }
 0x128   : > { %1897 = vmatpush2.msra.mxu0 %v1750_v24  ;;  %2010 = vmatpush2.msra.mxu1 %v1814_v25 }
 0x129   : > { %1898 = vmatprep.subr.mxu0 %v1749_v26  ;;  %2011 = vmatprep.subr.mxu1 %v1813_v27 }
 0x12a   : > { %1899 = vmatpush2.msra.mxu0 %v1748_v29  ;;  %2012 = vmatpush2.msra.mxu1 %v1812_v30 }
 0x12b   : > { %1900 = vmatprep.subr.mxu0 %v1747_v32  ;;  %2013 = vmatprep.subr.mxu1 %v1811_v33 }
 0x12c   : > { %1901 = vmatpush2.msra.mxu0 %v1746_v34  ;;  %2014 = vmatpush2.msra.mxu1 %v1810_v35 }
 0x12d   : > { %1902 = vmatprep.subr.mxu0 %v1745_v36  ;;  %2015 = vmatprep.subr.mxu1 %v1809_v37 }
 0x12e   : > { %1903 = vmatpush2.msra.mxu0 %v1744_v39  ;;  %2016 = vmatpush2.msra.mxu1 %v1808_v40 }
 0x150   : > { %v2895_v42 = vpop.f32.mrf.mxu0  ;;  %v2897_v43 = vpop.f32.mrf.mxu1 }
 0x151   : > { %v3661_v63 = vand.u32 2147483647, %v2895_v42  ;;  %v1392_v44 = vmul.f32 -0.5, %v2895_v42  ;;  %v3658_v1 = vand.u32 2147483647, %v2897_v43  ;;  %v1394_v45 = vmul.f32 -0.5, %v2897_v43 }
 0x152   : > { %v2903_v8 = vpop.f32.mrf.mxu0  ;;  %v2905_v11 = vpop.f32.mrf.mxu1 }
 0x153   : > { %v1008_v18 = vmul.f32 0.23164189, %v3661_v63  ;;  %v1424_v46 = vmul.f32 %v1392_v44, %v2895_v42  ;;  %v1010_v47 = vmul.f32 0.23164189, %v3658_v1  ;;  %v1426_v49 = vmul.f32 %v1394_v45, %v2897_v43 }
 0x154   : > { %v3659_v21 = vand.u32 2147483647, %v2903_v8  ;;  %v1393_v28 = vmul.f32 -0.5, %v2903_v8  ;;  %v3656_v50 = vand.u32 2147483647, %v2905_v11  ;;  %v1395_v52 = vmul.f32 -0.5, %v2905_v11 }
 0x155   : > { %v1040_v31 = vadd.f32 1.0, %v1008_v18  ;;  %v1456_v38 = vmul.f32 1.442695, %v1424_v46  ;;  %v1042_v53 = vadd.f32 1.0, %v1010_v47  ;;  %v1460_v54 = vmul.f32 1.442695, %v1426_v49 }
 0x156   : > { %v1009_v41 = vmul.f32 0.23164189, %v3659_v21  ;;  %v1425_v48 = vmul.f32 %v1393_v28, %v2903_v8  ;;  %v1011_v55 = vmul.f32 0.23164189, %v3656_v50  ;;  %v1427_v56 = vmul.f32 %v1395_v52, %v2905_v11  ;;  %v2923_v51 = vpop.f32.mrf.mxu0  ;;  %v2925_v58 = vpop.f32.mrf.mxu1 }
 0x157   : > { %2315 = vrcp.f32 %v1040_v31  ;;  %v3655_v57 = vand.u32 2147483647, %v2923_v51  ;;  %v1396_v59 = vmul.f32 -0.5, %v2923_v51  ;;  %v3653_v60 = vand.u32 2147483647, %v2925_v58 }
 0x158   : > { %2317 = vpow2.f32 %v1456_v38  ;;  %v1041_v61 = vadd.f32 1.0, %v1009_v41  ;;  %v1458_v62 = vmul.f32 1.442695, %v1425_v48  ;;  %v1043_v0 = vadd.f32 1.0, %v1011_v55  ;;  %v2930_v6 = vpop.f32.mrf.mxu0  ;;  %v2935_v5 = vpop.f32.mrf.mxu1 }
 0x159   : > { %2319 = vrcp.f32 %v1042_v53  ;;  %v1462_v2 = vmul.f32 1.442695, %v1427_v56  ;;  %v1012_v3 = vmul.f32 0.23164189, %v3655_v57  ;;  %v1428_v4 = vmul.f32 %v1396_v59, %v2923_v51 }
 0x15a   : > { %2321 = vpow2.f32 %v1460_v54  ;;  %v1014_v10 = vmul.f32 0.23164189, %v3653_v60  ;;  %v1398_v7 = vmul.f32 -0.5, %v2925_v58  ;;  %v3654_v9 = vand.u32 2147483647, %v2930_v6 }
 0x15b   : > { %2323 = vrcp.f32 %v1041_v61  ;;  %v1044_v12 = vadd.f32 1.0, %v1012_v3  ;;  %v1464_v13 = vmul.f32 1.442695, %v1428_v4  ;;  %v1397_v14 = vmul.f32 -0.5, %v2930_v6 }
 0x15c   : > { %2325 = vpow2.f32 %v1458_v62  ;;  %v1046_v15 = vadd.f32 1.0, %v1014_v10  ;;  %v1430_v16 = vmul.f32 %v1398_v7, %v2925_v58  ;;  %v1013_v17 = vmul.f32 0.23164189, %v3654_v9  ;;  %v2945_v19 = vpop.f32.mrf.mxu0  ;;  %v2950_v24 = vpop.f32.mrf.mxu1 }
 0x15d   : > { %2327 = vrcp.f32 %v1043_v0  ;;  %v1429_v20 = vmul.f32 %v1397_v14, %v2930_v6  ;;  %v3652_v22 = vand.u32 2147483647, %v2935_v5  ;;  %v1399_v23 = vmul.f32 -0.5, %v2935_v5  ;;  %3731 = vst [vmem:[#allocation12_spill] sm:$0xff] %v2950_v24 }
 0x15e   : > { %2329 = vpow2.f32 %v1462_v2  ;;  %v1468_v25 = vmul.f32 1.442695, %v1430_v16  ;;  %v1045_v26 = vadd.f32 1.0, %v1013_v17  ;;  %v3650_v27 = vand.u32 2147483647, %v2945_v19  ;;  %v2956_v33 = vpop.f32.mrf.mxu0  ;;  %v2963_v40 = vpop.f32.mrf.mxu1 }
 0x15f   : > { %2331 = vrcp.f32 %v1044_v12  ;;  %v1466_v29 = vmul.f32 1.442695, %v1429_v20  ;;  %v1015_v30 = vmul.f32 0.23164189, %v3652_v22  ;;  %v1431_v32 = vmul.f32 %v1399_v23, %v2935_v5  ;;  %3732 = vst [vmem:[#allocation13_spill] sm:$0xff] %v2956_v33  ;;  %3733 = vst [vmem:[#allocation14_spill] sm:$0xff] %v2963_v40 }
 0x160   : > { %2333 = vpow2.f32 %v1464_v13  ;;  %v1016_v34 = vmul.f32 0.23164189, %v3650_v27  ;;  %v1400_v35 = vmul.f32 -0.5, %v2945_v19  ;;  %v3649_v36 = vand.u32 2147483647, %v2950_v24 }
 0x161   : > { %2335 = vrcp.f32 %v1046_v15  ;;  %v1047_v37 = vadd.f32 1.0, %v1015_v30  ;;  %v1402_v39 = vmul.f32 -0.5, %v2950_v24  ;;  %v1470_v44 = vmul.f32 1.442695, %v1431_v32 }
 0x162   : > { %2337 = vpow2.f32 %v1468_v25  ;;  %v1432_v45 = vmul.f32 %v1400_v35, %v2945_v19  ;;  %v1018_v18 = vmul.f32 0.23164189, %v3649_v36  ;;  %v3648_v47 = vand.u32 2147483647, %v2956_v33  ;;  %v2971_v28 = vpop.f32.mrf.mxu0  ;;  %v2981_v56 = vpop.f32.mrf.mxu1 }
 0x163   : > { %2339 = vrcp.f32 %v1045_v26  ;;  %v1434_v46 = vmul.f32 %v1402_v39, %v2950_v24  ;;  %v1401_v49 = vmul.f32 -0.5, %v2956_v33  ;;  %3734 = vst [vmem:[#allocation15_spill] sm:$0xff] %v2971_v28  ;;  %v1048_v31 = vadd.f32 1.0, %v1016_v34  ;;  %3735 = vst [vmem:[#allocation16_spill] sm:$0xff] %v2981_v56 }
 0x164   : > { %v2973_v52 = vpop.eup %2315  ;;  %2341 = vpow2.f32 %v1466_v29  ;;  %v3647_v38 = vand.u32 2147483647, %v2963_v40  ;;  %v1472_v54 = vmul.f32 1.442695, %v1432_v45  ;;  %v1050_v41 = vadd.f32 1.0, %v1018_v18  ;;  %v2992_v10 = vpop.f32.mrf.mxu0 }
 0x165   : > { %v2976_v53 = vpop.eup %2317  ;;  %v1017_v48 = vmul.f32 0.23164189, %v3648_v47  ;;  %v1433_v55 = vmul.f32 %v1401_v49, %v2956_v33  ;;  %2343 = vrcp.f32 %v1047_v37  ;;  %v1403_v62 = vmul.f32 -0.5, %v2963_v40  ;;  %3736 = vst [vmem:[#allocation17_spill] sm:$0xff] %v2992_v10  ;;  %v3003_v23 = vpop.f32.mrf.mxu1 }
 0x166   : > { %v2983_v59 = vpop.eup %2319  ;;  %v1019_v61 = vmul.f32 0.23164189, %v3647_v38  ;;  %v3644_v0 = vand.u32 2147483647, %v2971_v28  ;;  %2345 = vpow2.f32 %v1470_v44  ;;  %v1476_v3 = vmul.f32 1.442695, %v1434_v46 }
 0x167   : > { %v2989_v2 = vpop.eup %2321  ;;  %v1404_v4 = vmul.f32 -0.5, %v2971_v28  ;;  %2347 = vrcp.f32 %v1048_v31  ;;  %v1049_v12 = vadd.f32 1.0, %v1017_v48  ;;  %v1474_v13 = vmul.f32 1.442695, %v1433_v55  ;;  %3737 = vst [vmem:[#allocation18_spill] sm:$0xff] %v3003_v23 }
 0x168   : > { %v2994_v7 = vpop.eup %2323  ;;  %v1435_v14 = vmul.f32 %v1403_v62, %v2963_v40  ;;  %2349 = vpow2.f32 %v1472_v54  ;;  %v1020_v16 = vmul.f32 0.23164189, %v3644_v0  ;;  %v3643_v17 = vand.u32 2147483647, %v2981_v56  ;;  %v3014_v37 = vpop.f32.mrf.mxu0 }
 0x169   : > { %v2997_v15 = vpop.eup %2325  ;;  %v1406_v20 = vmul.f32 -0.5, %v2981_v56  ;;  %2351 = vrcp.f32 %v1050_v41  ;;  %v1051_v26 = vadd.f32 1.0, %v1019_v61  ;;  %v1436_v29 = vmul.f32 %v1404_v4, %v2971_v28  ;;  %3738 = vst [vmem:[#allocation19_spill] sm:$0xff] %v3014_v37  ;;  %v3025_v41 = vpop.f32.mrf.mxu1 }
 0x16a   : > { %v3005_v25 = vpop.eup %2327  ;;  %v3642_v30 = vand.u32 2147483647, %v2992_v10  ;;  %2353 = vpow2.f32 %v1476_v3  ;;  %v1022_v34 = vmul.f32 0.23164189, %v3643_v17  ;;  %v1478_v44 = vmul.f32 1.442695, %v1435_v14  ;;  %v3034_v14 = vpop.f32.mrf.mxu0 }
 0x16b   : > { %v3009_v32 = vpop.eup %2329  ;;  %v1438_v35 = vmul.f32 %v1406_v20, %v2981_v56  ;;  %2355 = vrcp.f32 %v1049_v12  ;;  %v1405_v45 = vmul.f32 -0.5, %v2992_v10  ;;  %v3645_v18 = vand.u32 2147483647, %v3003_v23  ;;  %3739 = vst [vmem:[#allocation20_spill] sm:$0xff] %v3025_v41  ;;  %3740 = vst [vmem:[#allocation21_spill] sm:$0xff] %v3034_v14 }
 0x16c   : > { %v3016_v39 = vpop.eup %2331  ;;  %2357 = vpow2.f32 %v1474_v13  ;;  %v1052_v49 = vadd.f32 1.0, %v1020_v16  ;;  %v1021_v31 = vmul.f32 0.23164189, %v3642_v30  ;;  %v1407_v54 = vmul.f32 -0.5, %v3003_v23  ;;  %v3044_v30 = vpop.f32.mrf.mxu1 }
 0x16d   : > { %v3020_v46 = vpop.eup %2333  ;;  %2359 = vrcp.f32 %v1051_v26  ;;  %v1480_v55 = vmul.f32 1.442695, %v1436_v29  ;;  %v1437_v61 = vmul.f32 %v1405_v45, %v2992_v10  ;;  %v1054_v3 = vadd.f32 1.0, %v1022_v34  ;;  %3741 = vst [vmem:[#allocation22_spill] sm:$0xff] %v3044_v30 }
 0x16e   : > { %v3027_v48 = vpop.eup %2335  ;;  %v1484_v4 = vmul.f32 1.442695, %v1438_v35  ;;  %v3646_v12 = vand.u32 2147483647, %v3014_v37  ;;  %v1408_v13 = vmul.f32 -0.5, %v3014_v37  ;;  %2361 = vpow2.f32 %v1478_v44  ;;  %v3065_v27 = vpop.f32.mrf.mxu1 }
 0x16f   : > { %v3030_v62 = vpop.eup %2337  ;;  %v1023_v20 = vmul.f32 0.23164189, %v3645_v18  ;;  %v1439_v26 = vmul.f32 %v1407_v54, %v3003_v23  ;;  %v3651_v29 = vand.u32 2147483647, %v3025_v41  ;;  %2363 = vrcp.f32 %v1052_v49  ;;  %3743 = vst [vmem:[#allocation24_spill] sm:$0xff] %v3065_v27 }
 0x170   : > { %v3036_v16 = vpop.eup %2339  ;;  %v1053_v34 = vadd.f32 1.0, %v1021_v31  ;;  %v1482_v35 = vmul.f32 1.442695, %v1437_v61  ;;  %2365 = vpow2.f32 %v1480_v55  ;;  %v1024_v17 = vmul.f32 0.23164189, %v3646_v12  ;;  %v3056_v61 = vpop.f32.mrf.mxu0 }
 0x171   : > { %v3042_v45 = vpop.eup %2341  ;;  %v1410_v44 = vmul.f32 -0.5, %v3025_v41  ;;  %v3657_v0 = vand.u32 2147483647, %v3034_v14  ;;  %2367 = vrcp.f32 %v1054_v3  ;;  %v1440_v54 = vmul.f32 %v1408_v13, %v3014_v37  ;;  %3742 = vst [vmem:[#allocation23_spill] sm:$0xff] %v3056_v61  ;;  %v3091_v63 = vpop.f32.mrf.mxu1 }
 0x172   : > { %v3050_v18 = vpop.eup %2343  ;;  %v1026_v49 = vmul.f32 0.23164189, %v3651_v29  ;;  %v1409_v31 = vmul.f32 -0.5, %v3034_v14  ;;  %2369 = vpow2.f32 %v1484_v4  ;;  %v1055_v12 = vadd.f32 1.0, %v1023_v20  ;;  %v3075_v9 = vpop.f32.mrf.mxu0  ;;  %3745 = vst [vmem:[#allocation26_spill] sm:$0xff] %v3091_v63 }
 0x173   : > { %v3058_v55 = vpop.eup %2345  ;;  %v1486_v38 = vmul.f32 1.442695, %v1439_v26  ;;  %2371 = vrcp.f32 %v1053_v34  ;;  %v1442_v36 = vmul.f32 %v1410_v44, %v3025_v41  ;;  %v3660_v3 = vand.u32 2147483647, %v3044_v30  ;;  %3744 = vst [vmem:[#allocation25_spill] sm:$0xff] %v3075_v9 }
 0x174   : > { %v3060_v47 = vpop.eup %2347  ;;  %v1411_v13 = vmul.f32 -0.5, %v3044_v30  ;;  %v1056_v22 = vadd.f32 1.0, %v1024_v17  ;;  %v1025_v60 = vmul.f32 0.23164189, %v3657_v0  ;;  %v1441_v4 = vmul.f32 %v1409_v31, %v3034_v14 }
 0x175   : > { %v3067_v29 = vpop.eup %2349  ;;  %v3666_v20 = vand.u32 2147483647, %v3056_v61  ;;  %2373 = vpow2.f32 %v1482_v35  ;;  %v1488_v34 = vmul.f32 1.442695, %v1440_v54  ;;  %v1058_v44 = vadd.f32 1.0, %v1026_v49 }
 0x176   : > { %v3073_v26 = vpop.eup %2351  ;;  %2375 = vrcp.f32 %v1055_v12  ;;  %v1027_v17 = vmul.f32 0.23164189, %v3660_v3  ;;  %v1412_v50 = vmul.f32 -0.5, %v3056_v61  ;;  %v3669_v0 = vand.u32 2147483647, %v3065_v27 }
 0x177   : > { %v3077_v57 = vpop.eup %2353  ;;  %2377 = vpow2.f32 %v1486_v38  ;;  %v1492_v1 = vmul.f32 1.442695, %v1442_v36  ;;  %v1443_v35 = vmul.f32 %v1411_v13, %v3044_v30  ;;  %v1414_v54 = vmul.f32 -0.5, %v3065_v27  ;;  %v3099_v30 = vpop.f32.mrf.mxu0 }
 0x178   : > { %v3083_v31 = vpop.eup %2355  ;;  %2379 = vrcp.f32 %v1056_v22  ;;  %v1057_v21 = vadd.f32 1.0, %v1025_v60  ;;  %v1490_v12 = vmul.f32 1.442695, %v1441_v4  ;;  %v1028_v3 = vmul.f32 0.23164189, %v3666_v20  ;;  %3746 = vst [vmem:[#allocation27_spill] sm:$0xff] %v3099_v30 }
 0x179   : > { %v3087_v49 = vpop.eup %2357  ;;  %2381 = vpow2.f32 %v1488_v34  ;;  %v1444_v38 = vmul.f32 %v1412_v50, %v3056_v61  ;;  %v1030_v36 = vmul.f32 0.23164189, %v3669_v0  ;;  %v1059_v60 = vadd.f32 1.0, %v1027_v17  ;;  %v3116_v37 = vpop.f32.mrf.mxu0 }
 0x17a   : > { %v3093_v14 = vpop.eup %2359  ;;  %2383 = vrcp.f32 %v1058_v44  ;;  %v1446_v22 = vmul.f32 %v1414_v54, %v3065_v27  ;;  %v1413_v4 = vmul.f32 -0.5, %v3075_v9  ;;  %v1494_v41 = vmul.f32 1.442695, %v1443_v35  ;;  %v3110_v44 = vpop.f32.mrf.mxu1  ;;  %3751 = vst [vmem:[#allocation31_spill] sm:$0xff] %v3116_v37 }
 0x17b   : > { %v3103_v20 = vpop.eup %2361  ;;  %2385 = vpow2.f32 %v1492_v1  ;;  %v1060_v0 = vadd.f32 1.0, %v1028_v3  ;;  %v1415_v13 = vmul.f32 -0.5, %v3091_v63  ;;  %3748 = vst [vmem:[#allocation29_spill] sm:$0xff] %v3110_v44  ;;  %v1496_v54 = vmul.f32 1.442695, %v1444_v38 }
 0x17c   : > { %3747 = vst [vmem:[#allocation28_spill] sm:$0xff] %v3103_v20  ;;  %v3106_v50 = vpop.eup %2363  ;;  %2387 = vrcp.f32 %v1057_v21  ;;  %v1062_v27 = vadd.f32 1.0, %v1030_v36  ;;  %v3750_v1 = vand.u32 2147483647, %v3075_v9  ;;  %v1500_v21 = vmul.f32 1.442695, %v1446_v22  ;;  %v3134_v56 = vpop.f32.mrf.mxu1 }
 0x17d   : > { %v3112_v17 = vpop.eup %2365  ;;  %2389 = vpow2.f32 %v1490_v12  ;;  %v1445_v3 = vmul.f32 %v1413_v4, %v3075_v9  ;;  %v1416_v61 = vmul.f32 -0.5, %v3099_v30  ;;  %v3753_v12 = vand.u32 2147483647, %v3091_v63  ;;  %3755 = vst [vmem:[#allocation33_spill] sm:$0xff] %v3134_v56 }
 0x17e   : > { %3749 = vst [vmem:[#allocation30_spill] sm:$0xff] %v3112_v17  ;;  %v1029_v35 = vmul.f32 0.23164189, %v3750_v1  ;;  %v3118_v34 = vpop.eup %2367  ;;  %2391 = vrcp.f32 %v1059_v60  ;;  %v1447_v36 = vmul.f32 %v1415_v13, %v3091_v63  ;;  %v3754_v60 = vand.u32 2147483647, %v3099_v30 }
 0x17f   : > { %v3122_v23 = vpop.eup %2369  ;;  %2393 = vpow2.f32 %v1494_v41  ;;  %v1031_v38 = vmul.f32 0.23164189, %v3753_v12  ;;  %v1418_v4 = vmul.f32 -0.5, %v3110_v44  ;;  %v1498_v13 = vmul.f32 1.442695, %v1445_v3 }
 0x180   : > { %3752 = vst [vmem:[#allocation32_spill] sm:$0xff] %v3122_v23  ;;  %v3128_v10 = vpop.eup %2371  ;;  %2395 = vrcp.f32 %v1060_v0  ;;  %v1032_v22 = vmul.f32 0.23164189, %v3754_v60  ;;  %v1061_v41 = vadd.f32 1.0, %v1029_v35  ;;  %v1448_v12 = vmul.f32 %v1416_v61, %v3099_v30  ;;  %v3140_v0 = vpop.f32.mrf.mxu0 }
 0x181   : > { %2397 = vpow2.f32 %v1496_v54  ;;  %v1417_v1 = vmul.f32 -0.5, %v3116_v37  ;;  %3757 = vst [vmem:[#allocation35_spill] sm:$0xff] %v3140_v0  ;;  %v1063_v60 = vadd.f32 1.0, %v1031_v38  ;;  %v1502_v23 = vmul.f32 1.442695, %v1447_v36 }
 0x182   : > { %v3136_v28 = vpop.eup %2373  ;;  %2399 = vrcp.f32 %v1062_v27  ;;  %v3758_v9 = vand.u32 2147483647, %v3110_v44  ;;  %v1064_v35 = vadd.f32 1.0, %v1032_v22  ;;  %v1450_v27 = vmul.f32 %v1418_v4, %v3110_v44  ;;  %v3169_v24 = vpop.f32.mrf.mxu0 }
 0x183   : > { %3756 = vst [vmem:[#allocation34_spill] sm:$0xff] %v3136_v28  ;;  %v3142_v63 = vpop.eup %2375  ;;  %2401 = vpow2.f32 %v1500_v21  ;;  %v3760_v3 = vand.u32 2147483647, %v3116_v37  ;;  %v3152_v28 = vpop.f32.mrf.mxu1  ;;  %v1419_v21 = vmul.f32 -0.5, %v3134_v56  ;;  %v1504_v22 = vmul.f32 1.442695, %v1448_v12 }
 0x184   : > { %v1034_v40 = vmul.f32 0.23164189, %v3758_v9  ;;  %v3146_v54 = vpop.eup %2377  ;;  %3761 = vst [vmem:[#allocation37_spill] sm:$0xff] %v3152_v28  ;;  %2403 = vrcp.f32 %v1061_v41  ;;  %v1420_v9 = vmul.f32 -0.5, %v3140_v0  ;;  %v1449_v4 = vmul.f32 %v1417_v1, %v3116_v37  ;;  %3767 = vst [vmem:[#allocation42_spill] sm:$0xff] %v3169_v24 }
 0x185   : > { %3759 = vst [vmem:[#allocation36_spill] sm:$0xff] %v3146_v54  ;;  %v1033_v61 = vmul.f32 0.23164189, %v3760_v3  ;;  %v3154_v17 = vpop.eup %2379  ;;  %2405 = vpow2.f32 %v1498_v13  ;;  %v1508_v41 = vmul.f32 1.442695, %v1450_v27  ;;  %v1451_v1 = vmul.f32 %v1419_v21, %v3134_v56 }
 0x186   : > { %3762 = vst [vmem:[#allocation38_spill] sm:$0xff] %v3154_v17  ;;  %v3159_v36 = vpop.eup %2381  ;;  %2407 = vrcp.f32 %v1063_v60  ;;  %v1066_v30 = vadd.f32 1.0, %v1034_v40  ;;  %v3766_v38 = vand.u32 2147483647, %v3134_v56  ;;  %v3769_v12 = vand.u32 2147483647, %v3140_v0 }
 0x187   : > { %3763 = vst [vmem:[#allocation39_spill] sm:$0xff] %v3159_v36  ;;  %v3162_v3 = vpop.eup %2383  ;;  %2409 = vpow2.f32 %v1502_v23  ;;  %v1065_v17 = vadd.f32 1.0, %v1033_v61  ;;  %v1452_v60 = vmul.f32 %v1420_v9, %v3140_v0  ;;  %v1506_v23 = vmul.f32 1.442695, %v1449_v4 }
 0x188   : > { %3764 = vst [vmem:[#allocation40_spill] sm:$0xff] %v3162_v3  ;;  %v3165_v54 = vpop.eup %2385  ;;  %v1035_v33 = vmul.f32 0.23164189, %v3766_v38  ;;  %2411 = vrcp.f32 %v1064_v35  ;;  %v1036_v40 = vmul.f32 0.23164189, %v3769_v12  ;;  %v1422_v27 = vmul.f32 -0.5, %v3152_v28 }
 0x189   : > { %3765 = vst [vmem:[#allocation41_spill] sm:$0xff] %v3165_v54  ;;  %v3171_v13 = vpop.eup %2387  ;;  %2413 = vpow2.f32 %v1504_v22  ;;  %v3181_v61 = vmul.f32 0.5, %v2895_v42  ;;  %v3772_v35 = vand.u32 2147483647, %v3152_v28  ;;  %v1421_v12 = vmul.f32 -0.5, %v3169_v24 }
 0x18a   : > { %3768 = vst [vmem:[#allocation43_spill] sm:$0xff] %v3171_v13  ;;  %v3177_v44 = vpop.eup %2389  ;;  %2415 = vrcp.f32 %v1066_v30  ;;  %v1067_v22 = vadd.f32 1.0, %v1035_v33  ;;  %v1104_v4 = vmul.f32 0.5307027, %v2973_v52  ;;  %v3193_v0 = vmul.f32 0.5, %v2897_v43 }
 0x18b   : > { %3770 = vst [vmem:[#allocation44_spill] sm:$0xff] %v3177_v44  ;;  %v3183_v38 = vpop.eup %2391  ;;  %v1038_v21 = vmul.f32 0.23164189, %v3772_v35  ;;  %2417 = vpow2.f32 %v1508_v41  ;;  %v1510_v30 = vmul.f32 1.442695, %v1451_v1  ;;  %v1068_v44 = vadd.f32 1.0, %v1036_v40  ;;  %v3199_v35 = vpop.f32.mrf.mxu1 }
 0x18c   : > { %3771 = vst [vmem:[#allocation45_spill] sm:$0xff] %v3183_v38  ;;  %v3189_v9 = vpop.eup %2393  ;;  %2419 = vrcp.f32 %v1065_v17  ;;  %v3197_v54 = vmul.f32 1.442695, %v1452_v60  ;;  %3775 = vst [vmem:[#allocation48_spill] sm:$0xff] %v3199_v35  ;;  %v1136_v41 = vadd.f32 -0.72657603, %v1104_v4  ;;  %v1453_v40 = vmul.f32 %v1421_v12, %v3169_v24 }
 0x18d   : > { %3773 = vst [vmem:[#allocation46_spill] sm:$0xff] %v3189_v9  ;;  %v3195_v37 = vpop.eup %2395  ;;  %v1454_v9 = vmul.f32 %v1422_v27, %v3152_v28  ;;  %v1106_v33 = vmul.f32 0.5307027, %v2983_v59  ;;  %v1105_v36 = vmul.f32 0.5307027, %v2994_v7  ;;  %2421 = vpow2.f32 %v1506_v23 }
 0x18e   : > { %3774 = vst [vmem:[#allocation47_spill] sm:$0xff] %v3195_v37  ;;  %v3201_v56 = vpop.eup %2397  ;;  %v3208_v37 = vadd.f32 1.0, %v1038_v21  ;;  %v3778_v17 = vand.u32 2147483647, %v3169_v24  ;;  %v1168_v27 = vmul.f32 %v2973_v52, %v1136_v41  ;;  %2423 = vrcp.f32 %v1067_v22 }
 0x18f   : > { %3776 = vst [vmem:[#allocation49_spill] sm:$0xff] %v3201_v56  ;;  %v3206_v38 = vpop.eup %2399  ;;  %v1138_v4 = vadd.f32 -0.72657603, %v1106_v33  ;;  %v1137_v28 = vadd.f32 -0.72657603, %v1105_v36  ;;  %v1423_v13 = vmul.f32 -0.5, %v3199_v35  ;;  %2425 = vpow2.f32 %v1510_v30 }
 0x190   : > { %3777 = vst [vmem:[#allocation50_spill] sm:$0xff] %v3206_v38  ;;  %v1037_v1 = vmul.f32 0.23164189, %v3778_v17  ;;  %v3213_v60 = vpop.eup %2401  ;;  %v1107_v23 = vmul.f32 0.5307027, %v3005_v25  ;;  %2427 = vrcp.f32 %v1068_v44 }
 0x191   : > { %3779 = vst [vmem:[#allocation51_spill] sm:$0xff] %v3213_v60  ;;  %v1108_v21 = vmul.f32 0.5307027, %v3016_v39  ;;  %v3220_v38 = vpop.eup %2403  ;;  %v3222_v17 = vmul.f32 1.442695, %v1454_v9  ;;  %v1170_v24 = vmul.f32 %v2983_v59, %v1138_v4  ;;  %v1169_v56 = vmul.f32 %v2994_v7, %v1137_v28 }
 0x192   : > { %3780 = vst [vmem:[#allocation52_spill] sm:$0xff] %v3220_v38  ;;  %v1200_v12 = vadd.f32 0.7107069, %v1168_v27  ;;  %v3226_v60 = vpop.eup %2405  ;;  %v3228_v36 = vadd.f32 1.0, %v1037_v1  ;;  %v1139_v22 = vadd.f32 -0.72657603, %v1107_v23  ;;  %2429 = vpow2.f32 %v3197_v54 }
 0x193   : > { %3781 = vst [vmem:[#allocation53_spill] sm:$0xff] %v3222_v17  ;;  %3782 = vst [vmem:[#allocation54_spill] sm:$0xff] %v3226_v60  ;;  %v1140_v41 = vadd.f32 -0.72657603, %v1108_v21  ;;  %v3230_v33 = vpop.eup %2407  ;;  %v3232_v3 = vmul.f32 1.442695, %v1453_v40  ;;  %2431 = vrcp.f32 %v3208_v37 }
 0x194   : > { %3783 = vst [vmem:[#allocation55_spill] sm:$0xff] %v3230_v33  ;;  %v1232_v38 = vmul.f32 %v2973_v52, %v1200_v12  ;;  %v1202_v9 = vadd.f32 0.7107069, %v1170_v24  ;;  %v1201_v17 = vadd.f32 0.7107069, %v1169_v56  ;;  %v3235_v27 = vpop.eup %2409  ;;  %v1171_v30 = vmul.f32 %v3005_v25, %v1139_v22 }
 0x195   : > { %3784 = vst [vmem:[#allocation56_spill] sm:$0xff] %v3232_v3  ;;  %3785 = vst [vmem:[#allocation57_spill] sm:$0xff] %v3235_v27  ;;  %v3786_v4 = vand.u32 2147483647, %v3199_v35  ;;  %v1172_v1 = vmul.f32 %v3016_v39, %v1140_v41  ;;  %v1110_v23 = vmul.f32 0.5307027, %v3027_v48  ;;  %v3244_v21 = vpop.eup %2411  ;;  %2433 = vrcp.f32 %v3228_v36 }
 0x196   : > { %3787 = vst [vmem:[#allocation58_spill] sm:$0xff] %v3244_v21  ;;  %v1264_v40 = vadd.f32 -0.14224836, %v1232_v38  ;;  %v1234_v3 = vmul.f32 %v2983_v59, %v1202_v9  ;;  %v1233_v24 = vmul.f32 %v2994_v7, %v1201_v17  ;;  %v1109_v56 = vmul.f32 0.5307027, %v3036_v16  ;;  %v3249_v12 = vpop.eup %2413 }
 0x197   : > { %v3239_v28 = vmul.f32 0.23164189, %v3786_v4  ;;  %3788 = vst [vmem:[#allocation59_spill] sm:$0xff] %v3249_v12  ;;  %v1203_v4 = vadd.f32 0.7107069, %v1171_v30  ;;  %v3251_v22 = vpop.eup %2415  ;;  %v3257_v9 = vmul.f32 %v1423_v13, %v3199_v35 }
 0x198   : > { %v1204_v27 = vadd.f32 0.7107069, %v1172_v1  ;;  %v1142_v60 = vadd.f32 -0.72657603, %v1110_v23  ;;  %v1296_v41 = vmul.f32 %v2973_v52, %v1264_v40  ;;  %v1266_v33 = vadd.f32 -0.14224836, %v1234_v3  ;;  %v3254_v38 = vpop.eup %2417 }
 0x199   : > { %v1265_v20 = vadd.f32 -0.14224836, %v1233_v24  ;;  %v1141_v21 = vadd.f32 -0.72657603, %v1109_v56  ;;  %3789 = vst [vmem:[#allocation60_spill] sm:$0xff] %v3254_v38  ;;  %v1235_v17 = vmul.f32 %v3005_v25, %v1203_v4  ;;  %v3262_v30 = vpop.eup %2419 }
 0x19a   : > { %v1236_v12 = vmul.f32 %v3016_v39, %v1204_v27  ;;  %v1174_v44 = vmul.f32 %v3027_v48, %v1142_v60  ;;  %3790 = vst [vmem:[#allocation61_spill] sm:$0xff] %v3262_v30  ;;  %v1328_v1 = vadd.f32 0.1274148, %v1296_v41  ;;  %v1298_v23 = vmul.f32 %v2983_v59, %v1266_v33  ;;  %v3268_v35 = vpop.eup %2421 }
 0x19b   : > { %v1297_v3 = vmul.f32 %v2994_v7, %v1265_v20  ;;  %v1173_v40 = vmul.f32 %v3036_v16, %v1141_v21  ;;  %v1267_v24 = vadd.f32 -0.14224836, %v1235_v17  ;;  %v1111_v21 = vmul.f32 0.5307027, %v3050_v18  ;;  %v3275_v30 = vpop.eup %2423 }
 0x19c   : > { %v1268_v13 = vadd.f32 -0.14224836, %v1236_v12  ;;  %v1206_v56 = vadd.f32 0.7107069, %v1174_v44  ;;  %v1360_v27 = vmul.f32 %v2973_v52, %v1328_v1  ;;  %v1330_v4 = vadd.f32 0.1274148, %v1298_v23 }
 0x19d   : > { %v1329_v60 = vadd.f32 0.1274148, %v1297_v3  ;;  %v1205_v38 = vadd.f32 0.7107069, %v1173_v40  ;;  %v1299_v41 = vmul.f32 %v3005_v25, %v1267_v24  ;;  %v3282_v3 = vpop.eup %2425  ;;  %v3791_v37 = vand.u32 2147483647, %v2895_v42 }
 0x19e   : > { %v1300_v33 = vmul.f32 %v3016_v39, %v1268_v13  ;;  %v1238_v20 = vmul.f32 %v3027_v48, %v1206_v56  ;;  %v1552_v54 = vmul.f32 %v2976_v53, %v1360_v27  ;;  %v1362_v12 = vmul.f32 %v2983_v59, %v1330_v4 }
 0x19f   : > { %v1361_v17 = vmul.f32 %v2994_v7, %v1329_v60  ;;  %v1237_v52 = vmul.f32 %v3036_v16, %v1205_v38  ;;  %v1331_v44 = vadd.f32 0.1274148, %v1299_v41  ;;  %v1143_v27 = vadd.f32 -0.72657603, %v1111_v21 }
 0x1a0   : > { %v1332_v1 = vadd.f32 0.1274148, %v1300_v33  ;;  %v1270_v23 = vadd.f32 -0.14224836, %v1238_v20  ;;  %v1584_v40 = vsub.f32 0.5, %v1552_v54  ;;  %v1554_v24 = vmul.f32 %v2989_v2, %v1362_v12  ;;  %v816_v53 = vpop.f32.mrf.mxu0  ;;  %v929_v21 = vpop.f32.mrf.mxu1 }
 0x1a1   : > { %v1553_v13 = vmul.f32 %v2997_v15, %v1361_v17  ;;  %v1269_v56 = vadd.f32 -0.14224836, %v1237_v52  ;;  %v1363_v59 = vmul.f32 %v3005_v25, %v1331_v44  ;;  %v1175_v54 = vmul.f32 %v3050_v18, %v1143_v27  ;;  %v3295_v25 = vpop.eup %2427 }
 0x1a2   : > { %v1364_v7 = vmul.f32 %v3016_v39, %v1332_v1  ;;  %v1302_v38 = vmul.f32 %v3027_v48, %v1270_v23  ;;  %v1616_v4 = vmul.f32 %v1584_v40, %v3791_v37  ;;  %v1586_v60 = vsub.f32 0.5, %v1554_v24  ;;  %v818_v44 = vpop.f32.mrf.mxu0  ;;  %v3313_v37 = vpop.eup %2429 }
 0x1a3   : > { %v1585_v41 = vsub.f32 0.5, %v1553_v13  ;;  %v1301_v33 = vmul.f32 %v3036_v16, %v1269_v56  ;;  %v1555_v2 = vmul.f32 %v3009_v32, %v1363_v59  ;;  %v3298_v39 = vadd.f32 1.0, %v3239_v28 }
 0x1a4   : > { %v1556_v15 = vmul.f32 %v3020_v46, %v1364_v7  ;;  %v1334_v20 = vadd.f32 0.1274148, %v1302_v38  ;;  %v1521_v42 = vmul.f32 0.5, %v2903_v8  ;;  %v3792_v12 = vand.u32 2147483647, %v2903_v8 }
 0x1a5   : > { %v1333_v52 = vadd.f32 0.1274148, %v1301_v33  ;;  %v1523_v32 = vmul.f32 0.5, %v2905_v11  ;;  %v1587_v1 = vsub.f32 0.5, %v1555_v2  ;;  %v1207_v23 = vadd.f32 0.7107069, %v1175_v54 }
 0x1a6   : > { %v1617_v17 = vmul.f32 %v1585_v41, %v3792_v12  ;;  %v1366_v46 = vmul.f32 %v3027_v48, %v1334_v20  ;;  %v1648_v40 = vadd.f32 %v1616_v4, %v3181_v61  ;;  %v3793_v24 = vand.u32 2147483647, %v2897_v43  ;;  %v931_v61 = vpop.f32.mrf.mxu1 }
 0x1a7   : > { %v1365_v56 = vmul.f32 %v3036_v16, %v1333_v52  ;;  %v3794_v59 = vand.u32 2147483647, %v2905_v11  ;;  %v1588_v7 = vsub.f32 0.5, %v1556_v15  ;;  %v1239_v27 = vmul.f32 %v3050_v18, %v1207_v23  ;;  %v822_v11 = vpop.f32.mrf.mxu0 }
 0x1a8   : > { %v1618_v28 = vmul.f32 %v1586_v60, %v3793_v24  ;;  %v1649_v13 = vadd.f32 %v1617_v17, %v1521_v42  ;;  %v1558_v38 = vmul.f32 %v3030_v62, %v1366_v46  ;;  %v3317_v48 = vmul.f32 1.442695, %v3257_v9 }
 0x1a9   : > { %v1619_v8 = vmul.f32 %v1587_v1, %v3794_v59  ;;  %v1557_v4 = vmul.f32 %v3042_v45, %v1365_v56  ;;  %v1680_v16 = vmul.f32 %v1648_v40, %v816_v53  ;;  %v1525_v41 = vmul.f32 0.5, %v2930_v6  ;;  %v3327_v53 = vpop.eup %2431  ;;  %v824_v46 = vpop.f32.mrf.mxu0 }
 0x1aa   : > { %v1681_v43 = vmul.f32 %v1649_v13, %v818_v44  ;;  %v1271_v33 = vadd.f32 -0.14224836, %v1239_v27  ;;  %v1650_v62 = vadd.f32 %v1618_v28, %v3193_v0  ;;  %v1112_v15 = vmul.f32 0.5307027, %v3060_v47 }
 0x1ab   : > { %v1651_v60 = vadd.f32 %v1619_v8, %v1523_v32  ;;  %v1589_v2 = vsub.f32 0.5, %v1557_v4  ;;  %v1114_v36 = vmul.f32 0.5307027, %v3073_v26  ;;  %v3795_v20 = vand.u32 2147483647, %v2923_v51 }
 0x1ac   : > { %1904 = vmatprep.mubr.f32.mxu0 %v1681_v43  ;;  %v1590_v42 = vsub.f32 0.5, %v1558_v38  ;;  %v1303_v45 = vmul.f32 %v3050_v18, %v1271_v33  ;;  %v1682_v12 = vmul.f32 %v1650_v62, %v929_v21  ;;  %v3796_v17 = vand.u32 2147483647, %v2930_v6 }
 0x1ad   : > { %v1683_v9 = vmul.f32 %v1651_v60, %v931_v61  ;;  %v1620_v54 = vmul.f32 %v1588_v7, %v3795_v20  ;;  %1905 = vmatmul.mubr.f32.vlgmr.msra.gmra.mxu0 %v1680_v16  ;;  %v1144_v52 = vadd.f32 -0.72657603, %v1112_v15  ;;  %v1146_v44 = vadd.f32 -0.72657603, %v1114_v36 }
 0x1ae   : > { %v1621_v0 = vmul.f32 %v1589_v2, %v3796_v17  ;;  %v1524_v32 = vmul.f32 0.5, %v2923_v51  ;;  %v1526_v1 = vmul.f32 0.5, %v2925_v58  ;;  %v1335_v23 = vadd.f32 0.1274148, %v1303_v45 }
 0x1af   : > { %2017 = vmatprep.mubr.f32.mxu1 %v1683_v9  ;;  %v1113_v40 = vmul.f32 0.5307027, %v3083_v31  ;;  %v1176_v28 = vmul.f32 %v3060_v47, %v1144_v52  ;;  %v1178_v21 = vmul.f32 %v3073_v26, %v1146_v44  ;;  %v1115_v6 = vmul.f32 0.5307027, %v3093_v14 }
 0x1b0   : > { %v1653_v24 = vadd.f32 %v1621_v0, %v1525_v41  ;;  %2018 = vmatmul.mubr.f32.vlgmr.msra.gmra.mxu1 %v1682_v12  ;;  %v1652_v13 = vadd.f32 %v1620_v54, %v1524_v32  ;;  %v3797_v56 = vand.u32 2147483647, %v2925_v58  ;;  %v1367_v51 = vmul.f32 %v3050_v18, %v1335_v23  ;;  %v935_v41 = vpop.f32.mrf.mxu1 }
 0x1b1   : > { %v1145_v8 = vadd.f32 -0.72657603, %v1113_v40  ;;  %v1208_v38 = vadd.f32 0.7107069, %v1176_v28  ;;  %v1210_v27 = vadd.f32 0.7107069, %v1178_v21  ;;  %2435 = vrcp.f32 %v3298_v39 }
 0x1b2   : > { %v1622_v59 = vmul.f32 %v1590_v42, %v3797_v56  ;;  %v1685_v7 = vmul.f32 %v1653_v24, %v824_v46  ;;  %v1147_v43 = vadd.f32 -0.72657603, %v1115_v6  ;;  %v1684_v61 = vmul.f32 %v1652_v13, %v822_v11  ;;  %v3348_v42 = vpop.eup %2433  ;;  %v937_v44 = vpop.f32.mrf.mxu1 }
 0x1b3   : > { %v1559_v4 = vmul.f32 %v3058_v55, %v1367_v51  ;;  %v1177_v16 = vmul.f32 %v3083_v31, %v1145_v8  ;;  %v1116_v60 = vmul.f32 0.5307027, %v3106_v50  ;;  %v1240_v33 = vmul.f32 %v3060_v47, %v1208_v38 }
 0x1b4   : > { %v1242_v58 = vmul.f32 %v3073_v26, %v1210_v27  ;;  %1910 = vmatprep.mubr.f32.mxu0 %v1685_v7  ;;  %v1179_v18 = vmul.f32 %v3093_v14, %v1147_v43  ;;  %v1118_v62 = vmul.f32 0.5307027, %v3118_v34  ;;  %v1527_v2 = vmul.f32 0.5, %v2935_v5 }
 0x1b5   : > { %v1591_v15 = vsub.f32 0.5, %v1559_v4  ;;  %v1209_v11 = vadd.f32 0.7107069, %v1177_v16  ;;  %1911 = vmatmul.mubr.f32.gmra.mxu0 %v1684_v61  ;;  %v1148_v55 = vadd.f32 -0.72657603, %v1116_v60  ;;  %v1654_v36 = vadd.f32 %v1622_v59, %v1526_v1 }
 0x1b6   : > { %v1272_v9 = vadd.f32 -0.14224836, %v1240_v33  ;;  %v1274_v20 = vadd.f32 -0.14224836, %v1242_v58  ;;  %v1211_v54 = vadd.f32 0.7107069, %v1179_v18 }
 0x1b7   : > { %v3798_v45 = vand.u32 2147483647, %v2935_v5  ;;  %v1241_v17 = vmul.f32 %v3083_v31, %v1209_v11  ;;  %v1180_v0 = vmul.f32 %v3106_v50, %v1148_v55  ;;  %v1150_v52 = vadd.f32 -0.72657603, %v1118_v62 }
 0x1b8   : > { %v1304_v32 = vmul.f32 %v3060_v47, %v1272_v9  ;;  %v1306_v46 = vmul.f32 %v3073_v26, %v1274_v20  ;;  %v1243_v1 = vmul.f32 %v3093_v14, %v1211_v54  ;;  %v1117_v23 = vmul.f32 0.5307027, %v3128_v10  ;;  %v828_v20 = vpop.f32.mrf.mxu0 }
 0x1b9   : > { %v1623_v12 = vmul.f32 %v1591_v15, %v3798_v45  ;;  %v1273_v24 = vadd.f32 -0.14224836, %v1241_v17  ;;  %v1212_v28 = vadd.f32 0.7107069, %v1180_v0  ;;  %v1182_v5 = vmul.f32 %v3118_v34, %v1150_v52  ;;  %v941_v52 = vpop.f32.mrf.mxu1 }
 0x1ba   : > { %v1686_v21 = vmul.f32 %v1654_v36, %v935_v41  ;;  %v1336_v6 = vadd.f32 0.1274148, %v1304_v32  ;;  %v1338_v13 = vadd.f32 0.1274148, %v1306_v46  ;;  %v1275_v56 = vadd.f32 -0.14224836, %v1243_v1 }
 0x1bb   : > { %v1655_v40 = vadd.f32 %v1623_v12, %v1527_v2  ;;  %v1305_v51 = vmul.f32 %v3083_v31, %v1273_v24  ;;  %v1244_v8 = vmul.f32 %v3106_v50, %v1212_v28  ;;  %v1214_v7 = vadd.f32 0.7107069, %v1182_v5  ;;  %v3800_v12 = vld [vmem:[#allocation28_spill] sm:$0xff] }
 0x1bc   : > { %v1368_v38 = vmul.f32 %v3060_v47, %v1336_v6  ;;  %v1370_v27 = vmul.f32 %v3073_v26, %v1338_v13  ;;  %v1307_v43 = vmul.f32 %v3093_v14, %v1275_v56  ;;  %v1149_v61 = vadd.f32 -0.72657603, %v1117_v23  ;;  %v3801_v46 = vld [vmem:[#allocation12_spill] sm:$0xff]  ;;  %v3805_v6 = vld [vmem:[#allocation30_spill] sm:$0xff] }
 0x1bd   : > { %v1687_v59 = vmul.f32 %v1655_v40, %v937_v44  ;;  %v1337_v4 = vadd.f32 0.1274148, %v1305_v51  ;;  %v1276_v16 = vadd.f32 -0.14224836, %v1244_v8  ;;  %v1246_v60 = vmul.f32 %v3118_v34, %v1214_v7  ;;  %v3803_v40 = vld [vmem:[#allocation13_spill] sm:$0xff]  ;;  %v830_v51 = vpop.f32.mrf.mxu0  ;;  %v3806_v8 = vld [vmem:[#allocation14_spill] sm:$0xff] }
 0x1be   : > { %v1560_v41 = vmul.f32 %v3067_v29, %v1368_v38  ;;  %v1562_v33 = vmul.f32 %v3077_v57, %v1370_v27  ;;  %v1339_v58 = vadd.f32 0.1274148, %v1307_v43  ;;  %v1181_v47 = vmul.f32 %v3128_v10, %v1149_v61 }
 0x1bf   : > { %2023 = vmatprep.mubr.f32.mxu1 %v1687_v59  ;;  %v1369_v26 = vmul.f32 %v3083_v31, %v1337_v4  ;;  %v1308_v18 = vmul.f32 %v3106_v50, %v1276_v16  ;;  %v1278_v62 = vadd.f32 -0.14224836, %v1246_v60  ;;  %v1119_v39 = vmul.f32 0.5307027, %v3142_v63  ;;  %v943_v16 = vpop.f32.mrf.mxu1 }
 0x1c0   : > { %2024 = vmatmul.mubr.f32.gmra.mxu1 %v1686_v21  ;;  %v1592_v2 = vsub.f32 0.5, %v1560_v41  ;;  %v1594_v15 = vsub.f32 0.5, %v1562_v33  ;;  %v1371_v11 = vmul.f32 %v3093_v14, %v1339_v58  ;;  %v1213_v55 = vadd.f32 0.7107069, %v1181_v47  ;;  %v3808_v58 = vld [vmem:[#allocation32_spill] sm:$0xff] }
 0x1c1   : > { %v1561_v29 = vmul.f32 %v3087_v49, %v1369_v26  ;;  %v1340_v36 = vadd.f32 0.1274148, %v1308_v18  ;;  %v1310_v57 = vmul.f32 %v3118_v34, %v1278_v62  ;;  %v1151_v9 = vadd.f32 -0.72657603, %v1119_v39  ;;  %v3809_v26 = vld [vmem:[#allocation38_spill] sm:$0xff] }
 0x1c2   : > { %v1528_v54 = vmul.f32 0.5, %v2945_v19  ;;  %v3799_v31 = vand.u32 2147483647, %v2945_v19  ;;  %v1563_v17 = vmul.f32 %v3800_v12, %v1371_v11  ;;  %v1245_v0 = vmul.f32 %v3128_v10, %v1213_v55  ;;  %v3398_v55 = vpop.eup %2435 }
 0x1c3   : > { %v1593_v44 = vsub.f32 0.5, %v1561_v29  ;;  %v1372_v14 = vmul.f32 %v3106_v50, %v1340_v36  ;;  %v1342_v32 = vadd.f32 0.1274148, %v1310_v57  ;;  %v1183_v49 = vmul.f32 %v3142_v63, %v1151_v9 }
 0x1c4   : > { %v1624_v45 = vmul.f32 %v1592_v2, %v3799_v31  ;;  %v3802_v1 = vand.u32 2147483647, %v3801_v46  ;;  %v1529_v24 = vmul.f32 0.5, %v3803_v40  ;;  %v1595_v28 = vsub.f32 0.5, %v1563_v17  ;;  %v3810_v2 = vld [vmem:[#allocation15_spill] sm:$0xff]  ;;  %v3812_v17 = vld [vmem:[#allocation40_spill] sm:$0xff] }
 0x1c5   : > { %v1277_v5 = vadd.f32 -0.14224836, %v1245_v0  ;;  %v3804_v19 = vand.u32 2147483647, %v3803_v40  ;;  %v1564_v13 = vmul.f32 %v3805_v6, %v1372_v14  ;;  %v1374_v56 = vmul.f32 %v3118_v34, %v1342_v32  ;;  %v3813_v14 = vld [vmem:[#allocation34_spill] sm:$0xff] }
 0x1c6   : > { %v1626_v23 = vmul.f32 %v1594_v15, %v3802_v1  ;;  %v1215_v59 = vadd.f32 0.7107069, %v1183_v49  ;;  %v1530_v50 = vmul.f32 0.5, %v3801_v46  ;;  %v1531_v7 = vmul.f32 0.5, %v3806_v8  ;;  %v3814_v49 = vld [vmem:[#allocation43_spill] sm:$0xff]  ;;  %v3815_v1 = vld [vmem:[#allocation16_spill] sm:$0xff] }
 0x1c7   : > { %v1625_v21 = vmul.f32 %v1593_v44, %v3804_v19  ;;  %v3807_v38 = vand.u32 2147483647, %v3806_v8  ;;  %v1309_v43 = vmul.f32 %v3128_v10, %v1277_v5  ;;  %v1656_v61 = vadd.f32 %v1624_v45, %v1528_v54  ;;  %v3817_v19 = vld [vmem:[#allocation18_spill] sm:$0xff] }
 0x1c8   : > { %v1596_v60 = vsub.f32 0.5, %v1564_v13  ;;  %v1247_v41 = vmul.f32 %v3142_v63, %v1215_v59  ;;  %v1566_v34 = vmul.f32 %v3808_v58, %v1374_v56  ;;  %v1120_v18 = vmul.f32 0.5307027, %v3809_v26 }
 0x1c9   : > { %v1627_v27 = vmul.f32 %v1595_v28, %v3807_v38  ;;  %v1657_v4 = vadd.f32 %v1625_v21, %v1529_v24  ;;  %v1341_v47 = vadd.f32 0.1274148, %v1309_v43  ;;  %v1658_v62 = vadd.f32 %v1626_v23, %v1530_v50  ;;  %v3816_v23 = vld [vmem:[#allocation17_spill] sm:$0xff] }
 0x1ca   : > { %v1532_v15 = vmul.f32 0.5, %v3810_v2  ;;  %v1279_v11 = vadd.f32 -0.14224836, %v1247_v41  ;;  %v1688_v29 = vmul.f32 %v1656_v61, %v828_v20  ;;  %v1152_v9 = vadd.f32 -0.72657603, %v1120_v18  ;;  %v947_v18 = vpop.f32.mrf.mxu1 }
 0x1cb   : > { %v1659_v33 = vadd.f32 %v1627_v27, %v1531_v7  ;;  %v1689_v39 = vmul.f32 %v1657_v4, %v830_v51  ;;  %v1373_v57 = vmul.f32 %v3128_v10, %v1341_v47  ;;  %v1690_v54 = vmul.f32 %v1658_v62, %v941_v52  ;;  %v834_v10 = vpop.f32.mrf.mxu0  ;;  %v3818_v51 = vld [vmem:[#allocation45_spill] sm:$0xff] }
 0x1cc   : > { %v3811_v31 = vand.u32 2147483647, %v3810_v2  ;;  %v1311_v12 = vmul.f32 %v3142_v63, %v1279_v11  ;;  %v1122_v0 = vmul.f32 0.5307027, %v3812_v17  ;;  %v1598_v44 = vsub.f32 0.5, %v1566_v34 }
 0x1cd   : > { %v1691_v36 = vmul.f32 %v1659_v33, %v943_v16  ;;  %1916 = vmatprep.mubr.f32.mxu0 %v1689_v39  ;;  %v1565_v32 = vmul.f32 %v3813_v14, %v1373_v57  ;;  %v1184_v20 = vmul.f32 %v3809_v26, %v1152_v9  ;;  %v1121_v46 = vmul.f32 0.5307027, %v3814_v49  ;;  %v836_v16 = vpop.f32.mrf.mxu0 }
 0x1ce   : > { %v1628_v45 = vmul.f32 %v1596_v60, %v3811_v31  ;;  %1917 = vmatmul.mubr.f32.gmra.mxu0 %v1688_v29  ;;  %v1534_v52 = vmul.f32 0.5, %v3815_v1  ;;  %v1533_v40 = vmul.f32 0.5, %v3816_v23  ;;  %v1343_v24 = vadd.f32 0.1274148, %v1311_v12  ;;  %v3821_v60 = vld [vmem:[#allocation36_spill] sm:$0xff]  ;;  %v3823_v31 = vld [vmem:[#allocation50_spill] sm:$0xff] }
 0x1cf   : > { %2029 = vmatprep.mubr.f32.mxu1 %v1691_v36  ;;  %v1154_v28 = vadd.f32 -0.72657603, %v1122_v0  ;;  %v1597_v5 = vsub.f32 0.5, %v1565_v32  ;;  %v1535_v21 = vmul.f32 0.5, %v3817_v19  ;;  %v1216_v6 = vadd.f32 0.7107069, %v1184_v20 }
 0x1d0   : > { %2030 = vmatmul.mubr.f32.gmra.mxu1 %v1690_v54  ;;  %v1153_v13 = vadd.f32 -0.72657603, %v1121_v46  ;;  %v1660_v56 = vadd.f32 %v1628_v45, %v1532_v15  ;;  %v1375_v59 = vmul.f32 %v3142_v63, %v1343_v24  ;;  %v1123_v8 = vmul.f32 0.5307027, %v3818_v51  ;;  %v3822_v63 = vld [vmem:[#allocation47_spill] sm:$0xff]  ;;  %v949_v46 = vpop.f32.mrf.mxu1 }
 0x1d1   : > { %v1186_v50 = vmul.f32 %v3812_v17, %v1154_v28  ;;  %v3819_v7 = vand.u32 2147483647, %v3815_v1  ;;  %v3820_v27 = vand.u32 2147483647, %v3816_v23  ;;  %v1248_v61 = vmul.f32 %v3809_v26, %v1216_v6 }
 0x1d2   : > { %v1185_v4 = vmul.f32 %v3814_v49, %v1153_v13  ;;  %v1567_v41 = vmul.f32 %v3821_v60, %v1375_v59  ;;  %v1155_v58 = vadd.f32 -0.72657603, %v1123_v8  ;;  %v1124_v34 = vmul.f32 0.5307027, %v3822_v63 }
 0x1d3   : > { %v1630_v38 = vmul.f32 %v1598_v44, %v3819_v7  ;;  %v1629_v43 = vmul.f32 %v1597_v5, %v3820_v27  ;;  %v1218_v33 = vadd.f32 0.7107069, %v1186_v50  ;;  %v1692_v47 = vmul.f32 %v1660_v56, %v834_v10  ;;  %v3825_v7 = vld [vmem:[#allocation39_spill] sm:$0xff] }
 0x1d4   : > { %v1280_v39 = vadd.f32 -0.14224836, %v1248_v61  ;;  %v1217_v2 = vadd.f32 0.7107069, %v1185_v4  ;;  %v1599_v15 = vsub.f32 0.5, %v1567_v41  ;;  %v1187_v29 = vmul.f32 %v3818_v51, %v1155_v58  ;;  %v3827_v4 = vld [vmem:[#allocation19_spill] sm:$0xff] }
 0x1d5   : > { %v1661_v62 = vadd.f32 %v1629_v43, %v1533_v40  ;;  %v1250_v11 = vmul.f32 %v3812_v17, %v1218_v33  ;;  %v1156_v36 = vadd.f32 -0.72657603, %v1124_v34  ;;  %v1126_v45 = vmul.f32 0.5307027, %v3823_v31  ;;  %v3826_v43 = vld [vmem:[#allocation52_spill] sm:$0xff] }
 0x1d6   : > { %v1312_v9 = vmul.f32 %v3809_v26, %v1280_v39  ;;  %v1249_v54 = vmul.f32 %v3814_v49, %v1217_v2  ;;  %v3824_v12 = vand.u32 2147483647, %v3817_v19  ;;  %v1219_v14 = vadd.f32 0.7107069, %v1187_v29  ;;  %v3830_v29 = vld [vmem:[#allocation20_spill] sm:$0xff] }
 0x1d7   : > { %v1693_v57 = vmul.f32 %v1661_v62, %v836_v16  ;;  %v1282_v44 = vadd.f32 -0.14224836, %v1250_v11  ;;  %v1188_v32 = vmul.f32 %v3822_v63, %v1156_v36  ;;  %v1662_v20 = vadd.f32 %v1630_v38, %v1534_v52  ;;  %v3831_v36 = vld [vmem:[#allocation44_spill] sm:$0xff] }
 0x1d8   : > { %v1631_v0 = vmul.f32 %v1599_v15, %v3824_v12  ;;  %v1344_v10 = vadd.f32 0.1274148, %v1312_v9  ;;  %v1281_v1 = vadd.f32 -0.14224836, %v1249_v54  ;;  %v1158_v23 = vadd.f32 -0.72657603, %v1126_v45  ;;  %v840_v45 = vpop.f32.mrf.mxu0 }
 0x1d9   : > { %1922 = vmatprep.mubr.f32.mxu0 %v1693_v57  ;;  %v1314_v24 = vmul.f32 %v3812_v17, %v1282_v44  ;;  %v1251_v28 = vmul.f32 %v3818_v51, %v1219_v14  ;;  %v1220_v5 = vadd.f32 0.7107069, %v1188_v32  ;;  %v1694_v6 = vmul.f32 %v1662_v20, %v947_v18  ;;  %v3828_v18 = vld [vmem:[#allocation41_spill] sm:$0xff]  ;;  %v3829_v15 = vld [vmem:[#allocation55_spill] sm:$0xff] }
 0x1da   : > { %v1663_v40 = vadd.f32 %v1631_v0, %v1535_v21  ;;  %1923 = vmatmul.mubr.f32.gmra.mxu0 %v1692_v47  ;;  %v1376_v19 = vmul.f32 %v3809_v26, %v1344_v10  ;;  %v1313_v13 = vmul.f32 %v3814_v49, %v1281_v1  ;;  %v1190_v56 = vmul.f32 %v3823_v31, %v1158_v23 }
 0x1db   : > { %v1346_v59 = vadd.f32 0.1274148, %v1314_v24  ;;  %v1283_v50 = vadd.f32 -0.14224836, %v1251_v28  ;;  %v1252_v8 = vmul.f32 %v3822_v63, %v1220_v5  ;;  %v1125_v61 = vmul.f32 0.5307027, %v3826_v43 }
 0x1dc   : > { %v1695_v52 = vmul.f32 %v1663_v40, %v949_v46  ;;  %v1568_v21 = vmul.f32 %v3825_v7, %v1376_v19  ;;  %v1345_v38 = vadd.f32 0.1274148, %v1313_v13  ;;  %v1222_v27 = vadd.f32 0.7107069, %v1190_v56  ;;  %v3834_v40 = vld [vmem:[#allocation46_spill] sm:$0xff]  ;;  %v3837_v7 = vld [vmem:[#allocation23_spill] sm:$0xff] }
 0x1dd   : > { %v1536_v16 = vmul.f32 0.5, %v3827_v4  ;;  %v1378_v60 = vmul.f32 %v3812_v17, %v1346_v59  ;;  %v1315_v26 = vmul.f32 %v3818_v51, %v1283_v50  ;;  %v1284_v41 = vadd.f32 -0.14224836, %v1252_v8  ;;  %v3836_v13 = vld [vmem:[#allocation22_spill] sm:$0xff]  ;;  %v842_v50 = vpop.f32.mrf.mxu0 }
 0x1de   : > { %2035 = vmatprep.mubr.f32.mxu1 %v1695_v52  ;;  %v1600_v33 = vsub.f32 0.5, %v1568_v21  ;;  %v1377_v58 = vmul.f32 %v3814_v49, %v1345_v38  ;;  %v1254_v34 = vmul.f32 %v3823_v31, %v1222_v27  ;;  %v1157_v47 = vadd.f32 -0.72657603, %v1125_v61  ;;  %v3832_v49 = vld [vmem:[#allocation21_spill] sm:$0xff] }
 0x1df   : > { %2036 = vmatmul.mubr.f32.gmra.mxu1 %v1694_v6  ;;  %v1570_v62 = vmul.f32 %v3828_v18, %v1378_v60  ;;  %v1347_v39 = vadd.f32 0.1274148, %v1315_v26  ;;  %v1316_v2 = vmul.f32 %v3822_v63, %v1284_v41  ;;  %v1127_v11 = vmul.f32 0.5307027, %v3829_v15  ;;  %v953_v6 = vpop.f32.mrf.mxu1  ;;  %v3838_v38 = vld [vmem:[#allocation49_spill] sm:$0xff] }
 0x1e0   : > { %v1538_v17 = vmul.f32 0.5, %v3830_v29  ;;  %v1569_v57 = vmul.f32 %v3831_v36, %v1377_v58  ;;  %v1286_v9 = vadd.f32 -0.14224836, %v1254_v34  ;;  %v1189_v54 = vmul.f32 %v3826_v43, %v1157_v47 }
 0x1e1   : > { %v1537_v12 = vmul.f32 0.5, %v3832_v49  ;;  %v1379_v0 = vmul.f32 %v3818_v51, %v1347_v39  ;;  %v1348_v44 = vadd.f32 0.1274148, %v1316_v2  ;;  %v1159_v14 = vadd.f32 -0.72657603, %v1127_v11  ;;  %v955_v39 = vpop.f32.mrf.mxu1  ;;  %v3841_v2 = vld [vmem:[#allocation51_spill] sm:$0xff] }
 0x1e2   : > { %v1602_v32 = vsub.f32 0.5, %v1570_v62  ;;  %v1601_v20 = vsub.f32 0.5, %v1569_v57  ;;  %v1318_v46 = vmul.f32 %v3823_v31, %v1286_v9  ;;  %v1221_v10 = vadd.f32 0.7107069, %v1189_v54  ;;  %v3842_v57 = vld [vmem:[#allocation58_spill] sm:$0xff] }
 0x1e3   : > { %v3833_v1 = vand.u32 2147483647, %v3827_v4  ;;  %v1571_v24 = vmul.f32 %v3834_v40, %v1379_v0  ;;  %v1380_v28 = vmul.f32 %v3822_v63, %v1348_v44  ;;  %v1191_v5 = vmul.f32 %v3829_v15, %v1159_v14 }
 0x1e4   : > { %v3835_v19 = vand.u32 2147483647, %v3832_v49  ;;  %v1539_v56 = vmul.f32 0.5, %v3836_v13  ;;  %v1350_v52 = vadd.f32 0.1274148, %v1318_v46  ;;  %v1253_v59 = vmul.f32 %v3826_v43, %v1221_v10 }
 0x1e5   : > { %v1632_v23 = vmul.f32 %v1600_v33, %v3833_v1  ;;  %v1603_v8 = vsub.f32 0.5, %v1571_v24  ;;  %v1540_v21 = vmul.f32 0.5, %v3837_v7  ;;  %v1572_v27 = vmul.f32 %v3838_v38, %v1380_v28  ;;  %v3845_v24 = vld [vmem:[#allocation61_spill] sm:$0xff]  ;;  %v3849_v38 = vld [vmem:[#allocation26_spill] sm:$0xff] }
 0x1e6   : > { %v1633_v51 = vmul.f32 %v1601_v20, %v3835_v19  ;;  %v1223_v61 = vadd.f32 0.7107069, %v1191_v5  ;;  %v3839_v63 = vand.u32 2147483647, %v3830_v29  ;;  %v1382_v26 = vmul.f32 %v3823_v31, %v1350_v52  ;;  %v3844_v20 = vld [vmem:[#allocation24_spill] sm:$0xff]  ;;  %v3846_v19 = vld [vmem:[#allocation25_spill] sm:$0xff] }
 0x1e7   : > { %v1285_v41 = vadd.f32 -0.14224836, %v1253_v59  ;;  %v1664_v33 = vadd.f32 %v1632_v23, %v1536_v16  ;;  %v3840_v58 = vand.u32 2147483647, %v3836_v13  ;;  %v1604_v47 = vsub.f32 0.5, %v1572_v27 }
 0x1e8   : > { %v1634_v4 = vmul.f32 %v1602_v32, %v3839_v63  ;;  %v1665_v60 = vadd.f32 %v1633_v51, %v1537_v12  ;;  %v1255_v18 = vmul.f32 %v3829_v15, %v1223_v61  ;;  %v1574_v11 = vmul.f32 %v3841_v2, %v1382_v26 }
 0x1e9   : > { %v1635_v34 = vmul.f32 %v1603_v8, %v3840_v58  ;;  %v1317_v36 = vmul.f32 %v3826_v43, %v1285_v41  ;;  %v1128_v29 = vmul.f32 0.5307027, %v3842_v57  ;;  %v1696_v9 = vmul.f32 %v1664_v33, %v840_v45  ;;  %v3850_v41 = vld [vmem:[#allocation57_spill] sm:$0xff] }
 0x1ea   : > { %v1697_v62 = vmul.f32 %v1665_v60, %v842_v50  ;;  %v3843_v31 = vand.u32 2147483647, %v3837_v7  ;;  %v1287_v16 = vadd.f32 -0.14224836, %v1255_v18  ;;  %v1666_v12 = vadd.f32 %v1634_v4, %v1538_v17  ;;  %v846_v17 = vpop.f32.mrf.mxu0  ;;  %v3848_v50 = vld [vmem:[#allocation54_spill] sm:$0xff]  ;;  %v959_v18 = vpop.f32.mrf.mxu1 }
 0x1eb   : > { %v1667_v54 = vadd.f32 %v1635_v34, %v1539_v56  ;;  %v1606_v0 = vsub.f32 0.5, %v1574_v11  ;;  %v1349_v44 = vadd.f32 0.1274148, %v1317_v36  ;;  %v1160_v14 = vadd.f32 -0.72657603, %v1128_v29 }
 0x1ec   : > { %v1636_v49 = vmul.f32 %v1604_v47, %v3843_v31  ;;  %1928 = vmatprep.mubr.f32.mxu0 %v1697_v62  ;;  %v1542_v46 = vmul.f32 0.5, %v3844_v20  ;;  %v1319_v10 = vmul.f32 %v3829_v15, %v1287_v16  ;;  %v1130_v1 = vmul.f32 0.5307027, %v3251_v22  ;;  %v848_v36 = vpop.f32.mrf.mxu0 }
 0x1ed   : > { %v1699_v32 = vmul.f32 %v1667_v54, %v955_v39  ;;  %1929 = vmatmul.mubr.f32.gmra.mxu0 %v1696_v9  ;;  %v1698_v23 = vmul.f32 %v1666_v12, %v953_v6  ;;  %v1381_v45 = vmul.f32 %v3826_v43, %v1349_v44  ;;  %v1192_v40 = vmul.f32 %v3842_v57, %v1160_v14 }
 0x1ee   : > { %v1129_v28 = vmul.f32 0.5307027, %v3845_v24  ;;  %v1668_v5 = vadd.f32 %v1636_v49, %v1540_v21  ;;  %v1541_v51 = vmul.f32 0.5, %v3846_v19  ;;  %v1351_v13 = vadd.f32 0.1274148, %v1319_v10 }
 0x1ef   : > { %2041 = vmatprep.mubr.f32.mxu1 %v1699_v32  ;;  %v1162_v56 = vadd.f32 -0.72657603, %v1130_v1  ;;  %v3847_v52 = vand.u32 2147483647, %v3844_v20  ;;  %v1573_v8 = vmul.f32 %v3848_v50, %v1381_v45  ;;  %v1224_v6 = vadd.f32 0.7107069, %v1192_v40  ;;  %v961_v1 = vpop.f32.mrf.mxu1 }
 0x1f0   : > { %2042 = vmatmul.mubr.f32.gmra.mxu1 %v1698_v23  ;;  %v1161_v7 = vadd.f32 -0.72657603, %v1129_v28  ;;  %v1383_v43 = vmul.f32 %v3829_v15, %v1351_v13  ;;  %v1543_v27 = vmul.f32 0.5, %v3849_v38  ;;  %v1131_v21 = vmul.f32 0.5307027, %v3275_v30 }
 0x1f1   : > { %v1638_v59 = vmul.f32 %v1606_v0, %v3847_v52  ;;  %v1194_v61 = vmul.f32 %v3251_v22, %v1162_v56  ;;  %v1700_v63 = vmul.f32 %v1668_v5, %v846_v17  ;;  %v1605_v4 = vsub.f32 0.5, %v1573_v8 }
 0x1f2   : > { %v1256_v60 = vmul.f32 %v3842_v57, %v1224_v6  ;;  %v1193_v26 = vmul.f32 %v3845_v24, %v1161_v7  ;;  %v1575_v33 = vmul.f32 %v3850_v41, %v1383_v43  ;;  %v1163_v34 = vadd.f32 -0.72657603, %v1131_v21  ;;  %v3853_v7 = vld [vmem:[#allocation59_spill] sm:$0xff]  ;;  %v3854_v21 = vld [vmem:[#allocation53_spill] sm:$0xff] }
 0x1f3   : > { %v1226_v58 = vadd.f32 0.7107069, %v1194_v61  ;;  %v1132_v47 = vmul.f32 0.5307027, %v3295_v25  ;;  %v1670_v15 = vadd.f32 %v1638_v59, %v1542_v46  ;;  %v3851_v62 = vand.u32 2147483647, %v3846_v19 }
 0x1f4   : > { %v1288_v2 = vadd.f32 -0.14224836, %v1256_v60  ;;  %v1225_v11 = vadd.f32 0.7107069, %v1193_v26  ;;  %v1607_v29 = vsub.f32 0.5, %v1575_v33  ;;  %v1195_v54 = vmul.f32 %v3275_v30, %v1163_v34 }
 0x1f5   : > { %v1637_v39 = vmul.f32 %v1605_v4, %v3851_v62  ;;  %v1258_v9 = vmul.f32 %v3251_v22, %v1226_v58  ;;  %v1164_v31 = vadd.f32 -0.72657603, %v1132_v47  ;;  %v1134_v0 = vmul.f32 0.5307027, %v3327_v53  ;;  %v3855_v58 = vld [vmem:[#allocation60_spill] sm:$0xff] }
 0x1f6   : > { %v1320_v16 = vmul.f32 %v3842_v57, %v1288_v2  ;;  %v1257_v12 = vmul.f32 %v3845_v24, %v1225_v11  ;;  %v3852_v44 = vand.u32 2147483647, %v3849_v38  ;;  %v1227_v20 = vadd.f32 0.7107069, %v1195_v54  ;;  %v3856_v62 = vld [vmem:[#allocation56_spill] sm:$0xff]  ;;  %v852_v11 = vpop.f32.mrf.mxu0 }
 0x1f7   : > { %v1669_v49 = vadd.f32 %v1637_v39, %v1541_v51  ;;  %v1290_v32 = vadd.f32 -0.14224836, %v1258_v9  ;;  %v1196_v46 = vmul.f32 %v3295_v25, %v1164_v31  ;;  %v1166_v40 = vadd.f32 -0.72657603, %v1134_v0 }
 0x1f8   : > { %v1639_v14 = vmul.f32 %v1607_v29, %v3852_v44  ;;  %v1352_v23 = vadd.f32 0.1274148, %v1320_v16  ;;  %v1289_v45 = vadd.f32 -0.14224836, %v1257_v12  ;;  %v1259_v5 = vmul.f32 %v3275_v30, %v1227_v20  ;;  %v3857_v16 = vld [vmem:[#allocation27_spill] sm:$0xff] }
 0x1f9   : > { %v1701_v10 = vmul.f32 %v1669_v49, %v848_v36  ;;  %v1322_v17 = vmul.f32 %v3251_v22, %v1290_v32  ;;  %v1228_v19 = vadd.f32 0.7107069, %v1196_v46  ;;  %v1702_v51 = vmul.f32 %v1670_v15, %v959_v18  ;;  %v3859_v32 = vld [vmem:[#allocation31_spill] sm:$0xff] }
 0x1fa   : > { %v1671_v28 = vadd.f32 %v1639_v14, %v1543_v27  ;;  %v1384_v13 = vmul.f32 %v3842_v57, %v1352_v23  ;;  %v1321_v56 = vmul.f32 %v3845_v24, %v1289_v45  ;;  %v1198_v52 = vmul.f32 %v3327_v53, %v1166_v40  ;;  %v965_v14 = vpop.f32.mrf.mxu1  ;;  %v854_v45 = vpop.f32.mrf.mxu0 }
 0x1fb   : > { %1934 = vmatprep.mubr.f32.mxu0 %v1701_v10  ;;  %v1354_v50 = vadd.f32 0.1274148, %v1322_v17  ;;  %v1291_v8 = vadd.f32 -0.14224836, %v1259_v5  ;;  %v1260_v6 = vmul.f32 %v3295_v25, %v1228_v19  ;;  %v1133_v61 = vmul.f32 0.5307027, %v3348_v42 }
 0x1fc   : > { %v1703_v59 = vmul.f32 %v1671_v28, %v961_v1  ;;  %1935 = vmatmul.mubr.f32.gmra.mxu0 %v1700_v63  ;;  %v1576_v43 = vmul.f32 %v3853_v7, %v1384_v13  ;;  %v1353_v38 = vadd.f32 0.1274148, %v1321_v56  ;;  %v1230_v27 = vadd.f32 0.7107069, %v1198_v52  ;;  %v3861_v17 = vld [vmem:[#allocation29_spill] sm:$0xff] }
 0x1fd   : > { %2437 = vpow2.f32 %v3854_v21  ;;  %v1386_v57 = vmul.f32 %v3251_v22, %v1354_v50  ;;  %v1323_v4 = vmul.f32 %v3275_v30, %v1291_v8  ;;  %v1292_v60 = vadd.f32 -0.14224836, %v1260_v6  ;;  %v3863_v56 = vld [vmem:[#allocation33_spill] sm:$0xff] }
 0x1fe   : > { %2047 = vmatprep.mubr.f32.mxu1 %v1703_v59  ;;  %v1608_v26 = vsub.f32 0.5, %v1576_v43  ;;  %v1385_v41 = vmul.f32 %v3845_v24, %v1353_v38  ;;  %v1262_v63 = vmul.f32 %v3327_v53, %v1230_v27  ;;  %v1165_v33 = vadd.f32 -0.72657603, %v1133_v61  ;;  %v967_v43 = vpop.f32.mrf.mxu1 }
 0x1ff   : > { %2048 = vmatmul.mubr.f32.gmra.mxu1 %v1702_v51  ;;  %v1578_v34 = vmul.f32 %v3855_v58, %v1386_v57  ;;  %v1355_v47 = vadd.f32 0.1274148, %v1323_v4  ;;  %v1324_v18 = vmul.f32 %v3295_v25, %v1292_v60  ;;  %v1135_v15 = vmul.f32 0.5307027, %v3398_v55 }
 0x200   : > { %2439 = vpow2.f32 %v3856_v62  ;;  %v1577_v22 = vmul.f32 %v3268_v35, %v1385_v41  ;;  %v1294_v39 = vadd.f32 -0.14224836, %v1262_v63  ;;  %v1197_v2 = vmul.f32 %v3348_v42, %v1165_v33 }
 0x201   : > { %v1387_v24 = vmul.f32 %v3275_v30, %v1355_v47  ;;  %v1356_v36 = vadd.f32 0.1274148, %v1324_v18  ;;  %v1167_v29 = vadd.f32 -0.72657603, %v1135_v15  ;;  %v1610_v9 = vsub.f32 0.5, %v1578_v34 }
 0x202   : > { %v1609_v54 = vsub.f32 0.5, %v1577_v22  ;;  %v1326_v31 = vmul.f32 %v3327_v53, %v1294_v39  ;;  %v1229_v49 = vadd.f32 0.7107069, %v1197_v2  ;;  %2441 = vpow2.f32 %v3317_v48 }
 0x203   : > { %v3858_v12 = vand.u32 2147483647, %v3857_v16  ;;  %v1579_v35 = vmul.f32 %v3282_v3, %v1387_v24  ;;  %v1199_v44 = vmul.f32 %v3398_v55, %v1167_v29  ;;  %v1545_v20 = vmul.f32 0.5, %v3859_v32 }
 0x204   : > { %v3860_v30 = vand.u32 2147483647, %v3859_v32  ;;  %v1358_v10 = vadd.f32 0.1274148, %v1326_v31  ;;  %v1261_v1 = vmul.f32 %v3348_v42, %v1229_v49  ;;  %v1544_v23 = vmul.f32 0.5, %v3857_v16 }
 0x205   : > { %v1640_v0 = vmul.f32 %v1608_v26, %v3858_v12  ;;  %v1611_v48 = vsub.f32 0.5, %v1579_v35  ;;  %v1388_v40 = vmul.f32 %v3295_v25, %v1356_v36  ;;  %v1231_v28 = vadd.f32 0.7107069, %v1199_v44  ;;  %v3869_v35 = vld [vmem:[#allocation37_spill] sm:$0xff] }
 0x206   : > { %v1641_v46 = vmul.f32 %v1609_v54, %v3860_v30  ;;  %v3862_v3 = vand.u32 2147483647, %v3861_v17  ;;  %v1293_v51 = vadd.f32 -0.14224836, %v1261_v1  ;;  %v1547_v52 = vmul.f32 0.5, %v3863_v56  ;;  %v3867_v54 = vld [vmem:[#allocation42_spill] sm:$0xff] }
 0x207   : > { %v1672_v13 = vadd.f32 %v1640_v0, %v1544_v23  ;;  %v3864_v59 = vand.u32 2147483647, %v3863_v56  ;;  %v1263_v8 = vmul.f32 %v3398_v55, %v1231_v28  ;;  %v1546_v6 = vmul.f32 0.5, %v3861_v17 }
 0x208   : > { %v1642_v5 = vmul.f32 %v1610_v9, %v3862_v3  ;;  %v1673_v19 = vadd.f32 %v1641_v46, %v1545_v20  ;;  %v1390_v25 = vmul.f32 %v3327_v53, %v1358_v10  ;;  %v1325_v38 = vmul.f32 %v3348_v42, %v1293_v51  ;;  %v971_v9 = vpop.f32.mrf.mxu1  ;;  %v3871_v20 = vld [vmem:[#allocation48_spill] sm:$0xff] }
 0x209   : > { %v1643_v50 = vmul.f32 %v1611_v48, %v3864_v59  ;;  %v1704_v27 = vmul.f32 %v1672_v13, %v852_v11  ;;  %v1580_v21 = vmul.f32 %v3313_v37, %v1388_v40  ;;  %v1295_v57 = vadd.f32 -0.14224836, %v1263_v8  ;;  %v858_v37 = vpop.f32.mrf.mxu0  ;;  %v3865_v11 = vld [vmem:[#allocation35_spill] sm:$0xff] }
 0x20a   : > { %v1705_v7 = vmul.f32 %v1673_v19, %v854_v45  ;;  %v2438_v4 = vpop.eup %2437  ;;  %v1674_v60 = vadd.f32 %v1642_v5, %v1546_v6  ;;  %v1357_v26 = vadd.f32 0.1274148, %v1325_v38  ;;  %v3866_v24 = vand.u32 2147483647, %v3865_v11  ;;  %v973_v45 = vpop.f32.mrf.mxu1 }
 0x20b   : > { %v1675_v61 = vadd.f32 %v1643_v50, %v1547_v52  ;;  %v1327_v63 = vmul.f32 %v3398_v55, %v1295_v57  ;;  %v1582_v58 = vmul.f32 %v2438_v4, %v1390_v25  ;;  %v1612_v47 = vsub.f32 0.5, %v1580_v21  ;;  %v860_v12 = vpop.f32.mrf.mxu0 }
 0x20c   : > { %1940 = vmatprep.mubr.f32.mxu0 %v1705_v7  ;;  %v1706_v33 = vmul.f32 %v1674_v60, %v965_v14  ;;  %v1389_v34 = vmul.f32 %v3348_v42, %v1357_v26  ;;  %v1549_v31 = vmul.f32 0.5, %v3867_v54  ;;  %v3868_v42 = vand.u32 2147483647, %v3867_v54 }
 0x20d   : > { %v1707_v41 = vmul.f32 %v1675_v61, %v967_v43  ;;  %1941 = vmatmul.mubr.f32.gmra.mxu0 %v1704_v27  ;;  %v2440_v53 = vpop.eup %2439  ;;  %v1359_v18 = vadd.f32 0.1274148, %v1327_v63  ;;  %v1614_v39 = vsub.f32 0.5, %v1582_v58  ;;  %v1644_v36 = vmul.f32 %v1612_v47, %v3866_v24 }
 0x20e   : > { %v1581_v15 = vmul.f32 %v2440_v53, %v1389_v34  ;;  %v1548_v16 = vmul.f32 0.5, %v3865_v11  ;;  %v3870_v44 = vand.u32 2147483647, %v3869_v35  ;;  %v1551_v30 = vmul.f32 0.5, %v3871_v20 }
 0x20f   : > { %2053 = vmatprep.mubr.f32.mxu1 %v1707_v41  ;;  %v1391_v62 = vmul.f32 %v3398_v55, %v1359_v18  ;;  %v2442_v22 = vpop.eup %2441  ;;  %v3872_v46 = vand.u32 2147483647, %v3871_v20  ;;  %v1550_v1 = vmul.f32 0.5, %v3869_v35 }
 0x210   : > { %2054 = vmatmul.mubr.f32.gmra.mxu1 %v1706_v33  ;;  %v1613_v2 = vsub.f32 0.5, %v1581_v15  ;;  %v1646_v55 = vmul.f32 %v1614_v39, %v3870_v44  ;;  %v1676_v32 = vadd.f32 %v1644_v36, %v1548_v16 }
 0x211   : > { %v1583_v29 = vmul.f32 %v2442_v22, %v1391_v62 }
 0x212   : > { %v1645_v49 = vmul.f32 %v1613_v2, %v3868_v42  ;;  %v1708_v48 = vmul.f32 %v1676_v32, %v858_v37  ;;  %v1678_v28 = vadd.f32 %v1646_v55, %v1550_v1 }
 0x213   : > { %v1615_v0 = vsub.f32 0.5, %v1583_v29 }
 0x214   : > { %v1677_v14 = vadd.f32 %v1645_v49, %v1549_v31  ;;  %v1710_v3 = vmul.f32 %v1678_v28, %v971_v9 }
 0x215   : > { %v1647_v10 = vmul.f32 %v1615_v0, %v3872_v46 }
 0x216   : > { %v1709_v23 = vmul.f32 %v1677_v14, %v860_v12 }
 0x217   : > { %v1679_v40 = vadd.f32 %v1647_v10, %v1551_v30 }
 0x218   : > { %1946 = vmatprep.mubr.f32.mxu0 %v1709_v23 }
 0x219   : > { %v1711_v17 = vmul.f32 %v1679_v40, %v973_v45  ;;  %1947 = vmatmul.mubr.f32.gmra.mxu0 %v1708_v48 }
 0x21b   : > { %2059 = vmatprep.mubr.f32.mxu1 %v1711_v17 }
 0x21c   : > { %2060 = vmatmul.mubr.f32.gmra.mxu1 %v1710_v3 }
 0x26d   : > { %v1906_v5 = vpop.f32.mrf.mxu0 }
 0x26f   : > { %v1908_v51 = vpop.f32.mrf.mxu0 }
 0x270   : > { %v2019_v19 = vpop.f32.mrf.mxu1 }
 0x271   : > { %v2020_v13 = vadd.f32 %v2019_v19, %v1906_v5 }
 0x272   : > { %v2021_v56 = vpop.f32.mrf.mxu1 }
 0x273   : > { %2066 = vst [vmem:[%s3561_s20] sm:$0xff] %v2020_v13  ;;  %v2022_v52 = vadd.f32 %v2021_v56, %v1908_v51 }
 0x275   : > { %2067 = vst [vmem:[%s3561_s20 + $0x8] sm:$0xff] %v2022_v52  ;;  %v1912_v59 = vpop.f32.mrf.mxu0 }
 0x277   : > { %v1914_v8 = vpop.f32.mrf.mxu0 }
 0x280   : > { %v2025_v50 = vpop.f32.mrf.mxu1 }
 0x281   : > { %v2026_v6 = vadd.f32 %v2025_v50, %v1912_v59 }
 0x282   : > { %v2027_v7 = vpop.f32.mrf.mxu1 }
 0x283   : > { %2068 = vst [vmem:[%s3561_s20 + $0x10] sm:$0xff] %v2026_v6  ;;  %v2028_v43 = vadd.f32 %v2027_v7, %v1914_v8 }
 0x285   : > { %2069 = vst [vmem:[%s3561_s20 + $0x18] sm:$0xff] %v2028_v43 }
 0x28e   : > { %v1918_v25 = vpop.f32.mrf.mxu0 }
 0x290   : > { %v2031_v38 = vpop.f32.mrf.mxu1  ;;  %v1920_v61 = vpop.f32.mrf.mxu0 }
 0x291   : > { %v2032_v27 = vadd.f32 %v2031_v38, %v1918_v25 }
 0x292   : > { %v2033_v21 = vpop.f32.mrf.mxu1 }
 0x293   : > { %2070 = vst [vmem:[%s3561_s20 + $0x20] sm:$0xff] %v2032_v27  ;;  %v2034_v57 = vadd.f32 %v2033_v21, %v1920_v61 }
 0x295   : > { %2071 = vst [vmem:[%s3561_s20 + $0x28] sm:$0xff] %v2034_v57 }
 0x29a   : > { %v1924_v4 = vpop.f32.mrf.mxu0 }
 0x29c   : > { %v1926_v26 = vpop.f32.mrf.mxu0 }
 0x29f   : > { %v2037_v60 = vpop.f32.mrf.mxu1 }
 0x2a0   : > { %v2038_v41 = vadd.f32 %v2037_v60, %v1924_v4 }
 0x2a1   : > { %v2039_v63 = vpop.f32.mrf.mxu1 }
 0x2a2   : > { %2072 = vst [vmem:[%s3561_s20 + $0x30] sm:$0xff] %v2038_v41  ;;  %v2040_v33 = vadd.f32 %v2039_v63, %v1926_v26 }
 0x2a4   : > { %2073 = vst [vmem:[%s3561_s20 + $0x38] sm:$0xff] %v2040_v33 }
 0x2ad   : > { %v1930_v58 = vpop.f32.mrf.mxu0 }
 0x2af   : > { %v1932_v53 = vpop.f32.mrf.mxu0 }
 0x2b0   : > { %v2043_v34 = vpop.f32.mrf.mxu1 }
 0x2b1   : > { %v2044_v47 = vadd.f32 %v2043_v34, %v1930_v58 }
 0x2b2   : > { %v2045_v18 = vpop.f32.mrf.mxu1 }
 0x2b3   : > { %2074 = vst [vmem:[%s3561_s20 + $0x40] sm:$0xff] %v2044_v47  ;;  %v2046_v15 = vadd.f32 %v2045_v18, %v1932_v53 }
 0x2b5   : > { %2075 = vst [vmem:[%s3561_s20 + $0x48] sm:$0xff] %v2046_v15 }
 0x2bc   : > { %v1936_v37 = vpop.f32.mrf.mxu0 }
 0x2be   : > { %v1938_v22 = vpop.f32.mrf.mxu0 }
 0x2bf   : > { %v2049_v62 = vpop.f32.mrf.mxu1 }
 0x2c0   : > { %v2050_v39 = vadd.f32 %v2049_v62, %v1936_v37 }
 0x2c1   : > { %v2051_v2 = vpop.f32.mrf.mxu1 }
 0x2c2   : > { %2076 = vst [vmem:[%s3561_s20 + $0x50] sm:$0xff] %v2050_v39  ;;  %v2052_v11 = vadd.f32 %v2051_v2, %v1938_v22 }
 0x2c4   : > { %2077 = vst [vmem:[%s3561_s20 + $0x58] sm:$0xff] %v2052_v11 }
 0x2cd   : > { %v1942_v24 = vpop.f32.mrf.mxu0 }
 0x2cf   : > { %v1944_v29 = vpop.f32.mrf.mxu0 }
 0x2d0   : > { %v2055_v36 = vpop.f32.mrf.mxu1 }
 0x2d1   : > { %v2056_v9 = vadd.f32 %v2055_v36, %v1942_v24 }
 0x2d2   : > { %v2057_v54 = vpop.f32.mrf.mxu1 }
 0x2d3   : > { %2078 = vst [vmem:[%s3561_s20 + $0x60] sm:$0xff] %v2056_v9  ;;  %v2058_v31 = vadd.f32 %v2057_v54, %v1944_v29 }
 0x2d5   : > { %2079 = vst [vmem:[%s3561_s20 + $0x68] sm:$0xff] %v2058_v31 }
 0x2d9   : > { %v1948_v42 = vpop.f32.mrf.mxu0 }
 0x2db   : > { %v1950_v16 = vpop.f32.mrf.mxu0 }
 0x2dc   : > { %v2061_v49 = vpop.f32.mrf.mxu1 }
 0x2dd   : > { %v2062_v12 = vadd.f32 %v2061_v49, %v1948_v42 }
 0x2de   : > { %v2063_v0 = vpop.f32.mrf.mxu1 }
 0x2df   : > { %2080 = vst [vmem:[%s3561_s20 + $0x70] sm:$0xff] %v2062_v12  ;;  %v2064_v35 = vadd.f32 %v2063_v0, %v1950_v16 }
 0x2e1   : > { %2081 = vst [vmem:[%s3561_s20 + $0x78] sm:$0xff] %v2064_v35 }
 0x2e2   : > { %2536 = shalt.err (!%p2533_p5)
}
 0x2e3   : > { %s2537_s25 = scalar_lea.hbm %s3582_s8, 2048  ;;  %s2541_s9 = scalar_lea.hbm %s3637_s3, 4096 }
 0x2e4   : > { %p2538_p10 = scmp.ne.s32.totalorder %s3582_s8, %s2537_s25  ;;  %p2542_p6 = scmp.lt.s32.totalorder %s3582_s8, %s3637_s3 }
 0x2e5   : > { %p2543_p12 = scmp.lt.s32.totalorder %s2541_s9, %s2537_s25 }
 0x2e6   : > { %p2539_p1 = pnand %p2538_p10, %p2737_p7 }
 0x2e7   : > { %p2544_p3 = por %p2543_p12, %p2542_p6 }
 0x2e8   : > { %p2540_p4 = pneg %p2539_p1 }
 0x2ea   : > { %p2545_p8 = pnand %p2544_p3, %p2540_p4 }
 0x2ec   : > { %2548 = shalt.err (!%p2545_p8)
}
 0x2ed   : > { %s2617_s20 = smov 256   ;;  %s2618_s22 = smov 16  }
 0x2ee   : > { %2236 = dma.vmem_to_hbm [thread:$0]  (%p2737_p7), %s3584_s24, 2048, %s3582_s8, %s2083_s11, %s2617_s20, %s2617_s20, %s2618_s22  }
 0x2ef PF: > { %s2112_s10 = sand.u32 1, %s2587_s12   ;;  %p3873_p9 = scmp.ne.s32.totalorder %s3723_s23, 0 }
 0x2f0   : > { %p3874_p11 = scmp.ge.s32.totalorder %s2607_s17, 2  ;;  %s2113_s7 = scalar_lea.sflag [#allocation4], %s2112_s10 }
 0x2f2   : > { %p2250_p2 = pnand %p3874_p11, %p3873_p9 }
 0x2f4   : > { %p2251_p13 = pneg %p2250_p2 }
 0x2f6   : > { %2582 = dma.done.wait (%p2251_p13), %s2113_s7, 2048  }
 0x2f7   : > { %2584 = vsyncadd (%p2251_p13), %s2113_s7, 4294965248  ;;  %s20_s17 = sadd.s32 1, %s2607_s17   ;;  %s3875_s12 = smov %s2591_s13 }
 0x2f8   : > { %p17_p0 = scmp.ge.s32.totalorder %s20_s17, 4   ;;  %s3876_s13 = smov %s2595_s14 }
 0x2f9   : > { %s3877_s14 = smov %s2746_s4  ;;  %s3878_s15 = smov %s2603_s16 }
 0x2fa   : > { %s3879_s16 = smov %s3881_s19  ;;  %19 = sbr.rel (!%p17_p0) target bundleno = 7 (0x7), region = 87 }
 0x2ff   :  { %2118 = vsyncpa [#allocation3], 1 }
 0x300   :  { %2120 = vsyncpa [#allocation3 + $0x1], 1 }
 0x301   :  { %2121 = vsyncpa [#allocation6], 1 }
 0x302   :  { %2122 = vsyncpa [#allocation4], 1 }
 0x303   :  { %2124 = vsyncpa [#allocation4 + $0x1], 1 }

</bundles_post_ra>
